<compile_context>
chip_gen: v7x
topology: tpu7x:2x2x1
jax: 0.10.0
libtpu: 0.0.40
codegen_flags: <defaults>
</compile_context>

<pallas_src>
import jax
import jax.numpy as jnp
from jax.experimental import pallas as pl
from jax.experimental.pallas import tpu as pltpu

d_model = 512
d_ff = 2048
LN_EPS = 1e-5


def _round_up(n, k):
    return ((n + k - 1) // k) * k


def ffn_ln_kernel(x_ref, w1_ref, w2_ref, o_ref):
    # x_ref:  (tm, d_model)   f32 token tile
    # w1_ref: (d_model, d_ff) bf16 full weight (resident across the grid)
    # w2_ref: (d_ff, d_model) bf16 full weight (resident across the grid)
    x = x_ref[...]                              # f32, kept for residual + LN

    # Linear(d_model -> d_ff, bias=False) + ReLU  -- bf16 MXU, f32 accumulate
    h = jnp.dot(x.astype(jnp.bfloat16), w1_ref[...],
                preferred_element_type=jnp.float32)
    h = jnp.maximum(h, 0.0)

    # Linear(d_ff -> d_model, bias=False) + residual (residual stays f32)
    y = jnp.dot(h.astype(jnp.bfloat16), w2_ref[...],
                preferred_element_type=jnp.float32) + x

    # LayerNorm over d_model with gamma=1, beta=0 (fresh nn.LayerNorm(d_model) in forward)
    mean = jnp.mean(y, axis=-1, keepdims=True)
    centered = y - mean
    var = jnp.mean(centered * centered, axis=-1, keepdims=True)
    o_ref[...] = (centered * jax.lax.rsqrt(var + LN_EPS)).astype(o_ref.dtype)


def poswise_feed_forward(x, w1, w2, *, tm=256):
    """x: [batch, seq, d_model] float32; w1: [d_model, d_ff]; w2: [d_ff, d_model].

    Returns [batch, seq, d_model] float32.
    """
    b, s, dm = x.shape
    assert dm == d_model
    m = b * s

    x2d = x.reshape(m, dm).astype(jnp.float32)

    # Pick a sublane-dense token tile and pad the token count so every tile is full
    # (no ragged last tile -> no masked partial stores).
    tm_eff = min(tm, _round_up(m, 8))
    m_pad = _round_up(m, tm_eff)
    if m_pad != m:
        x2d = jnp.pad(x2d, ((0, m_pad - m), (0, 0)))

    # bf16 weights: halves the resident VMEM footprint and runs at bf16 MXU rate.
    w1_b = w1.astype(jnp.bfloat16)
    w2_b = w2.astype(jnp.bfloat16)

    grid = (m_pad // tm_eff,)

    out2d = pl.pallas_call(
        ffn_ln_kernel,
        out_shape=jax.ShapeDtypeStruct((m_pad, dm), jnp.float32),
        grid=grid,
        in_specs=[
            pl.BlockSpec((tm_eff, d_model), lambda i: (i, 0)),   # token tile
            pl.BlockSpec((d_model, d_ff), lambda i: (0, 0)),     # W1 (resident)
            pl.BlockSpec((d_ff, d_model), lambda i: (0, 0)),     # W2 (resident)
        ],
        out_specs=pl.BlockSpec((tm_eff, d_model), lambda i: (i, 0)),
        compiler_params=pltpu.CompilerParams(
            dimension_semantics=("parallel",),   # shard token tiles across TCs
            vmem_limit_bytes=48 << 20,           # headroom below v7x's 64 MiB VMEM
        ),
    )(x2d, w1_b, w2_b)

    if m_pad != m:
        out2d = out2d[:m]
    return out2d.reshape(b, s, dm)


def _reference(x, w1, w2):
    h = jnp.maximum(x @ w1, 0.0)
    y = h @ w2 + x
    mean = jnp.mean(y, axis=-1, keepdims=True)
    var = jnp.mean((y - mean) ** 2, axis=-1, keepdims=True)
    return (y - mean) * jax.lax.rsqrt(var + LN_EPS)


if __name__ == "__main__":
    key = jax.random.PRNGKey(0)
    k_x, k_w1, k_w2 = jax.random.split(key, 3)

    batch, seq = 2, 8
    x = jax.random.normal(k_x, (batch, seq, d_model), dtype=jnp.float32)

    # Deterministic kaiming-uniform-like init: U(-1/sqrt(fan_in), 1/sqrt(fan_in))
    w1 = jax.random.uniform(k_w1, (d_model, d_ff), dtype=jnp.float32,
                            minval=-1.0 / (d_model ** 0.5),
                            maxval=1.0 / (d_model ** 0.5))
    w2 = jax.random.uniform(k_w2, (d_ff, d_model), dtype=jnp.float32,
                            minval=-1.0 / (d_ff ** 0.5),
                            maxval=1.0 / (d_ff ** 0.5))

    out = jax.block_until_ready(poswise_feed_forward(x, w1, w2))

    ref = _reference(x, w1, w2)
    assert out.shape == (batch, seq, d_model)
    # Tolerance relaxed vs a pure-f32 implementation: matmuls run in bf16 (f32 accumulate).
    assert jnp.allclose(out, ref, atol=2e-2, rtol=2e-2), "mismatch vs reference"

    print("KERNEL_OK")
</pallas_src>

<mosaic_0001>
module attributes {stable_mosaic.version = 11 : i64} {
  func.func @ffn_ln_kernel(%arg0: i32, %arg1: memref<16x512xf32, #tpu.memory_space<vmem>>, %arg2: memref<512x2048xbf16, #tpu.memory_space<vmem>>, %arg3: memref<2048x512xbf16, #tpu.memory_space<vmem>>, %arg4: memref<16x512xf32, #tpu.memory_space<vmem>>) attributes {dimension_semantics = [#tpu.dimension_semantics<parallel>], iteration_bounds = array<i64: 1>, scalar_prefetch = 0 : i64, scratch_operands = 0 : i64, tpu.core_type = #tpu.core_type<tc>, window_params = [{transform_indices = @transform_0, window_bounds = array<i64: 16, 512>}, {pipeline_mode = #tpu.pipeline_mode<synchronous>, transform_indices = @transform_1, window_bounds = array<i64: 512, 2048>}, {pipeline_mode = #tpu.pipeline_mode<synchronous>, transform_indices = @transform_2, window_bounds = array<i64: 2048, 512>}, {transform_indices = @transform_3, window_bounds = array<i64: 16, 512>}]} {
    %c0 = arith.constant 0 : index
    %c0_0 = arith.constant 0 : index
    %0 = vector.load %arg1[%c0, %c0_0] : memref<16x512xf32, #tpu.memory_space<vmem>>, vector<16x512xf32>
    %1 = arith.truncf %0 : vector<16x512xf32> to vector<16x512xbf16>
    %c0_1 = arith.constant 0 : index
    %c0_2 = arith.constant 0 : index
    %2 = vector.load %arg2[%c0_1, %c0_2] : memref<512x2048xbf16, #tpu.memory_space<vmem>>, vector<512x2048xbf16>
    %cst = arith.constant dense<0.000000e+00> : vector<16x2048xf32>
    %3 = tpu.matmul %1, %2, %cst {dimension_numbers = #tpu.dot_dimension_numbers<[1], [0], [0], [1], [0, 0, 1, 1], [], []>} : vector<16x512xbf16>, vector<512x2048xbf16>, vector<16x2048xf32> -> vector<16x2048xf32>
    %cst_3 = arith.constant 0.000000e+00 : f32
    %4 = vector.broadcast %cst_3 : f32 to vector<16x2048xf32>
    %5 = arith.maximumf %3, %4 : vector<16x2048xf32>
    %6 = arith.truncf %5 : vector<16x2048xf32> to vector<16x2048xbf16>
    %c0_4 = arith.constant 0 : index
    %c0_5 = arith.constant 0 : index
    %7 = vector.load %arg3[%c0_4, %c0_5] : memref<2048x512xbf16, #tpu.memory_space<vmem>>, vector<2048x512xbf16>
    %cst_6 = arith.constant dense<0.000000e+00> : vector<16x512xf32>
    %8 = tpu.matmul %6, %7, %cst_6 {dimension_numbers = #tpu.dot_dimension_numbers<[1], [0], [0], [1], [0, 0, 1, 1], [], []>} : vector<16x2048xbf16>, vector<2048x512xbf16>, vector<16x512xf32> -> vector<16x512xf32>
    %9 = arith.addf %8, %0 : vector<16x512xf32>
    %cst_7 = arith.constant dense<0.000000e+00> : vector<16xf32>
    %10 = vector.multi_reduction <add>, %9, %cst_7 [1] : vector<16x512xf32> to vector<16xf32>
    %11 = vector.shape_cast %10 : vector<16xf32> to vector<16x1xf32>
    %cst_8 = arith.constant 5.120000e+02 : f32
    %12 = vector.broadcast %cst_8 : f32 to vector<16x1xf32>
    %13 = arith.divf %11, %12 : vector<16x1xf32>
    %14 = vector.broadcast %13 : vector<16x1xf32> to vector<16x512xf32>
    %15 = arith.subf %9, %14 : vector<16x512xf32>
    %16 = arith.mulf %15, %15 : vector<16x512xf32>
    %cst_9 = arith.constant dense<0.000000e+00> : vector<16xf32>
    %17 = vector.multi_reduction <add>, %16, %cst_9 [1] : vector<16x512xf32> to vector<16xf32>
    %18 = vector.shape_cast %17 : vector<16xf32> to vector<16x1xf32>
    %cst_10 = arith.constant 5.120000e+02 : f32
    %19 = vector.broadcast %cst_10 : f32 to vector<16x1xf32>
    %20 = arith.divf %18, %19 : vector<16x1xf32>
    %cst_11 = arith.constant 9.99999974E-6 : f32
    %21 = vector.broadcast %cst_11 : f32 to vector<16x1xf32>
    %22 = arith.addf %20, %21 : vector<16x1xf32>
    %23 = math.rsqrt %22 : vector<16x1xf32>
    %24 = vector.broadcast %23 : vector<16x1xf32> to vector<16x512xf32>
    %25 = arith.mulf %15, %24 : vector<16x512xf32>
    %c0_12 = arith.constant 0 : index
    %c0_13 = arith.constant 0 : index
    %26 = vector.load %arg4[%c0_12, %c0_13] : memref<16x512xf32, #tpu.memory_space<vmem>>, vector<16x512xf32>
    tpu.vector_store %arg4[%c0_12, %c0_13], %25 {strides = array<i32>} : memref<16x512xf32, #tpu.memory_space<vmem>>, vector<16x512xf32>,
    return
  }
  func.func @transform_0(%arg0: i32) -> (i32, i32) {
    %c0_i32 = arith.constant 0 : i32
    %c0_i32_0 = arith.constant 0 : i32
    return %arg0, %c0_i32 : i32, i32
  }
  func.func @transform_1(%arg0: i32) -> (i32, i32) {
    %c0_i32 = arith.constant 0 : i32
    %c0_i32_0 = arith.constant 0 : i32
    %c0_i32_1 = arith.constant 0 : i32
    return %c0_i32, %c0_i32_0 : i32, i32
  }
  func.func @transform_2(%arg0: i32) -> (i32, i32) {
    %c0_i32 = arith.constant 0 : i32
    %c0_i32_0 = arith.constant 0 : i32
    %c0_i32_1 = arith.constant 0 : i32
    return %c0_i32, %c0_i32_0 : i32, i32
  }
  func.func @transform_3(%arg0: i32) -> (i32, i32) {
    %c0_i32 = arith.constant 0 : i32
    %c0_i32_0 = arith.constant 0 : i32
    return %arg0, %c0_i32 : i32, i32
  }
}

</mosaic_0001>

<bundles_post_ra>
// kernel: tpu_custom_call.1
= control target key start
LH: loop header
LB: loop body
LE: loop exit
PB: predicated region body
PF: predicated region fallthrough
CT: control target
= control target key end

     0   :  { %8 = vsyncpa [#allocation3], 0  ;;  %s9907_s0 = inlined_call_operand.hbm [shape: f32[16,512], index: 0, kind: input, shape index: {}]   ;;  %s9908_s1 = inlined_call_operand.hbm [shape: bf16[512,2048], index: 1, kind: input, shape index: {}]   ;;  %s9909_s2 = inlined_call_operand.hbm [shape: bf16[2048,512], index: 2, kind: input, shape index: {}]   ;;  %s9910_s3 = inlined_call_operand.hbm [shape: f32[16,512], index: 3, kind: output, shape index: {}]  }
   0x1   :  { %9 = vsyncpa [#allocation6], 0 }
   0x2   :  { %10 = vsyncpa [#allocation4], 0  ;;  %s9719_s12 = smov [#allocation5]   ;;  %s9625_s16 = scalar_lea.hbm %s9908_s1, 65536 }
   0x3   :  { %s28_s13 = sshll.u32 %s9719_s12, 4  ;;  %p9626_p0 = scmp.ne.s32.totalorder %s9908_s1, %s9625_s16  ;;  %s29_s13 = int_to_ptr.vmem [resolvable:$true] %s28_s13 }
   0x4   :  { %p9629_p1 = scmp.lt.u32.totalorder %s9625_s16, %s9908_s1 }
   0x6   :  { %p9631_p2 = pnand %p9629_p1, %p9626_p0 }
   0x8   :  { %9634 = shalt.err (!%p9631_p2)
}
   0x9   :  { %s9635_s21 = scalar_lea.vmem %s29_s13, 65536  ;;  %p9640_p4 = scmp.lt.s32.totalorder %s29_s13, %s29_s13 }
   0xa   :  { %p9636_p3 = scmp.ne.s32.totalorder %s29_s13, %s9635_s21  ;;  %p9641_p5 = scmp.lt.s32.totalorder %s9635_s21, %s9635_s21 }
   0xc   :  { %p9642_p6 = por %p9641_p5, %p9640_p4 }
   0xe   :  { %p9643_p7 = pnand %p9642_p6, %p9636_p3 }
  0x10   :  { %9646 = shalt.err (!%p9643_p7)
}
  0x11   :  { %s9720_s22 = smov 1024   ;;  %s9721_s23 = smov 64  }
  0x12   :  { %34 = dma.hbm_to_vmem [thread:$0]  %s9908_s1, 65536, %s29_s13, [#allocation6], %s9720_s22, %s9720_s22, %s9721_s23  }
  0x13   :  { %s9722_s26 = smov [#allocation2]   ;;  %s9647_s30 = scalar_lea.hbm %s9907_s0, 1024 }
  0x14   :  { %s16_s27 = sshll.u32 %s9722_s26, 4  ;;  %p9648_p8 = scmp.ne.s32.totalorder %s9907_s0, %s9647_s30  ;;  %s17_s27 = int_to_ptr.vmem [resolvable:$true] %s16_s27 }
  0x15   :  { %p9651_p9 = scmp.lt.u32.totalorder %s9647_s30, %s9907_s0 }
  0x17   :  { %p9653_p10 = pnand %p9651_p9, %p9648_p8 }
  0x19   :  { %9656 = shalt.err (!%p9653_p10)
}
  0x1a   :  { %s9657_s8 = scalar_lea.vmem %s17_s27, 1024  ;;  %p9662_p12 = scmp.lt.s32.totalorder %s17_s27, %s17_s27 }
  0x1b   :  { %p9658_p11 = scmp.ne.s32.totalorder %s17_s27, %s9657_s8  ;;  %p9663_p13 = scmp.lt.s32.totalorder %s9657_s8, %s9657_s8 }
  0x1d   :  { %p9664_p0 = por %p9663_p13, %p9662_p12 }
  0x1f   :  { %p9665_p1 = pnand %p9664_p0, %p9658_p11 }
  0x21   :  { %9668 = shalt.err (!%p9665_p1)
}
  0x22   :  { %s9723_s1 = smov 512   ;;  %s9724_s9 = smov 32  }
  0x23   :  { %22 = dma.hbm_to_vmem [thread:$0]  %s9907_s0, 1024, %s17_s27, [#allocation3], %s9723_s1, %s9723_s1, %s9724_s9  }
  0x24   :  { %s9725_s12 = smov [#allocation7]   ;;  %s9669_s16 = scalar_lea.hbm %s9909_s2, 65536 }
  0x25   :  { %s40_s13 = sshll.u32 %s9725_s12, 4  ;;  %p9670_p2 = scmp.ne.s32.totalorder %s9909_s2, %s9669_s16  ;;  %s41_s13 = int_to_ptr.vmem [resolvable:$true] %s40_s13 }
  0x26   :  { %p9673_p3 = scmp.lt.u32.totalorder %s9669_s16, %s9909_s2 }
  0x28   :  { %p9675_p4 = pnand %p9673_p3, %p9670_p2 }
  0x2a   :  { %9678 = shalt.err (!%p9675_p4)
}
  0x2b   :  { %s9679_s21 = scalar_lea.vmem %s41_s13, 65536  ;;  %p9684_p6 = scmp.lt.s32.totalorder %s41_s13, %s41_s13 }
  0x2c   :  { %p9680_p5 = scmp.ne.s32.totalorder %s41_s13, %s9679_s21  ;;  %p9685_p7 = scmp.lt.s32.totalorder %s9679_s21, %s9679_s21 }
  0x2e   :  { %p9686_p8 = por %p9685_p7, %p9684_p6 }
  0x30   :  { %p9687_p9 = pnand %p9686_p8, %p9680_p5 }
  0x32   :  { %9690 = shalt.err (!%p9687_p9)
}
  0x33   :  { %s9726_s0 = smov 256   ;;  %s9727_s22 = smov 16  }
  0x34   :  { %46 = dma.hbm_to_vmem [thread:$0]  %s9909_s2, 65536, %s41_s13, [#allocation6], %s9726_s0, %s9726_s0, %s9727_s22  }
  0x35   :  { %9713 = dma.done.wait [#allocation3], 1024  }
  0x36   :  { %9714 = vsyncadd [#allocation3], 4294966272 }
  0x37   :  { %9715 = dma.done.wait [#allocation6], 131072  }
  0x38   :  { %9716 = vsyncadd [#allocation6], 4294836224  ;;  %v68_v0 = vld [vmem:[#allocation5] sm:$0xff]  ;;  %v69_v2 = vld [vmem:[#allocation5 + $0x8] sm:$0xff]  ;;  %s9728_s2 = smov [#allocation8]  }
  0x39   :  { %v76_v1 = vld [vmem:[#allocation5 + $0x40] sm:$0xff]  ;;  %v77_v4 = vld [vmem:[#allocation5 + $0x48] sm:$0xff]  ;;  %s7702_s25 = sshll.u32 %s9728_s2, 4  ;;  %s7703_s25 = int_to_ptr.vmem [resolvable:$true] %s7702_s25 }
  0x3a   :  { %v7716_v3 = vcombine.high %v68_v0, %v76_v1  ;;  %v7715_v5 = vcombine.low %v68_v0, %v76_v1  ;;  %v84_v6 = vld [vmem:[#allocation5 + $0x80] sm:$0xff]  ;;  %v7718_v8 = vcombine.high %v69_v2, %v77_v4  ;;  %v7717_v9 = vcombine.low %v69_v2, %v77_v4  ;;  %v85_v11 = vld [vmem:[#allocation5 + $0x88] sm:$0xff]  ;;  %s9691_s26 = scalar_lea.vmem %s7703_s25, 1024  ;;  %p9696_p11 = scmp.lt.s32.totalorder %s7703_s25, %s7703_s25 }
  0x3b   :  { %v92_v7 = vld [vmem:[#allocation5 + $0xc0] sm:$0xff]  ;;  %v93_v12 = vld [vmem:[#allocation5 + $0xc8] sm:$0xff]  ;;  %p9692_p10 = scmp.ne.s32.totalorder %s7703_s25, %s9691_s26  ;;  %p9697_p12 = scmp.lt.s32.totalorder %s9691_s26, %s9691_s26 }
  0x3c   :  { %v7732_v10 = vcombine.high %v84_v6, %v92_v7  ;;  %v100_v13 = vld [vmem:[#allocation5 + $0x100] sm:$0xff]  ;;  %3140 = vmatprep.subr.bf16.mxu0 %v7716_v3  ;;  %v7734_v14 = vcombine.high %v85_v11, %v93_v12  ;;  %v101_v16 = vld [vmem:[#allocation5 + $0x108] sm:$0xff]  ;;  %3226 = vmatprep.subr.bf16.mxu1 %v7718_v8  ;;  %v7731_v18 = vcombine.low %v84_v6, %v92_v7 }
  0x3d   :  { %v108_v15 = vld [vmem:[#allocation5 + $0x140] sm:$0xff]  ;;  %v109_v17 = vld [vmem:[#allocation5 + $0x148] sm:$0xff]  ;;  %3141 = vmatpush1.bf16.msra.mxu0 %v7715_v5  ;;  %3227 = vmatpush1.bf16.msra.mxu1 %v7717_v9  ;;  %v7733_v19 = vcombine.low %v85_v11, %v93_v12  ;;  %p9698_p13 = por %p9697_p12, %p9696_p11 }
  0x3e   :  { %3142 = vmatprep.subr.bf16.mxu0 %v7732_v10  ;;  %v7748_v20 = vcombine.high %v100_v13, %v108_v15  ;;  %3228 = vmatprep.subr.bf16.mxu1 %v7734_v14  ;;  %v7750_v21 = vcombine.high %v101_v16, %v109_v17  ;;  %v116_v22 = vld [vmem:[#allocation5 + $0x180] sm:$0xff]  ;;  %v117_v24 = vld [vmem:[#allocation5 + $0x188] sm:$0xff]  ;;  %v7747_v26 = vcombine.low %v100_v13, %v108_v15 }
  0x3f   :  { %v124_v23 = vld [vmem:[#allocation5 + $0x1c0] sm:$0xff]  ;;  %v125_v25 = vld [vmem:[#allocation5 + $0x1c8] sm:$0xff]  ;;  %v7749_v27 = vcombine.low %v101_v16, %v109_v17  ;;  %p9699_p0 = pnand %p9698_p13, %p9692_p10 }
  0x40   :  { %v7764_v28 = vcombine.high %v116_v22, %v124_v23  ;;  %v7766_v29 = vcombine.high %v117_v24, %v125_v25  ;;  %v132_v30 = vld [vmem:[#allocation5 + $0x200] sm:$0xff]  ;;  %v133_v32 = vld [vmem:[#allocation5 + $0x208] sm:$0xff]  ;;  %v7763_v34 = vcombine.low %v116_v22, %v124_v23  ;;  %v7765_v35 = vcombine.low %v117_v24, %v125_v25 }
  0x41   :  { %3143 = vmatpush1.bf16.msra.mxu0 %v7731_v18  ;;  %3229 = vmatpush1.bf16.msra.mxu1 %v7733_v19  ;;  %v140_v31 = vld [vmem:[#allocation5 + $0x240] sm:$0xff]  ;;  %v141_v33 = vld [vmem:[#allocation5 + $0x248] sm:$0xff] }
  0x42   :  { %3144 = vmatprep.subr.bf16.mxu0 %v7748_v20  ;;  %3230 = vmatprep.subr.bf16.mxu1 %v7750_v21  ;;  %v7780_v36 = vcombine.high %v132_v30, %v140_v31  ;;  %v7782_v37 = vcombine.high %v133_v32, %v141_v33  ;;  %v148_v38 = vld [vmem:[#allocation5 + $0x280] sm:$0xff]  ;;  %v149_v40 = vld [vmem:[#allocation5 + $0x288] sm:$0xff]  ;;  %v7779_v42 = vcombine.low %v132_v30, %v140_v31 }
  0x43   :  { %v156_v39 = vld [vmem:[#allocation5 + $0x2c0] sm:$0xff]  ;;  %v157_v41 = vld [vmem:[#allocation5 + $0x2c8] sm:$0xff]  ;;  %v7781_v43 = vcombine.low %v133_v32, %v141_v33 }
  0x44   :  { %v7796_v44 = vcombine.high %v148_v38, %v156_v39  ;;  %v7798_v45 = vcombine.high %v149_v40, %v157_v41  ;;  %v164_v46 = vld [vmem:[#allocation5 + $0x300] sm:$0xff]  ;;  %v165_v48 = vld [vmem:[#allocation5 + $0x308] sm:$0xff]  ;;  %v7795_v50 = vcombine.low %v148_v38, %v156_v39  ;;  %v7797_v51 = vcombine.low %v149_v40, %v157_v41 }
  0x45   :  { %3145 = vmatpush1.bf16.msra.mxu0 %v7747_v26  ;;  %3231 = vmatpush1.bf16.msra.mxu1 %v7749_v27  ;;  %v172_v47 = vld [vmem:[#allocation5 + $0x340] sm:$0xff]  ;;  %v173_v49 = vld [vmem:[#allocation5 + $0x348] sm:$0xff] }
  0x46   :  { %3146 = vmatprep.subr.bf16.mxu0 %v7764_v28  ;;  %3232 = vmatprep.subr.bf16.mxu1 %v7766_v29  ;;  %v7812_v52 = vcombine.high %v164_v46, %v172_v47  ;;  %v57_v53 = vld [vmem:[#allocation2 + $0x8] sm:$0xff]  ;;  %v7814_v55 = vcombine.high %v165_v48, %v173_v49  ;;  %v180_v56 = vld [vmem:[#allocation5 + $0x380] sm:$0xff]  ;;  %v7811_v61 = vcombine.low %v164_v46, %v172_v47 }
  0x47   :  { %v61_v54 = vld [vmem:[#allocation2 + $0x28] sm:$0xff]  ;;  %v188_v57 = vld [vmem:[#allocation5 + $0x3c0] sm:$0xff]  ;;  %v7813_v62 = vcombine.low %v165_v48, %v173_v49 }
  0x48   :  { %v9788_v58 = vpack.c.bf16 %v61_v54, %v57_v53  ;;  %v181_v59 = vld [vmem:[#allocation5 + $0x388] sm:$0xff]  ;;  %v7828_v63 = vcombine.high %v180_v56, %v188_v57  ;;  %v196_v1 = vld [vmem:[#allocation5 + $0x400] sm:$0xff]  ;;  %v7827_v5 = vcombine.low %v180_v56, %v188_v57 }
  0x49   :  { %3147 = vmatpush1.bf16.msra.mxu0 %v7763_v34  ;;  %3233 = vmatpush1.bf16.msra.mxu1 %v7765_v35  ;;  %v189_v60 = vld [vmem:[#allocation5 + $0x3c8] sm:$0xff]  ;;  %v204_v2 = vld [vmem:[#allocation5 + $0x440] sm:$0xff] }
  0x4a   :  { %3148 = vmatprep.subr.bf16.mxu0 %v7780_v36  ;;  %3234 = vmatprep.subr.bf16.mxu1 %v7782_v37  ;;  %v7830_v0 = vcombine.high %v181_v59, %v189_v60  ;;  %v197_v3 = vld [vmem:[#allocation5 + $0x408] sm:$0xff]  ;;  %v7829_v6 = vcombine.low %v181_v59, %v189_v60  ;;  %v7844_v7 = vcombine.high %v196_v1, %v204_v2  ;;  %v212_v9 = vld [vmem:[#allocation5 + $0x480] sm:$0xff] }
  0x4b   :  { %3172 = vmatprep.mubr.bf16.mxu0 %v9788_v58  ;;  %3258 = vmatprep.mubr.bf16.mxu1 %v9788_v58  ;;  %v205_v4 = vld [vmem:[#allocation5 + $0x448] sm:$0xff]  ;;  %v220_v10 = vld [vmem:[#allocation5 + $0x4c0] sm:$0xff]  ;;  %v7843_v13 = vcombine.low %v196_v1, %v204_v2 }
  0x4c   :  { %v7846_v8 = vcombine.high %v197_v3, %v205_v4  ;;  %v213_v11 = vld [vmem:[#allocation5 + $0x488] sm:$0xff]  ;;  %v7845_v14 = vcombine.low %v197_v3, %v205_v4  ;;  %v7860_v15 = vcombine.high %v212_v9, %v220_v10  ;;  %v228_v17 = vld [vmem:[#allocation5 + $0x500] sm:$0xff]  ;;  %v7859_v21 = vcombine.low %v212_v9, %v220_v10 }
  0x4d   :  { %3149 = vmatpush1.bf16.msra.mxu0 %v7779_v42  ;;  %3235 = vmatpush1.bf16.msra.mxu1 %v7781_v43  ;;  %v221_v12 = vld [vmem:[#allocation5 + $0x4c8] sm:$0xff]  ;;  %v236_v18 = vld [vmem:[#allocation5 + $0x540] sm:$0xff] }
  0x4e   :  { %3150 = vmatprep.subr.bf16.mxu0 %v7796_v44  ;;  %3236 = vmatprep.subr.bf16.mxu1 %v7798_v45  ;;  %v7862_v16 = vcombine.high %v213_v11, %v221_v12  ;;  %v229_v19 = vld [vmem:[#allocation5 + $0x508] sm:$0xff]  ;;  %v7861_v22 = vcombine.low %v213_v11, %v221_v12  ;;  %v7876_v23 = vcombine.high %v228_v17, %v236_v18  ;;  %v244_v25 = vld [vmem:[#allocation5 + $0x580] sm:$0xff] }
  0x4f   :  { %v237_v20 = vld [vmem:[#allocation5 + $0x548] sm:$0xff]  ;;  %v252_v26 = vld [vmem:[#allocation5 + $0x5c0] sm:$0xff]  ;;  %v7875_v29 = vcombine.low %v228_v17, %v236_v18  ;;  %v59_v17 = vld [vmem:[#allocation2 + $0x18] sm:$0xff] }
  0x50   :  { %v7878_v24 = vcombine.high %v229_v19, %v237_v20  ;;  %v245_v27 = vld [vmem:[#allocation5 + $0x588] sm:$0xff]  ;;  %v7877_v30 = vcombine.low %v229_v19, %v237_v20  ;;  %v7892_v31 = vcombine.high %v244_v25, %v252_v26  ;;  %v260_v33 = vld [vmem:[#allocation5 + $0x600] sm:$0xff]  ;;  %v7891_v37 = vcombine.low %v244_v25, %v252_v26  ;;  %v63_v18 = vld [vmem:[#allocation2 + $0x38] sm:$0xff] }
  0x51   :  { %3151 = vmatpush1.bf16.msra.mxu0 %v7795_v50  ;;  %3237 = vmatpush1.bf16.msra.mxu1 %v7797_v51  ;;  %v253_v28 = vld [vmem:[#allocation5 + $0x5c8] sm:$0xff]  ;;  %v268_v34 = vld [vmem:[#allocation5 + $0x640] sm:$0xff]  ;;  %v9794_v25 = vpack.c.bf16 %v63_v18, %v59_v17 }
  0x52   :  { %3152 = vmatprep.subr.bf16.mxu0 %v7812_v52  ;;  %3238 = vmatprep.subr.bf16.mxu1 %v7814_v55  ;;  %v7894_v32 = vcombine.high %v245_v27, %v253_v28  ;;  %v261_v35 = vld [vmem:[#allocation5 + $0x608] sm:$0xff]  ;;  %v7893_v38 = vcombine.low %v245_v27, %v253_v28  ;;  %v7908_v39 = vcombine.high %v260_v33, %v268_v34  ;;  %v276_v41 = vld [vmem:[#allocation5 + $0x680] sm:$0xff] }
  0x53   :  { %v269_v36 = vld [vmem:[#allocation5 + $0x648] sm:$0xff]  ;;  %v284_v42 = vld [vmem:[#allocation5 + $0x6c0] sm:$0xff]  ;;  %v7907_v45 = vcombine.low %v260_v33, %v268_v34 }
  0x54   :  { %v7910_v40 = vcombine.high %v261_v35, %v269_v36  ;;  %v277_v43 = vld [vmem:[#allocation5 + $0x688] sm:$0xff]  ;;  %v7909_v46 = vcombine.low %v261_v35, %v269_v36  ;;  %v7924_v47 = vcombine.high %v276_v41, %v284_v42  ;;  %v292_v49 = vld [vmem:[#allocation5 + $0x700] sm:$0xff]  ;;  %v7923_v53 = vcombine.low %v276_v41, %v284_v42 }
  0x55   :  { %3153 = vmatpush1.bf16.msra.mxu0 %v7811_v61  ;;  %3239 = vmatpush1.bf16.msra.mxu1 %v7813_v62  ;;  %v285_v44 = vld [vmem:[#allocation5 + $0x6c8] sm:$0xff]  ;;  %v300_v50 = vld [vmem:[#allocation5 + $0x740] sm:$0xff] }
  0x56   :  { %3154 = vmatprep.subr.bf16.mxu0 %v7828_v63  ;;  %3240 = vmatprep.subr.bf16.mxu1 %v7830_v0  ;;  %v7926_v48 = vcombine.high %v277_v43, %v285_v44  ;;  %v293_v51 = vld [vmem:[#allocation5 + $0x708] sm:$0xff]  ;;  %v7925_v54 = vcombine.low %v277_v43, %v285_v44  ;;  %v7940_v55 = vcombine.high %v292_v49, %v300_v50  ;;  %v308_v57 = vld [vmem:[#allocation5 + $0x780] sm:$0xff] }
  0x57   :  { %v301_v52 = vld [vmem:[#allocation5 + $0x748] sm:$0xff]  ;;  %v316_v59 = vld [vmem:[#allocation5 + $0x7c0] sm:$0xff]  ;;  %v7939_v62 = vcombine.low %v292_v49, %v300_v50 }
  0x58   :  { %v7942_v56 = vcombine.high %v293_v51, %v301_v52  ;;  %v309_v60 = vld [vmem:[#allocation5 + $0x788] sm:$0xff]  ;;  %v7941_v63 = vcombine.low %v293_v51, %v301_v52  ;;  %v7956_v0 = vcombine.high %v308_v57, %v316_v59  ;;  %v324_v2 = vld [vmem:[#allocation5 + $0x800] sm:$0xff] }
  0x59   :  { %3155 = vmatpush1.bf16.msra.mxu0 %v7827_v5  ;;  %3241 = vmatpush1.bf16.msra.mxu1 %v7829_v6  ;;  %v317_v61 = vld [vmem:[#allocation5 + $0x7c8] sm:$0xff]  ;;  %v332_v3 = vld [vmem:[#allocation5 + $0x840] sm:$0xff]  ;;  %v7955_v6 = vcombine.low %v308_v57, %v316_v59 }
  0x5a   :  { %3156 = vmatprep.subr.bf16.mxu0 %v7844_v7  ;;  %3242 = vmatprep.subr.bf16.mxu1 %v7846_v8  ;;  %v7958_v1 = vcombine.high %v309_v60, %v317_v61  ;;  %v325_v4 = vld [vmem:[#allocation5 + $0x808] sm:$0xff]  ;;  %v56_v7 = vld [vmem:[#allocation2] sm:$0xff]  ;;  %v7957_v9 = vcombine.low %v309_v60, %v317_v61  ;;  %v7972_v10 = vcombine.high %v324_v2, %v332_v3 }
  0x5b   :  { %v333_v5 = vld [vmem:[#allocation5 + $0x848] sm:$0xff]  ;;  %v60_v8 = vld [vmem:[#allocation2 + $0x20] sm:$0xff]  ;;  %v7971_v19 = vcombine.low %v324_v2, %v332_v3 }
  0x5c   :  { %v7974_v11 = vcombine.high %v325_v4, %v333_v5  ;;  %v340_v12 = vld [vmem:[#allocation5 + $0x880] sm:$0xff]  ;;  %v7973_v20 = vcombine.low %v325_v4, %v333_v5  ;;  %v357_v26 = vld [vmem:[#allocation5 + $0x908] sm:$0xff] }
  0x5d   :  { %3157 = vmatpush1.bf16.msra.mxu0 %v7843_v13  ;;  %3243 = vmatpush1.bf16.msra.mxu1 %v7845_v14  ;;  %v348_v13 = vld [vmem:[#allocation5 + $0x8c0] sm:$0xff]  ;;  %v341_v14 = vld [vmem:[#allocation5 + $0x888] sm:$0xff] }
  0x5e   :  { %3158 = vmatprep.subr.bf16.mxu0 %v7860_v15  ;;  %3244 = vmatprep.subr.bf16.mxu1 %v7862_v16  ;;  %v9792_v15 = vpack.c.bf16 %v60_v8, %v56_v7  ;;  %v349_v16 = vld [vmem:[#allocation5 + $0x8c8] sm:$0xff]  ;;  %v7987_v28 = vcombine.low %v340_v12, %v348_v13  ;;  %v452_v8 = vld [vmem:[#allocation5 + $0xc00] sm:$0xff] }
  0x5f   :  { %v365_v27 = vld [vmem:[#allocation5 + $0x948] sm:$0xff]  ;;  %v468_v17 = vld [vmem:[#allocation5 + $0xc80] sm:$0xff] }
  0x60   :  { %v373_v33 = vld [vmem:[#allocation5 + $0x988] sm:$0xff]  ;;  %v8006_v34 = vcombine.high %v357_v26, %v365_v27  ;;  %v476_v18 = vld [vmem:[#allocation5 + $0xcc0] sm:$0xff] }
  0x61   :  { %3159 = vmatpush1.bf16.msra.mxu0 %v7859_v21  ;;  %3245 = vmatpush1.bf16.msra.mxu1 %v7861_v22  ;;  %v7988_v21 = vcombine.high %v340_v12, %v348_v13  ;;  %v7990_v22 = vcombine.high %v341_v14, %v349_v16  ;;  %v381_v35 = vld [vmem:[#allocation5 + $0x9c8] sm:$0xff] }
  0x62   :  { %3160 = vmatprep.subr.bf16.mxu0 %v7876_v23  ;;  %3246 = vmatprep.subr.bf16.mxu1 %v7878_v24  ;;  %v356_v23 = vld [vmem:[#allocation5 + $0x900] sm:$0xff]  ;;  %v389_v41 = vld [vmem:[#allocation5 + $0xa08] sm:$0xff]  ;;  %v8022_v42 = vcombine.high %v373_v33, %v381_v35 }
  0x63   :  { %v364_v24 = vld [vmem:[#allocation5 + $0x940] sm:$0xff]  ;;  %v397_v43 = vld [vmem:[#allocation5 + $0xa48] sm:$0xff] }
  0x64   :  { %v8003_v36 = vcombine.low %v356_v23, %v364_v24  ;;  %v405_v49 = vld [vmem:[#allocation5 + $0xa88] sm:$0xff]  ;;  %v8038_v50 = vcombine.high %v389_v41, %v397_v43 }
  0x65   :  { %3161 = vmatpush1.bf16.msra.mxu0 %v7875_v29  ;;  %3247 = vmatpush1.bf16.msra.mxu1 %v7877_v30  ;;  %v7989_v29 = vcombine.low %v341_v14, %v349_v16  ;;  %v8004_v30 = vcombine.high %v356_v23, %v364_v24  ;;  %v413_v51 = vld [vmem:[#allocation5 + $0xac8] sm:$0xff]  ;;  %v8116_v24 = vcombine.high %v468_v17, %v476_v18 }
  0x66   :  { %3162 = vmatprep.subr.bf16.mxu0 %v7892_v31  ;;  %3248 = vmatprep.subr.bf16.mxu1 %v7894_v32  ;;  %v372_v31 = vld [vmem:[#allocation5 + $0x980] sm:$0xff]  ;;  %v421_v57 = vld [vmem:[#allocation5 + $0xb08] sm:$0xff]  ;;  %v8054_v59 = vcombine.high %v405_v49, %v413_v51 }
  0x67   :  { %v380_v32 = vld [vmem:[#allocation5 + $0x9c0] sm:$0xff]  ;;  %v429_v60 = vld [vmem:[#allocation5 + $0xb48] sm:$0xff] }
  0x68   :  { %v8019_v44 = vcombine.low %v372_v31, %v380_v32  ;;  %v437_v2 = vld [vmem:[#allocation5 + $0xb88] sm:$0xff]  ;;  %v8070_v3 = vcombine.high %v421_v57, %v429_v60 }
  0x69   :  { %3163 = vmatpush1.bf16.msra.mxu0 %v7891_v37  ;;  %3249 = vmatpush1.bf16.msra.mxu1 %v7893_v38  ;;  %v8005_v37 = vcombine.low %v357_v26, %v365_v27  ;;  %v8020_v38 = vcombine.high %v372_v31, %v380_v32  ;;  %v445_v4 = vld [vmem:[#allocation5 + $0xbc8] sm:$0xff]  ;;  %v484_v26 = vld [vmem:[#allocation5 + $0xd00] sm:$0xff]  ;;  %v8115_v31 = vcombine.low %v468_v17, %v476_v18  ;;  %v62_v17 = vld [vmem:[#allocation2 + $0x30] sm:$0xff] }
  0x6a   :  { %3164 = vmatprep.subr.bf16.mxu0 %v7908_v39  ;;  %3250 = vmatprep.subr.bf16.mxu1 %v7910_v40  ;;  %v388_v39 = vld [vmem:[#allocation5 + $0xa00] sm:$0xff]  ;;  %v461_v12 = vld [vmem:[#allocation5 + $0xc48] sm:$0xff]  ;;  %v8085_v14 = vcombine.low %v437_v2, %v445_v4  ;;  %v79_v18 = vld [vmem:[#allocation5 + $0x58] sm:$0xff] }
  0x6b   :  { %v396_v40 = vld [vmem:[#allocation5 + $0xa40] sm:$0xff] }
  0x6c   :  { %v8035_v52 = vcombine.low %v388_v39, %v396_v40  ;;  %v492_v27 = vld [vmem:[#allocation5 + $0xd40] sm:$0xff] }
  0x6d   :  { %3165 = vmatpush1.bf16.msra.mxu0 %v7907_v45  ;;  %3251 = vmatpush1.bf16.msra.mxu1 %v7909_v46  ;;  %v8021_v45 = vcombine.low %v373_v33, %v381_v35  ;;  %v8036_v46 = vcombine.high %v388_v39, %v396_v40  ;;  %v8132_v33 = vcombine.high %v484_v26, %v492_v27  ;;  %v508_v35 = vld [vmem:[#allocation5 + $0xdc0] sm:$0xff] }
  0x6e   :  { %3166 = vmatprep.subr.bf16.mxu0 %v7924_v47  ;;  %3252 = vmatprep.subr.bf16.mxu1 %v7926_v48  ;;  %v404_v47 = vld [vmem:[#allocation5 + $0xa80] sm:$0xff]  ;;  %v8131_v39 = vcombine.low %v484_v26, %v492_v27  ;;  %v95_v27 = vld [vmem:[#allocation5 + $0xd8] sm:$0xff] }
  0x6f   :  { %v412_v48 = vld [vmem:[#allocation5 + $0xac0] sm:$0xff] }
  0x70   :  { %v8051_v61 = vcombine.low %v404_v47, %v412_v48 }
  0x71   :  { %3167 = vmatpush1.bf16.msra.mxu0 %v7923_v53  ;;  %3253 = vmatpush1.bf16.msra.mxu1 %v7925_v54  ;;  %v8037_v53 = vcombine.low %v389_v41, %v397_v43  ;;  %v8052_v54 = vcombine.high %v404_v47, %v412_v48  ;;  %v524_v43 = vld [vmem:[#allocation5 + $0xe40] sm:$0xff] }
  0x72   :  { %3168 = vmatprep.subr.bf16.mxu0 %v7940_v55  ;;  %3254 = vmatprep.subr.bf16.mxu1 %v7942_v56  ;;  %v420_v55 = vld [vmem:[#allocation5 + $0xb00] sm:$0xff] }
  0x73   :  { %v428_v56 = vld [vmem:[#allocation5 + $0xb40] sm:$0xff] }
  0x74   :  { %v8067_v5 = vcombine.low %v420_v55, %v428_v56 }
  0x75   :  { %3169 = vmatpush1.bf16.msra.mxu0 %v7939_v62  ;;  %3255 = vmatpush1.bf16.msra.mxu1 %v7941_v63  ;;  %v8053_v62 = vcombine.low %v405_v49, %v413_v51  ;;  %v8068_v63 = vcombine.high %v420_v55, %v428_v56  ;;  %v540_v51 = vld [vmem:[#allocation5 + $0xec0] sm:$0xff] }
  0x76   :  { %3170 = vmatprep.subr.bf16.mxu0 %v7956_v0  ;;  %3256 = vmatprep.subr.bf16.mxu1 %v7958_v1  ;;  %v436_v0 = vld [vmem:[#allocation5 + $0xb80] sm:$0xff] }
  0x77   :  { %v444_v1 = vld [vmem:[#allocation5 + $0xbc0] sm:$0xff] }
  0x78   :  { %v8084_v7 = vcombine.high %v436_v0, %v444_v1  ;;  %v8083_v13 = vcombine.low %v436_v0, %v444_v1 }
  0x79   :  { %3171 = vmatpush1.bf16.msra.mxu0 %v7955_v6  ;;  %3257 = vmatpush1.bf16.msra.mxu1 %v7957_v9  ;;  %v8069_v6 = vcombine.low %v421_v57, %v429_v60  ;;  %v460_v9 = vld [vmem:[#allocation5 + $0xc40] sm:$0xff] }
  0x7a   :  { %3183 = vmatprep.subr.bf16.mxu0 %v7972_v10  ;;  %3269 = vmatprep.subr.bf16.mxu1 %v7974_v11  ;;  %v453_v10 = vld [vmem:[#allocation5 + $0xc08] sm:$0xff]  ;;  %v8086_v11 = vcombine.high %v437_v2, %v445_v4  ;;  %v8100_v16 = vcombine.high %v452_v8, %v460_v9  ;;  %v556_v60 = vld [vmem:[#allocation5 + $0xf40] sm:$0xff] }
  0x7b   :  { %v8101_v23 = vcombine.low %v453_v10, %v461_v12  ;;  %v572_v4 = vld [vmem:[#allocation5 + $0xfc0] sm:$0xff] }
  0x7c   :  { %3173 = vmatmul.mubr.bf16.vlgmr.msra.gmra.mrb[0].mxu0 %v9792_v15  ;;  %3259 = vmatmul.mubr.bf16.vlgmr.msra.gmra.mrb[0].mxu1 %v9792_v15 }
  0x7d   :  { %3184 = vmatpush1.bf16.msra.mxu0 %v7971_v19  ;;  %3270 = vmatpush1.bf16.msra.mxu1 %v7973_v20  ;;  %v469_v19 = vld [vmem:[#allocation5 + $0xc88] sm:$0xff]  ;;  %v8102_v20 = vcombine.high %v453_v10, %v461_v12  ;;  %v78_v12 = vld [vmem:[#allocation5 + $0x50] sm:$0xff] }
  0x7e   :  { %3185 = vmatprep.subr.bf16.mxu0 %v7988_v21  ;;  %3271 = vmatprep.subr.bf16.mxu1 %v7990_v22  ;;  %v477_v21 = vld [vmem:[#allocation5 + $0xcc8] sm:$0xff]  ;;  %v8099_v22 = vcombine.low %v452_v8, %v460_v9 }
  0x7f   :  { %3215 = vmatprep.mubr.bf16.mxu0 %v9794_v25  ;;  %3301 = vmatprep.mubr.bf16.mxu1 %v9794_v25  ;;  %v8117_v32 = vcombine.low %v469_v19, %v477_v21 }
  0x81   :  { %3186 = vmatpush1.bf16.msra.mxu0 %v7987_v28  ;;  %3272 = vmatpush1.bf16.msra.mxu1 %v7989_v29  ;;  %v485_v28 = vld [vmem:[#allocation5 + $0xd08] sm:$0xff]  ;;  %v8118_v29 = vcombine.high %v469_v19, %v477_v21 }
  0x82   :  { %3187 = vmatprep.subr.bf16.mxu0 %v8004_v30  ;;  %3273 = vmatprep.subr.bf16.mxu1 %v8006_v34  ;;  %v493_v30 = vld [vmem:[#allocation5 + $0xd48] sm:$0xff]  ;;  %v500_v34 = vld [vmem:[#allocation5 + $0xd80] sm:$0xff] }
  0x83   :  { %v8133_v40 = vcombine.low %v485_v28, %v493_v30  ;;  %v8148_v41 = vcombine.high %v500_v34, %v508_v35  ;;  %v8147_v47 = vcombine.low %v500_v34, %v508_v35  ;;  %v103_v34 = vld [vmem:[#allocation5 + $0x118] sm:$0xff] }
  0x85   :  { %3188 = vmatpush1.bf16.msra.mxu0 %v8003_v36  ;;  %3274 = vmatpush1.bf16.msra.mxu1 %v8005_v37  ;;  %v501_v36 = vld [vmem:[#allocation5 + $0xd88] sm:$0xff]  ;;  %v8134_v37 = vcombine.high %v485_v28, %v493_v30 }
  0x86   :  { %3189 = vmatprep.subr.bf16.mxu0 %v8020_v38  ;;  %3275 = vmatprep.subr.bf16.mxu1 %v8022_v42  ;;  %v509_v38 = vld [vmem:[#allocation5 + $0xdc8] sm:$0xff]  ;;  %v516_v42 = vld [vmem:[#allocation5 + $0xe00] sm:$0xff] }
  0x87   :  { %v8149_v48 = vcombine.low %v501_v36, %v509_v38  ;;  %v8164_v49 = vcombine.high %v516_v42, %v524_v43  ;;  %v8163_v55 = vcombine.low %v516_v42, %v524_v43  ;;  %v119_v42 = vld [vmem:[#allocation5 + $0x198] sm:$0xff] }
  0x89   :  { %3190 = vmatpush1.bf16.msra.mxu0 %v8019_v44  ;;  %3276 = vmatpush1.bf16.msra.mxu1 %v8021_v45  ;;  %v517_v44 = vld [vmem:[#allocation5 + $0xe08] sm:$0xff]  ;;  %v8150_v45 = vcombine.high %v501_v36, %v509_v38  ;;  %v111_v36 = vld [vmem:[#allocation5 + $0x158] sm:$0xff] }
  0x8a   :  { %3191 = vmatprep.subr.bf16.mxu0 %v8036_v46  ;;  %3277 = vmatprep.subr.bf16.mxu1 %v8038_v50  ;;  %v525_v46 = vld [vmem:[#allocation5 + $0xe48] sm:$0xff]  ;;  %v532_v50 = vld [vmem:[#allocation5 + $0xe80] sm:$0xff]  ;;  %v7754_v43 = vcombine.high %v103_v34, %v111_v36 }
  0x8b   :  { %v8165_v56 = vcombine.low %v517_v44, %v525_v46  ;;  %v8180_v57 = vcombine.high %v532_v50, %v540_v51  ;;  %v8179_v0 = vcombine.low %v532_v50, %v540_v51  ;;  %v135_v50 = vld [vmem:[#allocation5 + $0x218] sm:$0xff] }
  0x8d   :  { %3192 = vmatpush1.bf16.msra.mxu0 %v8035_v52  ;;  %3278 = vmatpush1.bf16.msra.mxu1 %v8037_v53  ;;  %v533_v52 = vld [vmem:[#allocation5 + $0xe88] sm:$0xff]  ;;  %v8166_v53 = vcombine.high %v517_v44, %v525_v46  ;;  %v127_v44 = vld [vmem:[#allocation5 + $0x1d8] sm:$0xff]  ;;  %v7753_v46 = vcombine.low %v103_v34, %v111_v36  ;;  %v230_v36 = vld [vmem:[#allocation5 + $0x510] sm:$0xff] }
  0x8e   :  { %3193 = vmatprep.subr.bf16.mxu0 %v8052_v54  ;;  %3279 = vmatprep.subr.bf16.mxu1 %v8054_v59  ;;  %v541_v54 = vld [vmem:[#allocation5 + $0xec8] sm:$0xff]  ;;  %v548_v59 = vld [vmem:[#allocation5 + $0xf00] sm:$0xff]  ;;  %v7770_v51 = vcombine.high %v119_v42, %v127_v44 }
  0x8f   :  { %v8181_v1 = vcombine.low %v533_v52, %v541_v54  ;;  %v8196_v2 = vcombine.high %v548_v59, %v556_v60  ;;  %v8195_v8 = vcombine.low %v548_v59, %v556_v60  ;;  %v151_v59 = vld [vmem:[#allocation5 + $0x298] sm:$0xff] }
  0x91   :  { %3194 = vmatpush1.bf16.msra.mxu0 %v8051_v61  ;;  %3280 = vmatpush1.bf16.msra.mxu1 %v8053_v62  ;;  %v549_v61 = vld [vmem:[#allocation5 + $0xf08] sm:$0xff]  ;;  %v8182_v62 = vcombine.high %v533_v52, %v541_v54  ;;  %v143_v52 = vld [vmem:[#allocation5 + $0x258] sm:$0xff]  ;;  %v7769_v54 = vcombine.low %v119_v42, %v127_v44  ;;  %v246_v44 = vld [vmem:[#allocation5 + $0x590] sm:$0xff] }
  0x92   :  { %3195 = vmatprep.subr.bf16.mxu0 %v8068_v63  ;;  %3281 = vmatprep.subr.bf16.mxu1 %v8070_v3  ;;  %v557_v63 = vld [vmem:[#allocation5 + $0xf48] sm:$0xff]  ;;  %v564_v3 = vld [vmem:[#allocation5 + $0xf80] sm:$0xff]  ;;  %v7786_v60 = vcombine.high %v135_v50, %v143_v52 }
  0x93   :  { %v8197_v9 = vcombine.low %v549_v61, %v557_v63  ;;  %v8212_v10 = vcombine.high %v564_v3, %v572_v4  ;;  %v8211_v19 = vcombine.low %v564_v3, %v572_v4  ;;  %v167_v3 = vld [vmem:[#allocation5 + $0x318] sm:$0xff] }
  0x95   :  { %3196 = vmatpush1.bf16.msra.mxu0 %v8067_v5  ;;  %3282 = vmatpush1.bf16.msra.mxu1 %v8069_v6  ;;  %v565_v5 = vld [vmem:[#allocation5 + $0xf88] sm:$0xff]  ;;  %v8198_v6 = vcombine.high %v549_v61, %v557_v63  ;;  %v159_v61 = vld [vmem:[#allocation5 + $0x2d8] sm:$0xff]  ;;  %v7785_v63 = vcombine.low %v135_v50, %v143_v52  ;;  %v262_v52 = vld [vmem:[#allocation5 + $0x610] sm:$0xff] }
  0x96   :  { %3197 = vmatprep.subr.bf16.mxu0 %v8084_v7  ;;  %3283 = vmatprep.subr.bf16.mxu1 %v8086_v11  ;;  %v573_v7 = vld [vmem:[#allocation5 + $0xfc8] sm:$0xff]  ;;  %v70_v11 = vld [vmem:[#allocation5 + $0x10] sm:$0xff]  ;;  %v7802_v4 = vcombine.high %v151_v59, %v159_v61 }
  0x97   :  { %v7720_v21 = vcombine.high %v70_v11, %v78_v12 }
  0x99   :  { %3198 = vmatpush1.bf16.msra.mxu0 %v8083_v13  ;;  %3284 = vmatpush1.bf16.msra.mxu1 %v8085_v14  ;;  %v71_v13 = vld [vmem:[#allocation5 + $0x18] sm:$0xff]  ;;  %v8214_v14 = vcombine.high %v565_v5, %v573_v7 }
  0x9a   :  { %3199 = vmatprep.subr.bf16.mxu0 %v8100_v16  ;;  %3285 = vmatprep.subr.bf16.mxu1 %v8102_v20  ;;  %v58_v16 = vld [vmem:[#allocation2 + $0x10] sm:$0xff]  ;;  %v8213_v20 = vcombine.low %v565_v5, %v573_v7  ;;  %v7722_v26 = vcombine.high %v71_v13, %v79_v18  ;;  %v7721_v30 = vcombine.low %v71_v13, %v79_v18  ;;  %v175_v5 = vld [vmem:[#allocation5 + $0x358] sm:$0xff] }
  0x9b   :  { %v9800_v28 = vpack.c.bf16 %v62_v17, %v58_v16  ;;  %v7801_v7 = vcombine.low %v151_v59, %v159_v61  ;;  %v191_v13 = vld [vmem:[#allocation5 + $0x3d8] sm:$0xff]  ;;  %v7817_v16 = vcombine.low %v167_v3, %v175_v5  ;;  %v198_v18 = vld [vmem:[#allocation5 + $0x410] sm:$0xff] }
  0x9c   :  { %v278_v61 = vld [vmem:[#allocation5 + $0x690] sm:$0xff] }
  0x9d   :  { %3200 = vmatpush1.bf16.msra.mxu0 %v8099_v22  ;;  %3286 = vmatpush1.bf16.msra.mxu1 %v8101_v23  ;;  %v86_v22 = vld [vmem:[#allocation5 + $0x90] sm:$0xff] }
  0x9e   :  { %3201 = vmatprep.subr.bf16.mxu0 %v8116_v24  ;;  %3287 = vmatprep.subr.bf16.mxu1 %v8118_v29  ;;  %v94_v23 = vld [vmem:[#allocation5 + $0xd0] sm:$0xff]  ;;  %v87_v24 = vld [vmem:[#allocation5 + $0x98] sm:$0xff]  ;;  %v7719_v29 = vcombine.low %v70_v11, %v78_v12  ;;  %v7818_v12 = vcombine.high %v167_v3, %v175_v5 }
  0x9f   :  { %v7738_v35 = vcombine.high %v87_v24, %v95_v27  ;;  %v7737_v38 = vcombine.low %v87_v24, %v95_v27  ;;  %v183_v11 = vld [vmem:[#allocation5 + $0x398] sm:$0xff]  ;;  %v214_v27 = vld [vmem:[#allocation5 + $0x490] sm:$0xff] }
  0xa0   :  { %v7833_v24 = vcombine.low %v183_v11, %v191_v13  ;;  %v294_v5 = vld [vmem:[#allocation5 + $0x710] sm:$0xff] }
  0xa1   :  { %3202 = vmatpush1.bf16.msra.mxu0 %v8115_v31  ;;  %3288 = vmatpush1.bf16.msra.mxu1 %v8117_v32  ;;  %v7736_v31 = vcombine.high %v86_v22, %v94_v23  ;;  %v102_v32 = vld [vmem:[#allocation5 + $0x110] sm:$0xff] }
  0xa2   :  { %3203 = vmatprep.subr.bf16.mxu0 %v8132_v33  ;;  %3289 = vmatprep.subr.bf16.mxu1 %v8134_v37  ;;  %v110_v33 = vld [vmem:[#allocation5 + $0x150] sm:$0xff]  ;;  %v7735_v37 = vcombine.low %v86_v22, %v94_v23  ;;  %v207_v22 = vld [vmem:[#allocation5 + $0x458] sm:$0xff] }
  0xa5   :  { %3204 = vmatpush1.bf16.msra.mxu0 %v8131_v39  ;;  %3290 = vmatpush1.bf16.msra.mxu1 %v8133_v40  ;;  %v7752_v39 = vcombine.high %v102_v32, %v110_v33  ;;  %v118_v40 = vld [vmem:[#allocation5 + $0x190] sm:$0xff] }
  0xa6   :  { %3205 = vmatprep.subr.bf16.mxu0 %v8148_v41  ;;  %3291 = vmatprep.subr.bf16.mxu1 %v8150_v45  ;;  %v126_v41 = vld [vmem:[#allocation5 + $0x1d0] sm:$0xff]  ;;  %v7751_v45 = vcombine.low %v102_v32, %v110_v33  ;;  %v223_v32 = vld [vmem:[#allocation5 + $0x4d8] sm:$0xff] }
  0xa9   :  { %3206 = vmatpush1.bf16.msra.mxu0 %v8147_v47  ;;  %3292 = vmatpush1.bf16.msra.mxu1 %v8149_v48  ;;  %v7768_v47 = vcombine.high %v118_v40, %v126_v41  ;;  %v134_v48 = vld [vmem:[#allocation5 + $0x210] sm:$0xff] }
  0xaa   :  { %3207 = vmatprep.subr.bf16.mxu0 %v8164_v49  ;;  %3293 = vmatprep.subr.bf16.mxu1 %v8166_v53  ;;  %v142_v49 = vld [vmem:[#allocation5 + $0x250] sm:$0xff]  ;;  %v7767_v53 = vcombine.low %v118_v40, %v126_v41  ;;  %v239_v40 = vld [vmem:[#allocation5 + $0x558] sm:$0xff] }
  0xad   :  { %3208 = vmatpush1.bf16.msra.mxu0 %v8163_v55  ;;  %3294 = vmatpush1.bf16.msra.mxu1 %v8165_v56  ;;  %v7784_v55 = vcombine.high %v134_v48, %v142_v49  ;;  %v150_v56 = vld [vmem:[#allocation5 + $0x290] sm:$0xff] }
  0xae   :  { %3209 = vmatprep.subr.bf16.mxu0 %v8180_v57  ;;  %3295 = vmatprep.subr.bf16.mxu1 %v8182_v62  ;;  %v158_v57 = vld [vmem:[#allocation5 + $0x2d0] sm:$0xff]  ;;  %v7783_v62 = vcombine.low %v134_v48, %v142_v49  ;;  %v255_v48 = vld [vmem:[#allocation5 + $0x5d8] sm:$0xff] }
  0xb1   :  { %3210 = vmatpush1.bf16.msra.mxu0 %v8179_v0  ;;  %3296 = vmatpush1.bf16.msra.mxu1 %v8181_v1  ;;  %v7800_v0 = vcombine.high %v150_v56, %v158_v57  ;;  %v166_v1 = vld [vmem:[#allocation5 + $0x310] sm:$0xff] }
  0xb2   :  { %3211 = vmatprep.subr.bf16.mxu0 %v8196_v2  ;;  %3297 = vmatprep.subr.bf16.mxu1 %v8198_v6  ;;  %v174_v2 = vld [vmem:[#allocation5 + $0x350] sm:$0xff]  ;;  %v7799_v6 = vcombine.low %v150_v56, %v158_v57  ;;  %v271_v56 = vld [vmem:[#allocation5 + $0x658] sm:$0xff] }
  0xb5   :  { %3212 = vmatpush1.bf16.msra.mxu0 %v8195_v8  ;;  %3298 = vmatpush1.bf16.msra.mxu1 %v8197_v9  ;;  %v7816_v8 = vcombine.high %v166_v1, %v174_v2  ;;  %v182_v9 = vld [vmem:[#allocation5 + $0x390] sm:$0xff] }
  0xb6   :  { %3213 = vmatprep.subr.bf16.mxu0 %v8212_v10  ;;  %3299 = vmatprep.subr.bf16.mxu1 %v8214_v14  ;;  %v190_v10 = vld [vmem:[#allocation5 + $0x3d0] sm:$0xff]  ;;  %v7815_v14 = vcombine.low %v166_v1, %v174_v2  ;;  %v287_v1 = vld [vmem:[#allocation5 + $0x6d8] sm:$0xff] }
  0xb7   :  { %v7832_v17 = vcombine.high %v182_v9, %v190_v10  ;;  %v7831_v23 = vcombine.low %v182_v9, %v190_v10  ;;  %v303_v9 = vld [vmem:[#allocation5 + $0x758] sm:$0xff] }
  0xb9   :  { %3214 = vmatpush1.bf16.msra.mxu0 %v8211_v19  ;;  %3300 = vmatpush1.bf16.msra.mxu1 %v8213_v20  ;;  %v206_v19 = vld [vmem:[#allocation5 + $0x450] sm:$0xff]  ;;  %v199_v20 = vld [vmem:[#allocation5 + $0x418] sm:$0xff] }
  0xba   :  { %3312 = vmatprep.subr.bf16.mxu0 %v7720_v21  ;;  %3398 = vmatprep.subr.bf16.mxu1 %v7722_v26  ;;  %v7834_v21 = vcombine.high %v183_v11, %v191_v13  ;;  %v7848_v26 = vcombine.high %v198_v18, %v206_v19  ;;  %v7847_v33 = vcombine.low %v198_v18, %v206_v19  ;;  %v310_v13 = vld [vmem:[#allocation5 + $0x790] sm:$0xff]  ;;  %v319_v18 = vld [vmem:[#allocation5 + $0x7d8] sm:$0xff] }
  0xbb   :  { %v7849_v34 = vcombine.low %v199_v20, %v207_v22 }
  0xbc   :  { %3216 = vmatmul.mubr.bf16.vlgmr.msra.gmra.mrb[0].mxu0 %v9800_v28  ;;  %3302 = vmatmul.mubr.bf16.vlgmr.msra.gmra.mrb[0].mxu1 %v9800_v28 }
  0xbd   :  { %3313 = vmatpush1.bf16.msra.mxu0 %v7719_v29  ;;  %3399 = vmatpush1.bf16.msra.mxu1 %v7721_v30  ;;  %v222_v29 = vld [vmem:[#allocation5 + $0x4d0] sm:$0xff]  ;;  %v215_v30 = vld [vmem:[#allocation5 + $0x498] sm:$0xff] }
  0xbe   :  { %3314 = vmatprep.subr.bf16.mxu0 %v7736_v31  ;;  %3400 = vmatprep.subr.bf16.mxu1 %v7738_v35  ;;  %v7850_v31 = vcombine.high %v199_v20, %v207_v22  ;;  %v7864_v35 = vcombine.high %v214_v27, %v222_v29  ;;  %v7863_v41 = vcombine.low %v214_v27, %v222_v29  ;;  %v326_v22 = vld [vmem:[#allocation5 + $0x810] sm:$0xff]  ;;  %v335_v27 = vld [vmem:[#allocation5 + $0x858] sm:$0xff] }
  0xbf   :  { %3344 = vmatprep.mubr.bf16.mxu0 %v9788_v58  ;;  %3430 = vmatprep.mubr.bf16.mxu1 %v9788_v58  ;;  %v7865_v42 = vcombine.low %v215_v30, %v223_v32 }
  0xc1   :  { %3315 = vmatpush1.bf16.msra.mxu0 %v7735_v37  ;;  %3401 = vmatpush1.bf16.msra.mxu1 %v7737_v38  ;;  %v238_v37 = vld [vmem:[#allocation5 + $0x550] sm:$0xff]  ;;  %v231_v38 = vld [vmem:[#allocation5 + $0x518] sm:$0xff] }
  0xc2   :  { %3316 = vmatprep.subr.bf16.mxu0 %v7752_v39  ;;  %3402 = vmatprep.subr.bf16.mxu1 %v7754_v43  ;;  %v7866_v39 = vcombine.high %v215_v30, %v223_v32  ;;  %v7880_v43 = vcombine.high %v230_v36, %v238_v37  ;;  %v7879_v49 = vcombine.low %v230_v36, %v238_v37  ;;  %v342_v32 = vld [vmem:[#allocation5 + $0x890] sm:$0xff]  ;;  %v351_v36 = vld [vmem:[#allocation5 + $0x8d8] sm:$0xff] }
  0xc3   :  { %v7881_v50 = vcombine.low %v231_v38, %v239_v40 }
  0xc5   :  { %3317 = vmatpush1.bf16.msra.mxu0 %v7751_v45  ;;  %3403 = vmatpush1.bf16.msra.mxu1 %v7753_v46  ;;  %v254_v45 = vld [vmem:[#allocation5 + $0x5d0] sm:$0xff]  ;;  %v247_v46 = vld [vmem:[#allocation5 + $0x598] sm:$0xff] }
  0xc6   :  { %3318 = vmatprep.subr.bf16.mxu0 %v7768_v47  ;;  %3404 = vmatprep.subr.bf16.mxu1 %v7770_v51  ;;  %v7882_v47 = vcombine.high %v231_v38, %v239_v40  ;;  %v7896_v51 = vcombine.high %v246_v44, %v254_v45  ;;  %v7895_v57 = vcombine.low %v246_v44, %v254_v45  ;;  %v358_v40 = vld [vmem:[#allocation5 + $0x910] sm:$0xff]  ;;  %v367_v44 = vld [vmem:[#allocation5 + $0x958] sm:$0xff] }
  0xc7   :  { %v7897_v59 = vcombine.low %v247_v46, %v255_v48 }
  0xc9   :  { %3319 = vmatpush1.bf16.msra.mxu0 %v7767_v53  ;;  %3405 = vmatpush1.bf16.msra.mxu1 %v7769_v54  ;;  %v270_v53 = vld [vmem:[#allocation5 + $0x650] sm:$0xff]  ;;  %v263_v54 = vld [vmem:[#allocation5 + $0x618] sm:$0xff] }
  0xca   :  { %3320 = vmatprep.subr.bf16.mxu0 %v7784_v55  ;;  %3406 = vmatprep.subr.bf16.mxu1 %v7786_v60  ;;  %v7898_v55 = vcombine.high %v247_v46, %v255_v48  ;;  %v7912_v60 = vcombine.high %v262_v52, %v270_v53  ;;  %v7911_v2 = vcombine.low %v262_v52, %v270_v53  ;;  %v374_v48 = vld [vmem:[#allocation5 + $0x990] sm:$0xff]  ;;  %v383_v52 = vld [vmem:[#allocation5 + $0x9d8] sm:$0xff] }
  0xcb   :  { %v7913_v3 = vcombine.low %v263_v54, %v271_v56 }
  0xcd   :  { %3321 = vmatpush1.bf16.msra.mxu0 %v7783_v62  ;;  %3407 = vmatpush1.bf16.msra.mxu1 %v7785_v63  ;;  %v286_v62 = vld [vmem:[#allocation5 + $0x6d0] sm:$0xff]  ;;  %v279_v63 = vld [vmem:[#allocation5 + $0x698] sm:$0xff] }
  0xce   :  { %3322 = vmatprep.subr.bf16.mxu0 %v7800_v0  ;;  %3408 = vmatprep.subr.bf16.mxu1 %v7802_v4  ;;  %v7914_v0 = vcombine.high %v263_v54, %v271_v56  ;;  %v7928_v4 = vcombine.high %v278_v61, %v286_v62  ;;  %v7927_v10 = vcombine.low %v278_v61, %v286_v62  ;;  %v390_v56 = vld [vmem:[#allocation5 + $0xa10] sm:$0xff]  ;;  %v399_v61 = vld [vmem:[#allocation5 + $0xa58] sm:$0xff] }
  0xcf   :  { %v7929_v11 = vcombine.low %v279_v63, %v287_v1 }
  0xd1   :  { %3323 = vmatpush1.bf16.msra.mxu0 %v7799_v6  ;;  %3409 = vmatpush1.bf16.msra.mxu1 %v7801_v7  ;;  %v302_v6 = vld [vmem:[#allocation5 + $0x750] sm:$0xff]  ;;  %v295_v7 = vld [vmem:[#allocation5 + $0x718] sm:$0xff] }
  0xd2   :  { %3324 = vmatprep.subr.bf16.mxu0 %v7816_v8  ;;  %3410 = vmatprep.subr.bf16.mxu1 %v7818_v12  ;;  %v7930_v8 = vcombine.high %v279_v63, %v287_v1  ;;  %v7944_v12 = vcombine.high %v294_v5, %v302_v6  ;;  %v7943_v19 = vcombine.low %v294_v5, %v302_v6  ;;  %v406_v1 = vld [vmem:[#allocation5 + $0xa90] sm:$0xff]  ;;  %v415_v5 = vld [vmem:[#allocation5 + $0xad8] sm:$0xff] }
  0xd3   :  { %v7945_v20 = vcombine.low %v295_v7, %v303_v9 }
  0xd5   :  { %3325 = vmatpush1.bf16.msra.mxu0 %v7815_v14  ;;  %3411 = vmatpush1.bf16.msra.mxu1 %v7817_v16  ;;  %v318_v14 = vld [vmem:[#allocation5 + $0x7d0] sm:$0xff]  ;;  %v311_v16 = vld [vmem:[#allocation5 + $0x798] sm:$0xff] }
  0xd6   :  { %3326 = vmatprep.subr.bf16.mxu0 %v7832_v17  ;;  %3412 = vmatprep.subr.bf16.mxu1 %v7834_v21  ;;  %v7946_v17 = vcombine.high %v295_v7, %v303_v9  ;;  %v7960_v21 = vcombine.high %v310_v13, %v318_v14  ;;  %v7959_v29 = vcombine.low %v310_v13, %v318_v14  ;;  %v422_v9 = vld [vmem:[#allocation5 + $0xb10] sm:$0xff]  ;;  %v431_v13 = vld [vmem:[#allocation5 + $0xb58] sm:$0xff] }
  0xd7   :  { %v7961_v30 = vcombine.low %v311_v16, %v319_v18 }
  0xd9   :  { %3327 = vmatpush1.bf16.msra.mxu0 %v7831_v23  ;;  %3413 = vmatpush1.bf16.msra.mxu1 %v7833_v24  ;;  %v334_v23 = vld [vmem:[#allocation5 + $0x850] sm:$0xff]  ;;  %v327_v24 = vld [vmem:[#allocation5 + $0x818] sm:$0xff] }
  0xda   :  { %3328 = vmatprep.subr.bf16.mxu0 %v7848_v26  ;;  %3414 = vmatprep.subr.bf16.mxu1 %v7850_v31  ;;  %v7962_v26 = vcombine.high %v311_v16, %v319_v18  ;;  %v7976_v31 = vcombine.high %v326_v22, %v334_v23  ;;  %v7975_v37 = vcombine.low %v326_v22, %v334_v23  ;;  %v438_v18 = vld [vmem:[#allocation5 + $0xb90] sm:$0xff]  ;;  %v447_v22 = vld [vmem:[#allocation5 + $0xbd8] sm:$0xff] }
  0xdb   :  { %v7977_v38 = vcombine.low %v327_v24, %v335_v27 }
  0xdd   :  { %3329 = vmatpush1.bf16.msra.mxu0 %v7847_v33  ;;  %3415 = vmatpush1.bf16.msra.mxu1 %v7849_v34  ;;  %v350_v33 = vld [vmem:[#allocation5 + $0x8d0] sm:$0xff]  ;;  %v343_v34 = vld [vmem:[#allocation5 + $0x898] sm:$0xff] }
  0xde   :  { %3330 = vmatprep.subr.bf16.mxu0 %v7864_v35  ;;  %3416 = vmatprep.subr.bf16.mxu1 %v7866_v39  ;;  %v7978_v35 = vcombine.high %v327_v24, %v335_v27  ;;  %v7992_v39 = vcombine.high %v342_v32, %v350_v33  ;;  %v7991_v45 = vcombine.low %v342_v32, %v350_v33  ;;  %v454_v27 = vld [vmem:[#allocation5 + $0xc10] sm:$0xff]  ;;  %v463_v32 = vld [vmem:[#allocation5 + $0xc58] sm:$0xff] }
  0xdf   :  { %v7993_v46 = vcombine.low %v343_v34, %v351_v36 }
  0xe1   :  { %3331 = vmatpush1.bf16.msra.mxu0 %v7863_v41  ;;  %3417 = vmatpush1.bf16.msra.mxu1 %v7865_v42  ;;  %v366_v41 = vld [vmem:[#allocation5 + $0x950] sm:$0xff]  ;;  %v359_v42 = vld [vmem:[#allocation5 + $0x918] sm:$0xff] }
  0xe2   :  { %3332 = vmatprep.subr.bf16.mxu0 %v7880_v43  ;;  %3418 = vmatprep.subr.bf16.mxu1 %v7882_v47  ;;  %v7994_v43 = vcombine.high %v343_v34, %v351_v36  ;;  %v8008_v47 = vcombine.high %v358_v40, %v366_v41  ;;  %v8007_v53 = vcombine.low %v358_v40, %v366_v41  ;;  %v470_v36 = vld [vmem:[#allocation5 + $0xc90] sm:$0xff]  ;;  %v479_v40 = vld [vmem:[#allocation5 + $0xcd8] sm:$0xff] }
  0xe3   :  { %v8009_v54 = vcombine.low %v359_v42, %v367_v44 }
  0xe5   :  { %3333 = vmatpush1.bf16.msra.mxu0 %v7879_v49  ;;  %3419 = vmatpush1.bf16.msra.mxu1 %v7881_v50  ;;  %v382_v49 = vld [vmem:[#allocation5 + $0x9d0] sm:$0xff]  ;;  %v375_v50 = vld [vmem:[#allocation5 + $0x998] sm:$0xff] }
  0xe6   :  { %3334 = vmatprep.subr.bf16.mxu0 %v7896_v51  ;;  %3420 = vmatprep.subr.bf16.mxu1 %v7898_v55  ;;  %v8010_v51 = vcombine.high %v359_v42, %v367_v44  ;;  %v8024_v55 = vcombine.high %v374_v48, %v382_v49  ;;  %v8023_v62 = vcombine.low %v374_v48, %v382_v49  ;;  %v486_v44 = vld [vmem:[#allocation5 + $0xd10] sm:$0xff]  ;;  %v495_v48 = vld [vmem:[#allocation5 + $0xd58] sm:$0xff] }
  0xe7   :  { %v8025_v63 = vcombine.low %v375_v50, %v383_v52 }
  0xe9   :  { %3335 = vmatpush1.bf16.msra.mxu0 %v7895_v57  ;;  %3421 = vmatpush1.bf16.msra.mxu1 %v7897_v59  ;;  %v398_v57 = vld [vmem:[#allocation5 + $0xa50] sm:$0xff]  ;;  %v391_v59 = vld [vmem:[#allocation5 + $0xa18] sm:$0xff] }
  0xea   :  { %3336 = vmatprep.subr.bf16.mxu0 %v7912_v60  ;;  %3422 = vmatprep.subr.bf16.mxu1 %v7914_v0  ;;  %v8026_v60 = vcombine.high %v375_v50, %v383_v52  ;;  %v8040_v0 = vcombine.high %v390_v56, %v398_v57  ;;  %v8039_v6 = vcombine.low %v390_v56, %v398_v57  ;;  %v502_v52 = vld [vmem:[#allocation5 + $0xd90] sm:$0xff]  ;;  %v511_v56 = vld [vmem:[#allocation5 + $0xdd8] sm:$0xff] }
  0xeb   :  { %v8041_v7 = vcombine.low %v391_v59, %v399_v61 }
  0xed   :  { %3337 = vmatpush1.bf16.msra.mxu0 %v7911_v2  ;;  %3423 = vmatpush1.bf16.msra.mxu1 %v7913_v3  ;;  %v414_v2 = vld [vmem:[#allocation5 + $0xad0] sm:$0xff]  ;;  %v407_v3 = vld [vmem:[#allocation5 + $0xa98] sm:$0xff] }
  0xee   :  { %3338 = vmatprep.subr.bf16.mxu0 %v7928_v4  ;;  %3424 = vmatprep.subr.bf16.mxu1 %v7930_v8  ;;  %v8042_v4 = vcombine.high %v391_v59, %v399_v61  ;;  %v8056_v8 = vcombine.high %v406_v1, %v414_v2  ;;  %v8055_v14 = vcombine.low %v406_v1, %v414_v2  ;;  %v518_v61 = vld [vmem:[#allocation5 + $0xe10] sm:$0xff]  ;;  %v527_v1 = vld [vmem:[#allocation5 + $0xe58] sm:$0xff] }
  0xef   :  { %v8057_v16 = vcombine.low %v407_v3, %v415_v5 }
  0xf1   :  { %3339 = vmatpush1.bf16.msra.mxu0 %v7927_v10  ;;  %3425 = vmatpush1.bf16.msra.mxu1 %v7929_v11  ;;  %v430_v10 = vld [vmem:[#allocation5 + $0xb50] sm:$0xff]  ;;  %v423_v11 = vld [vmem:[#allocation5 + $0xb18] sm:$0xff] }
  0xf2   :  { %3340 = vmatprep.subr.bf16.mxu0 %v7944_v12  ;;  %3426 = vmatprep.subr.bf16.mxu1 %v7946_v17  ;;  %v8058_v12 = vcombine.high %v407_v3, %v415_v5  ;;  %v8072_v17 = vcombine.high %v422_v9, %v430_v10  ;;  %v8071_v23 = vcombine.low %v422_v9, %v430_v10  ;;  %v534_v5 = vld [vmem:[#allocation5 + $0xe90] sm:$0xff]  ;;  %v543_v9 = vld [vmem:[#allocation5 + $0xed8] sm:$0xff] }
  0xf3   :  { %v8073_v24 = vcombine.low %v423_v11, %v431_v13 }
  0xf5   :  { %3341 = vmatpush1.bf16.msra.mxu0 %v7943_v19  ;;  %3427 = vmatpush1.bf16.msra.mxu1 %v7945_v20  ;;  %v446_v19 = vld [vmem:[#allocation5 + $0xbd0] sm:$0xff]  ;;  %v439_v20 = vld [vmem:[#allocation5 + $0xb98] sm:$0xff] }
  0xf6   :  { %3342 = vmatprep.subr.bf16.mxu0 %v7960_v21  ;;  %3428 = vmatprep.subr.bf16.mxu1 %v7962_v26  ;;  %v8074_v21 = vcombine.high %v423_v11, %v431_v13  ;;  %v8088_v26 = vcombine.high %v438_v18, %v446_v19  ;;  %v8087_v33 = vcombine.low %v438_v18, %v446_v19  ;;  %v550_v13 = vld [vmem:[#allocation5 + $0xf10] sm:$0xff]  ;;  %v559_v18 = vld [vmem:[#allocation5 + $0xf58] sm:$0xff] }
  0xf7   :  { %v8089_v34 = vcombine.low %v439_v20, %v447_v22 }
  0xf9   :  { %3343 = vmatpush1.bf16.msra.mxu0 %v7959_v29  ;;  %3429 = vmatpush1.bf16.msra.mxu1 %v7961_v30  ;;  %v462_v29 = vld [vmem:[#allocation5 + $0xc50] sm:$0xff]  ;;  %v455_v30 = vld [vmem:[#allocation5 + $0xc18] sm:$0xff] }
  0xfa   :  { %3355 = vmatprep.subr.bf16.mxu0 %v7976_v31  ;;  %3441 = vmatprep.subr.bf16.mxu1 %v7978_v35  ;;  %v8090_v31 = vcombine.high %v439_v20, %v447_v22  ;;  %v8104_v35 = vcombine.high %v454_v27, %v462_v29  ;;  %v8103_v41 = vcombine.low %v454_v27, %v462_v29  ;;  %v566_v22 = vld [vmem:[#allocation5 + $0xf90] sm:$0xff]  ;;  %v575_v27 = vld [vmem:[#allocation5 + $0xfd8] sm:$0xff] }
  0xfb   :  { %v8105_v42 = vcombine.low %v455_v30, %v463_v32 }
  0xfc   :  { %3345 = vmatmul.mubr.bf16.vlgmr.msra.gmra.mrb[4].mxu0 %v9792_v15  ;;  %3431 = vmatmul.mubr.bf16.vlgmr.msra.gmra.mrb[4].mxu1 %v9792_v15 }
  0xfd   :  { %3356 = vmatpush1.bf16.msra.mxu0 %v7975_v37  ;;  %3442 = vmatpush1.bf16.msra.mxu1 %v7977_v38  ;;  %v478_v37 = vld [vmem:[#allocation5 + $0xcd0] sm:$0xff]  ;;  %v471_v38 = vld [vmem:[#allocation5 + $0xc98] sm:$0xff] }
  0xfe   :  { %3357 = vmatprep.subr.bf16.mxu0 %v7992_v39  ;;  %3443 = vmatprep.subr.bf16.mxu1 %v7994_v43  ;;  %v8106_v39 = vcombine.high %v455_v30, %v463_v32  ;;  %v8120_v43 = vcombine.high %v470_v36, %v478_v37  ;;  %v8119_v49 = vcombine.low %v470_v36, %v478_v37  ;;  %v72_v32 = vld [vmem:[#allocation5 + $0x20] sm:$0xff]  ;;  %v81_v36 = vld [vmem:[#allocation5 + $0x68] sm:$0xff] }
  0xff   :  { %3387 = vmatprep.mubr.bf16.mxu0 %v9794_v25  ;;  %3473 = vmatprep.mubr.bf16.mxu1 %v9794_v25  ;;  %v8121_v50 = vcombine.low %v471_v38, %v479_v40 }
 0x101   :  { %3358 = vmatpush1.bf16.msra.mxu0 %v7991_v45  ;;  %3444 = vmatpush1.bf16.msra.mxu1 %v7993_v46  ;;  %v494_v45 = vld [vmem:[#allocation5 + $0xd50] sm:$0xff]  ;;  %v487_v46 = vld [vmem:[#allocation5 + $0xd18] sm:$0xff] }
 0x102   :  { %3359 = vmatprep.subr.bf16.mxu0 %v8008_v47  ;;  %3445 = vmatprep.subr.bf16.mxu1 %v8010_v51  ;;  %v8122_v47 = vcombine.high %v471_v38, %v479_v40  ;;  %v8136_v51 = vcombine.high %v486_v44, %v494_v45  ;;  %v8135_v57 = vcombine.low %v486_v44, %v494_v45  ;;  %v88_v40 = vld [vmem:[#allocation5 + $0xa0] sm:$0xff]  ;;  %v97_v44 = vld [vmem:[#allocation5 + $0xe8] sm:$0xff] }
 0x103   :  { %v8137_v59 = vcombine.low %v487_v46, %v495_v48 }
 0x105   :  { %3360 = vmatpush1.bf16.msra.mxu0 %v8007_v53  ;;  %3446 = vmatpush1.bf16.msra.mxu1 %v8009_v54  ;;  %v510_v53 = vld [vmem:[#allocation5 + $0xdd0] sm:$0xff]  ;;  %v503_v54 = vld [vmem:[#allocation5 + $0xd98] sm:$0xff] }
 0x106   :  { %3361 = vmatprep.subr.bf16.mxu0 %v8024_v55  ;;  %3447 = vmatprep.subr.bf16.mxu1 %v8026_v60  ;;  %v8138_v55 = vcombine.high %v487_v46, %v495_v48  ;;  %v8152_v60 = vcombine.high %v502_v52, %v510_v53  ;;  %v8151_v2 = vcombine.low %v502_v52, %v510_v53  ;;  %v104_v48 = vld [vmem:[#allocation5 + $0x120] sm:$0xff]  ;;  %v113_v52 = vld [vmem:[#allocation5 + $0x168] sm:$0xff] }
 0x107   :  { %v8153_v3 = vcombine.low %v503_v54, %v511_v56 }
 0x109   :  { %3362 = vmatpush1.bf16.msra.mxu0 %v8023_v62  ;;  %3448 = vmatpush1.bf16.msra.mxu1 %v8025_v63  ;;  %v526_v62 = vld [vmem:[#allocation5 + $0xe50] sm:$0xff]  ;;  %v519_v63 = vld [vmem:[#allocation5 + $0xe18] sm:$0xff] }
 0x10a   :  { %3363 = vmatprep.subr.bf16.mxu0 %v8040_v0  ;;  %3449 = vmatprep.subr.bf16.mxu1 %v8042_v4  ;;  %v8154_v0 = vcombine.high %v503_v54, %v511_v56  ;;  %v8168_v4 = vcombine.high %v518_v61, %v526_v62  ;;  %v8167_v10 = vcombine.low %v518_v61, %v526_v62  ;;  %v120_v56 = vld [vmem:[#allocation5 + $0x1a0] sm:$0xff]  ;;  %v129_v61 = vld [vmem:[#allocation5 + $0x1e8] sm:$0xff] }
 0x10b   :  { %v8169_v11 = vcombine.low %v519_v63, %v527_v1 }
 0x10d   :  { %3364 = vmatpush1.bf16.msra.mxu0 %v8039_v6  ;;  %3450 = vmatpush1.bf16.msra.mxu1 %v8041_v7  ;;  %v542_v6 = vld [vmem:[#allocation5 + $0xed0] sm:$0xff]  ;;  %v535_v7 = vld [vmem:[#allocation5 + $0xe98] sm:$0xff] }
 0x10e   :  { %3365 = vmatprep.subr.bf16.mxu0 %v8056_v8  ;;  %3451 = vmatprep.subr.bf16.mxu1 %v8058_v12  ;;  %v8170_v8 = vcombine.high %v519_v63, %v527_v1  ;;  %v8184_v12 = vcombine.high %v534_v5, %v542_v6  ;;  %v8183_v19 = vcombine.low %v534_v5, %v542_v6  ;;  %v136_v1 = vld [vmem:[#allocation5 + $0x220] sm:$0xff]  ;;  %v145_v5 = vld [vmem:[#allocation5 + $0x268] sm:$0xff] }
 0x10f   :  { %v8185_v20 = vcombine.low %v535_v7, %v543_v9 }
 0x111   :  { %3366 = vmatpush1.bf16.msra.mxu0 %v8055_v14  ;;  %3452 = vmatpush1.bf16.msra.mxu1 %v8057_v16  ;;  %v558_v14 = vld [vmem:[#allocation5 + $0xf50] sm:$0xff]  ;;  %v551_v16 = vld [vmem:[#allocation5 + $0xf18] sm:$0xff] }
 0x112   :  { %3367 = vmatprep.subr.bf16.mxu0 %v8072_v17  ;;  %3453 = vmatprep.subr.bf16.mxu1 %v8074_v21  ;;  %v8186_v17 = vcombine.high %v535_v7, %v543_v9  ;;  %v8200_v21 = vcombine.high %v550_v13, %v558_v14  ;;  %v8199_v29 = vcombine.low %v550_v13, %v558_v14  ;;  %v152_v9 = vld [vmem:[#allocation5 + $0x2a0] sm:$0xff]  ;;  %v161_v13 = vld [vmem:[#allocation5 + $0x2e8] sm:$0xff] }
 0x113   :  { %v8201_v30 = vcombine.low %v551_v16, %v559_v18 }
 0x115   :  { %3368 = vmatpush1.bf16.msra.mxu0 %v8071_v23  ;;  %3454 = vmatpush1.bf16.msra.mxu1 %v8073_v24  ;;  %v574_v23 = vld [vmem:[#allocation5 + $0xfd0] sm:$0xff]  ;;  %v567_v24 = vld [vmem:[#allocation5 + $0xf98] sm:$0xff] }
 0x116   :  { %3369 = vmatprep.subr.bf16.mxu0 %v8088_v26  ;;  %3455 = vmatprep.subr.bf16.mxu1 %v8090_v31  ;;  %v8202_v26 = vcombine.high %v551_v16, %v559_v18  ;;  %v8216_v31 = vcombine.high %v566_v22, %v574_v23  ;;  %v8215_v37 = vcombine.low %v566_v22, %v574_v23  ;;  %v168_v18 = vld [vmem:[#allocation5 + $0x320] sm:$0xff]  ;;  %v177_v22 = vld [vmem:[#allocation5 + $0x368] sm:$0xff] }
 0x117   :  { %v8217_v38 = vcombine.low %v567_v24, %v575_v27 }
 0x119   :  { %3370 = vmatpush1.bf16.msra.mxu0 %v8087_v33  ;;  %3456 = vmatpush1.bf16.msra.mxu1 %v8089_v34  ;;  %v80_v33 = vld [vmem:[#allocation5 + $0x60] sm:$0xff]  ;;  %v73_v34 = vld [vmem:[#allocation5 + $0x28] sm:$0xff] }
 0x11a   :  { %3371 = vmatprep.subr.bf16.mxu0 %v8104_v35  ;;  %3457 = vmatprep.subr.bf16.mxu1 %v8106_v39  ;;  %v8218_v35 = vcombine.high %v567_v24, %v575_v27  ;;  %v7724_v39 = vcombine.high %v72_v32, %v80_v33  ;;  %v7723_v45 = vcombine.low %v72_v32, %v80_v33  ;;  %v184_v27 = vld [vmem:[#allocation5 + $0x3a0] sm:$0xff]  ;;  %v193_v32 = vld [vmem:[#allocation5 + $0x3e8] sm:$0xff] }
 0x11b   :  { %v7725_v46 = vcombine.low %v73_v34, %v81_v36 }
 0x11d   :  { %3372 = vmatpush1.bf16.msra.mxu0 %v8103_v41  ;;  %3458 = vmatpush1.bf16.msra.mxu1 %v8105_v42  ;;  %v96_v41 = vld [vmem:[#allocation5 + $0xe0] sm:$0xff]  ;;  %v89_v42 = vld [vmem:[#allocation5 + $0xa8] sm:$0xff] }
 0x11e   :  { %3373 = vmatprep.subr.bf16.mxu0 %v8120_v43  ;;  %3459 = vmatprep.subr.bf16.mxu1 %v8122_v47  ;;  %v7726_v43 = vcombine.high %v73_v34, %v81_v36  ;;  %v7740_v47 = vcombine.high %v88_v40, %v96_v41  ;;  %v7739_v53 = vcombine.low %v88_v40, %v96_v41  ;;  %v200_v36 = vld [vmem:[#allocation5 + $0x420] sm:$0xff]  ;;  %v209_v40 = vld [vmem:[#allocation5 + $0x468] sm:$0xff] }
 0x11f   :  { %v7741_v54 = vcombine.low %v89_v42, %v97_v44 }
 0x121   :  { %3374 = vmatpush1.bf16.msra.mxu0 %v8119_v49  ;;  %3460 = vmatpush1.bf16.msra.mxu1 %v8121_v50  ;;  %v112_v49 = vld [vmem:[#allocation5 + $0x160] sm:$0xff]  ;;  %v105_v50 = vld [vmem:[#allocation5 + $0x128] sm:$0xff] }
 0x122   :  { %3375 = vmatprep.subr.bf16.mxu0 %v8136_v51  ;;  %3461 = vmatprep.subr.bf16.mxu1 %v8138_v55  ;;  %v7742_v51 = vcombine.high %v89_v42, %v97_v44  ;;  %v7756_v55 = vcombine.high %v104_v48, %v112_v49  ;;  %v7755_v62 = vcombine.low %v104_v48, %v112_v49  ;;  %v216_v44 = vld [vmem:[#allocation5 + $0x4a0] sm:$0xff]  ;;  %v225_v48 = vld [vmem:[#allocation5 + $0x4e8] sm:$0xff] }
 0x123   :  { %v7757_v63 = vcombine.low %v105_v50, %v113_v52 }
 0x125   :  { %3376 = vmatpush1.bf16.msra.mxu0 %v8135_v57  ;;  %3462 = vmatpush1.bf16.msra.mxu1 %v8137_v59  ;;  %v128_v57 = vld [vmem:[#allocation5 + $0x1e0] sm:$0xff]  ;;  %v121_v59 = vld [vmem:[#allocation5 + $0x1a8] sm:$0xff] }
 0x126   :  { %3377 = vmatprep.subr.bf16.mxu0 %v8152_v60  ;;  %3463 = vmatprep.subr.bf16.mxu1 %v8154_v0  ;;  %v7758_v60 = vcombine.high %v105_v50, %v113_v52  ;;  %v7772_v0 = vcombine.high %v120_v56, %v128_v57  ;;  %v7771_v6 = vcombine.low %v120_v56, %v128_v57  ;;  %v232_v52 = vld [vmem:[#allocation5 + $0x520] sm:$0xff]  ;;  %v241_v56 = vld [vmem:[#allocation5 + $0x568] sm:$0xff] }
 0x127   :  { %v7773_v7 = vcombine.low %v121_v59, %v129_v61 }
 0x129   :  { %3378 = vmatpush1.bf16.msra.mxu0 %v8151_v2  ;;  %3464 = vmatpush1.bf16.msra.mxu1 %v8153_v3  ;;  %v144_v2 = vld [vmem:[#allocation5 + $0x260] sm:$0xff]  ;;  %v137_v3 = vld [vmem:[#allocation5 + $0x228] sm:$0xff] }
 0x12a   :  { %3379 = vmatprep.subr.bf16.mxu0 %v8168_v4  ;;  %3465 = vmatprep.subr.bf16.mxu1 %v8170_v8  ;;  %v7774_v4 = vcombine.high %v121_v59, %v129_v61  ;;  %v7788_v8 = vcombine.high %v136_v1, %v144_v2  ;;  %v7787_v14 = vcombine.low %v136_v1, %v144_v2  ;;  %v248_v61 = vld [vmem:[#allocation5 + $0x5a0] sm:$0xff]  ;;  %v257_v1 = vld [vmem:[#allocation5 + $0x5e8] sm:$0xff] }
 0x12b   :  { %v7789_v16 = vcombine.low %v137_v3, %v145_v5 }
 0x12d   :  { %3380 = vmatpush1.bf16.msra.mxu0 %v8167_v10  ;;  %3466 = vmatpush1.bf16.msra.mxu1 %v8169_v11  ;;  %v160_v10 = vld [vmem:[#allocation5 + $0x2e0] sm:$0xff]  ;;  %v153_v11 = vld [vmem:[#allocation5 + $0x2a8] sm:$0xff] }
 0x12e   :  { %3381 = vmatprep.subr.bf16.mxu0 %v8184_v12  ;;  %3467 = vmatprep.subr.bf16.mxu1 %v8186_v17  ;;  %v7790_v12 = vcombine.high %v137_v3, %v145_v5  ;;  %v7804_v17 = vcombine.high %v152_v9, %v160_v10  ;;  %v7803_v23 = vcombine.low %v152_v9, %v160_v10  ;;  %v264_v5 = vld [vmem:[#allocation5 + $0x620] sm:$0xff]  ;;  %v273_v9 = vld [vmem:[#allocation5 + $0x668] sm:$0xff] }
 0x12f   :  { %v7805_v24 = vcombine.low %v153_v11, %v161_v13 }
 0x131   :  { %3382 = vmatpush1.bf16.msra.mxu0 %v8183_v19  ;;  %3468 = vmatpush1.bf16.msra.mxu1 %v8185_v20  ;;  %v176_v19 = vld [vmem:[#allocation5 + $0x360] sm:$0xff]  ;;  %v169_v20 = vld [vmem:[#allocation5 + $0x328] sm:$0xff] }
 0x132   :  { %3383 = vmatprep.subr.bf16.mxu0 %v8200_v21  ;;  %3469 = vmatprep.subr.bf16.mxu1 %v8202_v26  ;;  %v7806_v21 = vcombine.high %v153_v11, %v161_v13  ;;  %v7820_v26 = vcombine.high %v168_v18, %v176_v19  ;;  %v7819_v33 = vcombine.low %v168_v18, %v176_v19  ;;  %v280_v13 = vld [vmem:[#allocation5 + $0x6a0] sm:$0xff]  ;;  %v289_v18 = vld [vmem:[#allocation5 + $0x6e8] sm:$0xff] }
 0x133   :  { %v7821_v34 = vcombine.low %v169_v20, %v177_v22 }
 0x135   :  { %3384 = vmatpush1.bf16.msra.mxu0 %v8199_v29  ;;  %3470 = vmatpush1.bf16.msra.mxu1 %v8201_v30  ;;  %v192_v29 = vld [vmem:[#allocation5 + $0x3e0] sm:$0xff]  ;;  %v185_v30 = vld [vmem:[#allocation5 + $0x3a8] sm:$0xff] }
 0x136   :  { %3385 = vmatprep.subr.bf16.mxu0 %v8216_v31  ;;  %3471 = vmatprep.subr.bf16.mxu1 %v8218_v35  ;;  %v7822_v31 = vcombine.high %v169_v20, %v177_v22  ;;  %v7836_v35 = vcombine.high %v184_v27, %v192_v29  ;;  %v7835_v41 = vcombine.low %v184_v27, %v192_v29  ;;  %v296_v22 = vld [vmem:[#allocation5 + $0x720] sm:$0xff]  ;;  %v305_v27 = vld [vmem:[#allocation5 + $0x768] sm:$0xff] }
 0x137   :  { %v7837_v42 = vcombine.low %v185_v30, %v193_v32 }
 0x139   :  { %3386 = vmatpush1.bf16.msra.mxu0 %v8215_v37  ;;  %3472 = vmatpush1.bf16.msra.mxu1 %v8217_v38  ;;  %v208_v37 = vld [vmem:[#allocation5 + $0x460] sm:$0xff]  ;;  %v201_v38 = vld [vmem:[#allocation5 + $0x428] sm:$0xff] }
 0x13a   :  { %3484 = vmatprep.subr.bf16.mxu0 %v7724_v39  ;;  %3570 = vmatprep.subr.bf16.mxu1 %v7726_v43  ;;  %v7838_v39 = vcombine.high %v185_v30, %v193_v32  ;;  %v7852_v43 = vcombine.high %v200_v36, %v208_v37  ;;  %v7851_v49 = vcombine.low %v200_v36, %v208_v37  ;;  %v312_v32 = vld [vmem:[#allocation5 + $0x7a0] sm:$0xff]  ;;  %v321_v36 = vld [vmem:[#allocation5 + $0x7e8] sm:$0xff] }
 0x13b   :  { %v7853_v50 = vcombine.low %v201_v38, %v209_v40 }
 0x13c   :  { %3388 = vmatmul.mubr.bf16.vlgmr.msra.gmra.mrb[4].mxu0 %v9800_v28  ;;  %3474 = vmatmul.mubr.bf16.vlgmr.msra.gmra.mrb[4].mxu1 %v9800_v28 }
 0x13d   :  { %3485 = vmatpush1.bf16.msra.mxu0 %v7723_v45  ;;  %3571 = vmatpush1.bf16.msra.mxu1 %v7725_v46  ;;  %v224_v45 = vld [vmem:[#allocation5 + $0x4e0] sm:$0xff]  ;;  %v217_v46 = vld [vmem:[#allocation5 + $0x4a8] sm:$0xff] }
 0x13e   :  { %3486 = vmatprep.subr.bf16.mxu0 %v7740_v47  ;;  %3572 = vmatprep.subr.bf16.mxu1 %v7742_v51  ;;  %v7854_v47 = vcombine.high %v201_v38, %v209_v40  ;;  %v7868_v51 = vcombine.high %v216_v44, %v224_v45  ;;  %v7867_v57 = vcombine.low %v216_v44, %v224_v45  ;;  %v328_v40 = vld [vmem:[#allocation5 + $0x820] sm:$0xff]  ;;  %v337_v44 = vld [vmem:[#allocation5 + $0x868] sm:$0xff] }
 0x13f   :  { %3516 = vmatprep.mubr.bf16.mxu0 %v9788_v58  ;;  %3602 = vmatprep.mubr.bf16.mxu1 %v9788_v58  ;;  %v7869_v59 = vcombine.low %v217_v46, %v225_v48 }
 0x141   :  { %3487 = vmatpush1.bf16.msra.mxu0 %v7739_v53  ;;  %3573 = vmatpush1.bf16.msra.mxu1 %v7741_v54  ;;  %v240_v53 = vld [vmem:[#allocation5 + $0x560] sm:$0xff]  ;;  %v233_v54 = vld [vmem:[#allocation5 + $0x528] sm:$0xff] }
 0x142   :  { %3488 = vmatprep.subr.bf16.mxu0 %v7756_v55  ;;  %3574 = vmatprep.subr.bf16.mxu1 %v7758_v60  ;;  %v7870_v55 = vcombine.high %v217_v46, %v225_v48  ;;  %v7884_v60 = vcombine.high %v232_v52, %v240_v53  ;;  %v7883_v2 = vcombine.low %v232_v52, %v240_v53  ;;  %v344_v48 = vld [vmem:[#allocation5 + $0x8a0] sm:$0xff]  ;;  %v353_v52 = vld [vmem:[#allocation5 + $0x8e8] sm:$0xff] }
 0x143   :  { %v7885_v3 = vcombine.low %v233_v54, %v241_v56 }
 0x145   :  { %3489 = vmatpush1.bf16.msra.mxu0 %v7755_v62  ;;  %3575 = vmatpush1.bf16.msra.mxu1 %v7757_v63  ;;  %v256_v62 = vld [vmem:[#allocation5 + $0x5e0] sm:$0xff]  ;;  %v249_v63 = vld [vmem:[#allocation5 + $0x5a8] sm:$0xff] }
 0x146   :  { %3490 = vmatprep.subr.bf16.mxu0 %v7772_v0  ;;  %3576 = vmatprep.subr.bf16.mxu1 %v7774_v4  ;;  %v7886_v0 = vcombine.high %v233_v54, %v241_v56  ;;  %v7900_v4 = vcombine.high %v248_v61, %v256_v62  ;;  %v7899_v10 = vcombine.low %v248_v61, %v256_v62  ;;  %v360_v56 = vld [vmem:[#allocation5 + $0x920] sm:$0xff]  ;;  %v369_v61 = vld [vmem:[#allocation5 + $0x968] sm:$0xff] }
 0x147   :  { %v7901_v11 = vcombine.low %v249_v63, %v257_v1 }
 0x149   :  { %3491 = vmatpush1.bf16.msra.mxu0 %v7771_v6  ;;  %3577 = vmatpush1.bf16.msra.mxu1 %v7773_v7  ;;  %v272_v6 = vld [vmem:[#allocation5 + $0x660] sm:$0xff]  ;;  %v265_v7 = vld [vmem:[#allocation5 + $0x628] sm:$0xff] }
 0x14a   :  { %3492 = vmatprep.subr.bf16.mxu0 %v7788_v8  ;;  %3578 = vmatprep.subr.bf16.mxu1 %v7790_v12  ;;  %v7902_v8 = vcombine.high %v249_v63, %v257_v1  ;;  %v7916_v12 = vcombine.high %v264_v5, %v272_v6  ;;  %v7915_v19 = vcombine.low %v264_v5, %v272_v6  ;;  %v385_v5 = vld [vmem:[#allocation5 + $0x9e8] sm:$0xff] }
 0x14b   :  { %v7917_v20 = vcombine.low %v265_v7, %v273_v9 }
 0x14d   :  { %3493 = vmatpush1.bf16.msra.mxu0 %v7787_v14  ;;  %3579 = vmatpush1.bf16.msra.mxu1 %v7789_v16  ;;  %v288_v14 = vld [vmem:[#allocation5 + $0x6e0] sm:$0xff]  ;;  %v281_v16 = vld [vmem:[#allocation5 + $0x6a8] sm:$0xff] }
 0x14e   :  { %3494 = vmatprep.subr.bf16.mxu0 %v7804_v17  ;;  %3580 = vmatprep.subr.bf16.mxu1 %v7806_v21  ;;  %v7918_v17 = vcombine.high %v265_v7, %v273_v9  ;;  %v7932_v21 = vcombine.high %v280_v13, %v288_v14  ;;  %v7931_v29 = vcombine.low %v280_v13, %v288_v14  ;;  %v401_v13 = vld [vmem:[#allocation5 + $0xa68] sm:$0xff] }
 0x14f   :  { %v7933_v30 = vcombine.low %v281_v16, %v289_v18 }
 0x151   :  { %3495 = vmatpush1.bf16.msra.mxu0 %v7803_v23  ;;  %3581 = vmatpush1.bf16.msra.mxu1 %v7805_v24  ;;  %v304_v23 = vld [vmem:[#allocation5 + $0x760] sm:$0xff]  ;;  %v297_v24 = vld [vmem:[#allocation5 + $0x728] sm:$0xff] }
 0x152   :  { %3496 = vmatprep.subr.bf16.mxu0 %v7820_v26  ;;  %3582 = vmatprep.subr.bf16.mxu1 %v7822_v31  ;;  %v7934_v26 = vcombine.high %v281_v16, %v289_v18  ;;  %v7948_v31 = vcombine.high %v296_v22, %v304_v23  ;;  %v7947_v37 = vcombine.low %v296_v22, %v304_v23  ;;  %v417_v22 = vld [vmem:[#allocation5 + $0xae8] sm:$0xff] }
 0x153   :  { %v7949_v38 = vcombine.low %v297_v24, %v305_v27 }
 0x155   :  { %3497 = vmatpush1.bf16.msra.mxu0 %v7819_v33  ;;  %3583 = vmatpush1.bf16.msra.mxu1 %v7821_v34  ;;  %v320_v33 = vld [vmem:[#allocation5 + $0x7e0] sm:$0xff]  ;;  %v313_v34 = vld [vmem:[#allocation5 + $0x7a8] sm:$0xff] }
 0x156   :  { %3498 = vmatprep.subr.bf16.mxu0 %v7836_v35  ;;  %3584 = vmatprep.subr.bf16.mxu1 %v7838_v39  ;;  %v7950_v35 = vcombine.high %v297_v24, %v305_v27  ;;  %v7964_v39 = vcombine.high %v312_v32, %v320_v33  ;;  %v7963_v45 = vcombine.low %v312_v32, %v320_v33  ;;  %v433_v32 = vld [vmem:[#allocation5 + $0xb68] sm:$0xff] }
 0x157   :  { %v7965_v46 = vcombine.low %v313_v34, %v321_v36 }
 0x159   :  { %3499 = vmatpush1.bf16.msra.mxu0 %v7835_v41  ;;  %3585 = vmatpush1.bf16.msra.mxu1 %v7837_v42  ;;  %v336_v41 = vld [vmem:[#allocation5 + $0x860] sm:$0xff]  ;;  %v329_v42 = vld [vmem:[#allocation5 + $0x828] sm:$0xff] }
 0x15a   :  { %3500 = vmatprep.subr.bf16.mxu0 %v7852_v43  ;;  %3586 = vmatprep.subr.bf16.mxu1 %v7854_v47  ;;  %v7966_v43 = vcombine.high %v313_v34, %v321_v36  ;;  %v7980_v47 = vcombine.high %v328_v40, %v336_v41  ;;  %v7979_v53 = vcombine.low %v328_v40, %v336_v41  ;;  %v440_v36 = vld [vmem:[#allocation5 + $0xba0] sm:$0xff]  ;;  %v441_v40 = vld [vmem:[#allocation5 + $0xba8] sm:$0xff] }
 0x15b   :  { %v7981_v54 = vcombine.low %v329_v42, %v337_v44  ;;  %v449_v41 = vld [vmem:[#allocation5 + $0xbe8] sm:$0xff] }
 0x15d   :  { %3501 = vmatpush1.bf16.msra.mxu0 %v7851_v49  ;;  %3587 = vmatpush1.bf16.msra.mxu1 %v7853_v50  ;;  %v352_v49 = vld [vmem:[#allocation5 + $0x8e0] sm:$0xff]  ;;  %v345_v50 = vld [vmem:[#allocation5 + $0x8a8] sm:$0xff] }
 0x15e   :  { %3502 = vmatprep.subr.bf16.mxu0 %v7868_v51  ;;  %3588 = vmatprep.subr.bf16.mxu1 %v7870_v55  ;;  %v7982_v51 = vcombine.high %v329_v42, %v337_v44  ;;  %v7996_v55 = vcombine.high %v344_v48, %v352_v49  ;;  %v7995_v62 = vcombine.low %v344_v48, %v352_v49 }
 0x15f   :  { %v7997_v63 = vcombine.low %v345_v50, %v353_v52 }
 0x161   :  { %3503 = vmatpush1.bf16.msra.mxu0 %v7867_v57  ;;  %3589 = vmatpush1.bf16.msra.mxu1 %v7869_v59  ;;  %v368_v57 = vld [vmem:[#allocation5 + $0x960] sm:$0xff]  ;;  %v361_v59 = vld [vmem:[#allocation5 + $0x928] sm:$0xff] }
 0x162   :  { %3504 = vmatprep.subr.bf16.mxu0 %v7884_v60  ;;  %3590 = vmatprep.subr.bf16.mxu1 %v7886_v0  ;;  %v7998_v60 = vcombine.high %v345_v50, %v353_v52  ;;  %v8012_v0 = vcombine.high %v360_v56, %v368_v57  ;;  %v8014_v1 = vcombine.high %v361_v59, %v369_v61 }
 0x163   :  { %v8011_v6 = vcombine.low %v360_v56, %v368_v57  ;;  %v8013_v7 = vcombine.low %v361_v59, %v369_v61  ;;  %v464_v61 = vld [vmem:[#allocation5 + $0xc60] sm:$0xff] }
 0x165   :  { %3505 = vmatpush1.bf16.msra.mxu0 %v7883_v2  ;;  %3591 = vmatpush1.bf16.msra.mxu1 %v7885_v3  ;;  %v376_v2 = vld [vmem:[#allocation5 + $0x9a0] sm:$0xff] }
 0x166   :  { %3506 = vmatprep.subr.bf16.mxu0 %v7900_v4  ;;  %3592 = vmatprep.subr.bf16.mxu1 %v7902_v8  ;;  %v384_v3 = vld [vmem:[#allocation5 + $0x9e0] sm:$0xff]  ;;  %v377_v4 = vld [vmem:[#allocation5 + $0x9a8] sm:$0xff] }
 0x167   :  { %v8028_v8 = vcombine.high %v376_v2, %v384_v3  ;;  %v8030_v9 = vcombine.high %v377_v4, %v385_v5  ;;  %v8027_v14 = vcombine.low %v376_v2, %v384_v3  ;;  %v8029_v16 = vcombine.low %v377_v4, %v385_v5  ;;  %v465_v2 = vld [vmem:[#allocation5 + $0xc68] sm:$0xff] }
 0x169   :  { %3507 = vmatpush1.bf16.msra.mxu0 %v7899_v10  ;;  %3593 = vmatpush1.bf16.msra.mxu1 %v7901_v11  ;;  %v392_v10 = vld [vmem:[#allocation5 + $0xa20] sm:$0xff] }
 0x16a   :  { %3508 = vmatprep.subr.bf16.mxu0 %v7916_v12  ;;  %3594 = vmatprep.subr.bf16.mxu1 %v7918_v17  ;;  %v400_v11 = vld [vmem:[#allocation5 + $0xa60] sm:$0xff]  ;;  %v393_v12 = vld [vmem:[#allocation5 + $0xa28] sm:$0xff] }
 0x16b   :  { %v8044_v17 = vcombine.high %v392_v10, %v400_v11  ;;  %v8046_v18 = vcombine.high %v393_v12, %v401_v13  ;;  %v8043_v23 = vcombine.low %v392_v10, %v400_v11  ;;  %v8045_v24 = vcombine.low %v393_v12, %v401_v13  ;;  %v472_v10 = vld [vmem:[#allocation5 + $0xca0] sm:$0xff]  ;;  %v473_v12 = vld [vmem:[#allocation5 + $0xca8] sm:$0xff] }
 0x16c   :  { %v480_v11 = vld [vmem:[#allocation5 + $0xce0] sm:$0xff]  ;;  %v481_v13 = vld [vmem:[#allocation5 + $0xce8] sm:$0xff] }
 0x16d   :  { %3509 = vmatpush1.bf16.msra.mxu0 %v7915_v19  ;;  %3595 = vmatpush1.bf16.msra.mxu1 %v7917_v20  ;;  %v408_v19 = vld [vmem:[#allocation5 + $0xaa0] sm:$0xff] }
 0x16e   :  { %3510 = vmatprep.subr.bf16.mxu0 %v7932_v21  ;;  %3596 = vmatprep.subr.bf16.mxu1 %v7934_v26  ;;  %v416_v20 = vld [vmem:[#allocation5 + $0xae0] sm:$0xff]  ;;  %v409_v21 = vld [vmem:[#allocation5 + $0xaa8] sm:$0xff] }
 0x16f   :  { %v8060_v26 = vcombine.high %v408_v19, %v416_v20  ;;  %v8062_v27 = vcombine.high %v409_v21, %v417_v22  ;;  %v8059_v33 = vcombine.low %v408_v19, %v416_v20  ;;  %v8061_v34 = vcombine.low %v409_v21, %v417_v22  ;;  %v488_v19 = vld [vmem:[#allocation5 + $0xd20] sm:$0xff]  ;;  %v489_v21 = vld [vmem:[#allocation5 + $0xd28] sm:$0xff] }
 0x170   :  { %v496_v20 = vld [vmem:[#allocation5 + $0xd60] sm:$0xff]  ;;  %v497_v22 = vld [vmem:[#allocation5 + $0xd68] sm:$0xff] }
 0x171   :  { %3511 = vmatpush1.bf16.msra.mxu0 %v7931_v29  ;;  %3597 = vmatpush1.bf16.msra.mxu1 %v7933_v30  ;;  %v424_v29 = vld [vmem:[#allocation5 + $0xb20] sm:$0xff] }
 0x172   :  { %3512 = vmatprep.subr.bf16.mxu0 %v7948_v31  ;;  %3598 = vmatprep.subr.bf16.mxu1 %v7950_v35  ;;  %v432_v30 = vld [vmem:[#allocation5 + $0xb60] sm:$0xff]  ;;  %v425_v31 = vld [vmem:[#allocation5 + $0xb28] sm:$0xff] }
 0x173   :  { %v8076_v35 = vcombine.high %v424_v29, %v432_v30 }
 0x175   :  { %3513 = vmatpush1.bf16.msra.mxu0 %v7947_v37  ;;  %3599 = vmatpush1.bf16.msra.mxu1 %v7949_v38  ;;  %v8078_v38 = vcombine.high %v425_v31, %v433_v32 }
 0x176   :  { %3514 = vmatprep.subr.bf16.mxu0 %v7964_v39  ;;  %3600 = vmatprep.subr.bf16.mxu1 %v7966_v43  ;;  %v448_v39 = vld [vmem:[#allocation5 + $0xbe0] sm:$0xff] }
 0x177   :  { %v8092_v52 = vcombine.high %v440_v36, %v448_v39  ;;  %v8091_v5 = vcombine.low %v440_v36, %v448_v39  ;;  %v521_v39 = vld [vmem:[#allocation5 + $0xe28] sm:$0xff] }
 0x179   :  { %3515 = vmatpush1.bf16.msra.mxu0 %v7963_v45  ;;  %3601 = vmatpush1.bf16.msra.mxu1 %v7965_v46  ;;  %v8075_v46 = vcombine.low %v424_v29, %v432_v30  ;;  %v504_v29 = vld [vmem:[#allocation5 + $0xda0] sm:$0xff] }
 0x17a   :  { %3527 = vmatprep.subr.bf16.mxu0 %v7980_v47  ;;  %3613 = vmatprep.subr.bf16.mxu1 %v7982_v51  ;;  %v8077_v47 = vcombine.low %v425_v31, %v433_v32  ;;  %v512_v30 = vld [vmem:[#allocation5 + $0xde0] sm:$0xff]  ;;  %v505_v31 = vld [vmem:[#allocation5 + $0xda8] sm:$0xff] }
 0x17b   :  { %v513_v32 = vld [vmem:[#allocation5 + $0xde8] sm:$0xff] }
 0x17c   :  { %3517 = vmatmul.mubr.bf16.vlgmr.msra.gmra.mrb[8].mxu0 %v9792_v15  ;;  %3603 = vmatmul.mubr.bf16.vlgmr.msra.gmra.mrb[8].mxu1 %v9792_v15  ;;  %v8158_v36 = vcombine.high %v505_v31, %v513_v32 }
 0x17d   :  { %3528 = vmatpush1.bf16.msra.mxu0 %v7979_v53  ;;  %3614 = vmatpush1.bf16.msra.mxu1 %v7981_v54  ;;  %v8094_v53 = vcombine.high %v441_v40, %v449_v41  ;;  %v456_v54 = vld [vmem:[#allocation5 + $0xc20] sm:$0xff] }
 0x17e   :  { %3529 = vmatprep.subr.bf16.mxu0 %v7996_v55  ;;  %3615 = vmatprep.subr.bf16.mxu1 %v7998_v60 }
 0x17f   :  { %3559 = vmatprep.mubr.bf16.mxu0 %v9794_v25  ;;  %3645 = vmatprep.mubr.bf16.mxu1 %v9794_v25 }
 0x181   :  { %3530 = vmatpush1.bf16.msra.mxu0 %v7995_v62  ;;  %3616 = vmatpush1.bf16.msra.mxu1 %v7997_v63 }
 0x182   :  { %3531 = vmatprep.subr.bf16.mxu0 %v8012_v0  ;;  %3617 = vmatprep.subr.bf16.mxu1 %v8014_v1  ;;  %v457_v1 = vld [vmem:[#allocation5 + $0xc28] sm:$0xff] }
 0x185   :  { %3532 = vmatpush1.bf16.msra.mxu0 %v8011_v6  ;;  %3618 = vmatpush1.bf16.msra.mxu1 %v8013_v7  ;;  %v8093_v7 = vcombine.low %v441_v40, %v449_v41  ;;  %v529_v40 = vld [vmem:[#allocation5 + $0xe68] sm:$0xff]  ;;  %v8155_v41 = vcombine.low %v504_v29, %v512_v30 }
 0x186   :  { %3533 = vmatprep.subr.bf16.mxu0 %v8028_v8  ;;  %3619 = vmatprep.subr.bf16.mxu1 %v8030_v9  ;;  %v8108_v8 = vcombine.high %v456_v54, %v464_v61  ;;  %v8110_v9 = vcombine.high %v457_v1, %v465_v2 }
 0x189   :  { %3534 = vmatpush1.bf16.msra.mxu0 %v8027_v14  ;;  %3620 = vmatpush1.bf16.msra.mxu1 %v8029_v16  ;;  %v8107_v14 = vcombine.low %v456_v54, %v464_v61  ;;  %v8109_v16 = vcombine.low %v457_v1, %v465_v2  ;;  %v560_v54 = vld [vmem:[#allocation5 + $0xf60] sm:$0xff]  ;;  %v569_v1 = vld [vmem:[#allocation5 + $0xfa8] sm:$0xff] }
 0x18a   :  { %3535 = vmatprep.subr.bf16.mxu0 %v8044_v17  ;;  %3621 = vmatprep.subr.bf16.mxu1 %v8046_v18  ;;  %v8124_v17 = vcombine.high %v472_v10, %v480_v11  ;;  %v8126_v18 = vcombine.high %v473_v12, %v481_v13  ;;  %v577_v2 = vld [vmem:[#allocation5 + $0xfe8] sm:$0xff] }
 0x18d   :  { %3536 = vmatpush1.bf16.msra.mxu0 %v8043_v23  ;;  %3622 = vmatpush1.bf16.msra.mxu1 %v8045_v24  ;;  %v8123_v23 = vcombine.low %v472_v10, %v480_v11  ;;  %v8125_v24 = vcombine.low %v473_v12, %v481_v13  ;;  %v74_v10 = vld [vmem:[#allocation5 + $0x30] sm:$0xff]  ;;  %v75_v12 = vld [vmem:[#allocation5 + $0x38] sm:$0xff] }
 0x18e   :  { %3537 = vmatprep.subr.bf16.mxu0 %v8060_v26  ;;  %3623 = vmatprep.subr.bf16.mxu1 %v8062_v27  ;;  %v8140_v26 = vcombine.high %v488_v19, %v496_v20  ;;  %v8142_v27 = vcombine.high %v489_v21, %v497_v22  ;;  %v82_v11 = vld [vmem:[#allocation5 + $0x70] sm:$0xff]  ;;  %v83_v13 = vld [vmem:[#allocation5 + $0x78] sm:$0xff] }
 0x18f   :  { %v3217_v37 = vpop.f32.mrb[0].mxu0  ;;  %v3303_v42 = vpop.f32.mrb[0].mxu1 }
 0x190   :  { %v3219_v43 = vpop.f32.mrb[1].mxu0  ;;  %v3305_v44 = vpop.f32.mrb[1].mxu1  ;;  %v3828_v48 = vmax.f32 %v3217_v37, 0.0  ;;  %v3830_v55 = vmax.f32 %v3303_v42, 0.0  ;;  %v520_v37 = vld [vmem:[#allocation5 + $0xe20] sm:$0xff]  ;;  %v8157_v42 = vcombine.low %v505_v31, %v513_v32  ;;  %v107_v31 = vld [vmem:[#allocation5 + $0x138] sm:$0xff] }
 0x191   :  { %v3221_v45 = vpop.f32.mrb[2].mxu0  ;;  %3538 = vmatpush1.bf16.msra.mxu0 %v8059_v33  ;;  %v3307_v50 = vpop.f32.mrb[2].mxu1  ;;  %3624 = vmatpush1.bf16.msra.mxu1 %v8061_v34  ;;  %v3829_v56 = vmax.f32 %v3219_v43, 0.0  ;;  %v3831_v62 = vmax.f32 %v3305_v44, 0.0  ;;  %v8139_v33 = vcombine.low %v488_v19, %v496_v20  ;;  %v8141_v34 = vcombine.low %v489_v21, %v497_v22  ;;  %v90_v19 = vld [vmem:[#allocation5 + $0xb0] sm:$0xff]  ;;  %v91_v21 = vld [vmem:[#allocation5 + $0xb8] sm:$0xff] }
 0x192   :  { %v3844_v49 = vmax.f32 %v3221_v45, 0.0  ;;  %v3223_v51 = vpop.f32.mrb[3].mxu0  ;;  %3539 = vmatprep.subr.bf16.mxu0 %v8076_v35  ;;  %v3846_v57 = vmax.f32 %v3307_v50, 0.0  ;;  %v3309_v60 = vpop.f32.mrb[3].mxu1  ;;  %3625 = vmatprep.subr.bf16.mxu1 %v8078_v38  ;;  %v8156_v35 = vcombine.high %v504_v29, %v512_v30  ;;  %v528_v38 = vld [vmem:[#allocation5 + $0xe60] sm:$0xff]  ;;  %v8174_v44 = vcombine.high %v521_v39, %v529_v40  ;;  %v98_v20 = vld [vmem:[#allocation5 + $0xf0] sm:$0xff] }
 0x193   :  { %v3845_v59 = vmax.f32 %v3223_v51, 0.0  ;;  %v3847_v0 = vmax.f32 %v3309_v60, 0.0  ;;  %v8172_v43 = vcombine.high %v520_v37, %v528_v38  ;;  %v536_v45 = vld [vmem:[#allocation5 + $0xea0] sm:$0xff]  ;;  %v8173_v50 = vcombine.low %v521_v39, %v529_v40  ;;  %v99_v22 = vld [vmem:[#allocation5 + $0xf8] sm:$0xff]  ;;  %v106_v29 = vld [vmem:[#allocation5 + $0x130] sm:$0xff] }
 0x194   :  { %v9818_v63 = vpack.c.bf16 %v3844_v49, %v3828_v48  ;;  %v9820_v3 = vpack.c.bf16 %v3846_v57, %v3830_v55  ;;  %v545_v48 = vld [vmem:[#allocation5 + $0xee8] sm:$0xff]  ;;  %v8171_v49 = vcombine.low %v520_v37, %v528_v38  ;;  %v114_v30 = vld [vmem:[#allocation5 + $0x170] sm:$0xff]  ;;  %v115_v32 = vld [vmem:[#allocation5 + $0x178] sm:$0xff] }
 0x195   :  { %v9822_v4 = vpack.c.bf16 %v3845_v59, %v3829_v56  ;;  %3540 = vmatpush1.bf16.msra.mxu0 %v8075_v46  ;;  %v9824_v6 = vpack.c.bf16 %v3847_v0, %v3831_v62  ;;  %3626 = vmatpush1.bf16.msra.mxu1 %v8077_v47  ;;  %v544_v46 = vld [vmem:[#allocation5 + $0xee0] sm:$0xff]  ;;  %v537_v47 = vld [vmem:[#allocation5 + $0xea8] sm:$0xff]  ;;  %v122_v37 = vld [vmem:[#allocation5 + $0x1b0] sm:$0xff] }
 0x196   :  { %3541 = vmatprep.subr.bf16.mxu0 %v8092_v52  ;;  %3627 = vmatprep.subr.bf16.mxu1 %v8094_v53  ;;  %v8188_v51 = vcombine.high %v536_v45, %v544_v46  ;;  %v8190_v52 = vcombine.high %v537_v47, %v545_v48  ;;  %v552_v53 = vld [vmem:[#allocation5 + $0xf20] sm:$0xff]  ;;  %v553_v55 = vld [vmem:[#allocation5 + $0xf28] sm:$0xff]  ;;  %v8187_v57 = vcombine.low %v536_v45, %v544_v46  ;;  %v130_v38 = vld [vmem:[#allocation5 + $0x1f0] sm:$0xff] }
 0x197   :  { %v561_v56 = vld [vmem:[#allocation5 + $0xf68] sm:$0xff]  ;;  %v8189_v59 = vcombine.low %v537_v47, %v545_v48  ;;  %v8204_v60 = vcombine.high %v552_v53, %v560_v54  ;;  %v568_v62 = vld [vmem:[#allocation5 + $0xfa0] sm:$0xff]  ;;  %v123_v39 = vld [vmem:[#allocation5 + $0x1b8] sm:$0xff] }
 0x198   :  { %v8206_v61 = vcombine.high %v553_v55, %v561_v56  ;;  %v576_v0 = vld [vmem:[#allocation5 + $0xfe0] sm:$0xff]  ;;  %v131_v40 = vld [vmem:[#allocation5 + $0x1f8] sm:$0xff]  ;;  %v138_v45 = vld [vmem:[#allocation5 + $0x230] sm:$0xff] }
 0x199   :  { %3542 = vmatpush1.bf16.msra.mxu0 %v8091_v5  ;;  %3628 = vmatpush1.bf16.msra.mxu1 %v8093_v7  ;;  %v8203_v5 = vcombine.low %v552_v53, %v560_v54  ;;  %v8205_v7 = vcombine.low %v553_v55, %v561_v56  ;;  %v146_v46 = vld [vmem:[#allocation5 + $0x270] sm:$0xff]  ;;  %v139_v47 = vld [vmem:[#allocation5 + $0x238] sm:$0xff] }
 0x19a   :  { %3543 = vmatprep.subr.bf16.mxu0 %v8108_v8  ;;  %3629 = vmatprep.subr.bf16.mxu1 %v8110_v9  ;;  %v8220_v8 = vcombine.high %v568_v62, %v576_v0  ;;  %v8222_v9 = vcombine.high %v569_v1, %v577_v2  ;;  %v147_v48 = vld [vmem:[#allocation5 + $0x278] sm:$0xff]  ;;  %v162_v53 = vld [vmem:[#allocation5 + $0x2f0] sm:$0xff]  ;;  %v7791_v56 = vcombine.low %v138_v45, %v146_v46 }
 0x19b   :  { %v155_v54 = vld [vmem:[#allocation5 + $0x2b8] sm:$0xff] }
 0x19c   :  { %v163_v55 = vld [vmem:[#allocation5 + $0x2f8] sm:$0xff] }
 0x19d   :  { %3544 = vmatpush1.bf16.msra.mxu0 %v8107_v14  ;;  %3630 = vmatpush1.bf16.msra.mxu1 %v8109_v16  ;;  %v8219_v14 = vcombine.low %v568_v62, %v576_v0  ;;  %v8221_v16 = vcombine.low %v569_v1, %v577_v2  ;;  %v178_v62 = vld [vmem:[#allocation5 + $0x370] sm:$0xff]  ;;  %v171_v0 = vld [vmem:[#allocation5 + $0x338] sm:$0xff] }
 0x19e   :  { %3545 = vmatprep.subr.bf16.mxu0 %v8124_v17  ;;  %3631 = vmatprep.subr.bf16.mxu1 %v8126_v18  ;;  %v7728_v17 = vcombine.high %v74_v10, %v82_v11  ;;  %v7730_v18 = vcombine.high %v75_v12, %v83_v13  ;;  %v179_v1 = vld [vmem:[#allocation5 + $0x378] sm:$0xff] }
 0x1a1   :  { %3546 = vmatpush1.bf16.msra.mxu0 %v8123_v23  ;;  %3632 = vmatpush1.bf16.msra.mxu1 %v8125_v24  ;;  %v7727_v23 = vcombine.low %v74_v10, %v82_v11  ;;  %v7729_v24 = vcombine.low %v75_v12, %v83_v13  ;;  %v194_v10 = vld [vmem:[#allocation5 + $0x3f0] sm:$0xff]  ;;  %v187_v11 = vld [vmem:[#allocation5 + $0x3b8] sm:$0xff] }
 0x1a2   :  { %3547 = vmatprep.subr.bf16.mxu0 %v8140_v26  ;;  %3633 = vmatprep.subr.bf16.mxu1 %v8142_v27  ;;  %v7744_v26 = vcombine.high %v90_v19, %v98_v20  ;;  %v7746_v27 = vcombine.high %v91_v21, %v99_v22  ;;  %v195_v12 = vld [vmem:[#allocation5 + $0x3f8] sm:$0xff] }
 0x1a5   :  { %3548 = vmatpush1.bf16.msra.mxu0 %v8139_v33  ;;  %3634 = vmatpush1.bf16.msra.mxu1 %v8141_v34  ;;  %v7743_v33 = vcombine.low %v90_v19, %v98_v20  ;;  %v7745_v34 = vcombine.low %v91_v21, %v99_v22  ;;  %v210_v19 = vld [vmem:[#allocation5 + $0x470] sm:$0xff]  ;;  %v203_v20 = vld [vmem:[#allocation5 + $0x438] sm:$0xff] }
 0x1a6   :  { %3549 = vmatprep.subr.bf16.mxu0 %v8156_v35  ;;  %3635 = vmatprep.subr.bf16.mxu1 %v8158_v36  ;;  %v7760_v35 = vcombine.high %v106_v29, %v114_v30  ;;  %v7762_v36 = vcombine.high %v107_v31, %v115_v32  ;;  %v211_v21 = vld [vmem:[#allocation5 + $0x478] sm:$0xff] }
 0x1a9   :  { %3550 = vmatpush1.bf16.msra.mxu0 %v8155_v41  ;;  %3636 = vmatpush1.bf16.msra.mxu1 %v8157_v42  ;;  %v7759_v41 = vcombine.low %v106_v29, %v114_v30  ;;  %v7761_v42 = vcombine.low %v107_v31, %v115_v32  ;;  %v226_v29 = vld [vmem:[#allocation5 + $0x4f0] sm:$0xff]  ;;  %v219_v30 = vld [vmem:[#allocation5 + $0x4b8] sm:$0xff] }
 0x1aa   :  { %3551 = vmatprep.subr.bf16.mxu0 %v8172_v43  ;;  %3637 = vmatprep.subr.bf16.mxu1 %v8174_v44  ;;  %v7776_v43 = vcombine.high %v122_v37, %v130_v38  ;;  %v7778_v44 = vcombine.high %v123_v39, %v131_v40  ;;  %v227_v31 = vld [vmem:[#allocation5 + $0x4f8] sm:$0xff] }
 0x1ad   :  { %3552 = vmatpush1.bf16.msra.mxu0 %v8171_v49  ;;  %3638 = vmatpush1.bf16.msra.mxu1 %v8173_v50  ;;  %v7775_v49 = vcombine.low %v122_v37, %v130_v38  ;;  %v7777_v50 = vcombine.low %v123_v39, %v131_v40  ;;  %v242_v37 = vld [vmem:[#allocation5 + $0x570] sm:$0xff]  ;;  %v235_v38 = vld [vmem:[#allocation5 + $0x538] sm:$0xff] }
 0x1ae   :  { %3553 = vmatprep.subr.bf16.mxu0 %v8188_v51  ;;  %3639 = vmatprep.subr.bf16.mxu1 %v8190_v52  ;;  %v7792_v51 = vcombine.high %v138_v45, %v146_v46  ;;  %v154_v52 = vld [vmem:[#allocation5 + $0x2b0] sm:$0xff]  ;;  %v243_v39 = vld [vmem:[#allocation5 + $0x578] sm:$0xff] }
 0x1af   :  { %v7807_v2 = vcombine.low %v154_v52, %v162_v53  ;;  %v258_v45 = vld [vmem:[#allocation5 + $0x5f0] sm:$0xff]  ;;  %v251_v46 = vld [vmem:[#allocation5 + $0x5b8] sm:$0xff] }
 0x1b1   :  { %3554 = vmatpush1.bf16.msra.mxu0 %v8187_v57  ;;  %3640 = vmatpush1.bf16.msra.mxu1 %v8189_v59  ;;  %v7793_v57 = vcombine.low %v139_v47, %v147_v48  ;;  %v7808_v59 = vcombine.high %v154_v52, %v162_v53  ;;  %v274_v52 = vld [vmem:[#allocation5 + $0x670] sm:$0xff]  ;;  %v267_v53 = vld [vmem:[#allocation5 + $0x638] sm:$0xff] }
 0x1b2   :  { %3555 = vmatprep.subr.bf16.mxu0 %v8204_v60  ;;  %3641 = vmatprep.subr.bf16.mxu1 %v8206_v61  ;;  %v7810_v60 = vcombine.high %v155_v54, %v163_v55  ;;  %v170_v61 = vld [vmem:[#allocation5 + $0x330] sm:$0xff] }
 0x1b3   :  { %v7823_v13 = vcombine.low %v170_v61, %v178_v62 }
 0x1b5   :  { %3556 = vmatpush1.bf16.msra.mxu0 %v8203_v5  ;;  %3642 = vmatpush1.bf16.msra.mxu1 %v8205_v7  ;;  %v7809_v5 = vcombine.low %v155_v54, %v163_v55  ;;  %v7824_v7 = vcombine.high %v170_v61, %v178_v62  ;;  %v275_v54 = vld [vmem:[#allocation5 + $0x678] sm:$0xff]  ;;  %v290_v61 = vld [vmem:[#allocation5 + $0x6f0] sm:$0xff] }
 0x1b6   :  { %3557 = vmatprep.subr.bf16.mxu0 %v8220_v8  ;;  %3643 = vmatprep.subr.bf16.mxu1 %v8222_v9  ;;  %v7826_v8 = vcombine.high %v171_v0, %v179_v1  ;;  %v186_v9 = vld [vmem:[#allocation5 + $0x3b0] sm:$0xff]  ;;  %v283_v62 = vld [vmem:[#allocation5 + $0x6b8] sm:$0xff] }
 0x1b7   :  { %v7839_v22 = vcombine.low %v186_v9, %v194_v10 }
 0x1b9   :  { %3558 = vmatpush1.bf16.msra.mxu0 %v8219_v14  ;;  %3644 = vmatpush1.bf16.msra.mxu1 %v8221_v16  ;;  %v7825_v14 = vcombine.low %v171_v0, %v179_v1  ;;  %v7840_v16 = vcombine.high %v186_v9, %v194_v10  ;;  %v291_v0 = vld [vmem:[#allocation5 + $0x6f8] sm:$0xff]  ;;  %v306_v9 = vld [vmem:[#allocation5 + $0x770] sm:$0xff] }
 0x1ba   :  { %3656 = vmatprep.subr.bf16.mxu0 %v7728_v17  ;;  %3742 = vmatprep.subr.bf16.mxu1 %v7730_v18  ;;  %v7842_v17 = vcombine.high %v187_v11, %v195_v12  ;;  %v202_v18 = vld [vmem:[#allocation5 + $0x430] sm:$0xff]  ;;  %v299_v10 = vld [vmem:[#allocation5 + $0x738] sm:$0xff] }
 0x1bb   :  { %v7855_v32 = vcombine.low %v202_v18, %v210_v19 }
 0x1bc   :  { %3560 = vmatmul.mubr.bf16.vlgmr.msra.gmra.mrb[8].mxu0 %v9800_v28  ;;  %3646 = vmatmul.mubr.bf16.vlgmr.msra.gmra.mrb[8].mxu1 %v9800_v28 }
 0x1bd   :  { %3657 = vmatpush1.bf16.msra.mxu0 %v7727_v23  ;;  %3743 = vmatpush1.bf16.msra.mxu1 %v7729_v24  ;;  %v7841_v23 = vcombine.low %v187_v11, %v195_v12  ;;  %v7856_v24 = vcombine.high %v202_v18, %v210_v19  ;;  %v307_v11 = vld [vmem:[#allocation5 + $0x778] sm:$0xff]  ;;  %v322_v18 = vld [vmem:[#allocation5 + $0x7f0] sm:$0xff] }
 0x1be   :  { %3658 = vmatprep.subr.bf16.mxu0 %v7744_v26  ;;  %3744 = vmatprep.subr.bf16.mxu1 %v7746_v27  ;;  %v7858_v26 = vcombine.high %v203_v20, %v211_v21  ;;  %v218_v27 = vld [vmem:[#allocation5 + $0x4b0] sm:$0xff]  ;;  %v315_v19 = vld [vmem:[#allocation5 + $0x7b8] sm:$0xff] }
 0x1bf   :  { %3688 = vmatprep.mubr.bf16.mxu0 %v9788_v58  ;;  %3774 = vmatprep.mubr.bf16.mxu1 %v9788_v58  ;;  %v7794_v58 = vcombine.high %v139_v47, %v147_v48  ;;  %v7871_v40 = vcombine.low %v218_v27, %v226_v29  ;;  %v259_v47 = vld [vmem:[#allocation5 + $0x5f8] sm:$0xff] }
 0x1c1   :  { %3659 = vmatpush1.bf16.msra.mxu0 %v7743_v33  ;;  %3745 = vmatpush1.bf16.msra.mxu1 %v7745_v34  ;;  %v7857_v33 = vcombine.low %v203_v20, %v211_v21  ;;  %v7872_v34 = vcombine.high %v218_v27, %v226_v29  ;;  %v323_v20 = vld [vmem:[#allocation5 + $0x7f8] sm:$0xff]  ;;  %v338_v27 = vld [vmem:[#allocation5 + $0x870] sm:$0xff] }
 0x1c2   :  { %3660 = vmatprep.subr.bf16.mxu0 %v7760_v35  ;;  %3746 = vmatprep.subr.bf16.mxu1 %v7762_v36  ;;  %v7874_v35 = vcombine.high %v219_v30, %v227_v31  ;;  %v234_v36 = vld [vmem:[#allocation5 + $0x530] sm:$0xff]  ;;  %v331_v29 = vld [vmem:[#allocation5 + $0x838] sm:$0xff] }
 0x1c3   :  { %v7887_v48 = vcombine.low %v234_v36, %v242_v37 }
 0x1c5   :  { %3661 = vmatpush1.bf16.msra.mxu0 %v7759_v41  ;;  %3747 = vmatpush1.bf16.msra.mxu1 %v7761_v42  ;;  %v7873_v41 = vcombine.low %v219_v30, %v227_v31  ;;  %v7888_v42 = vcombine.high %v234_v36, %v242_v37  ;;  %v339_v30 = vld [vmem:[#allocation5 + $0x878] sm:$0xff]  ;;  %v354_v36 = vld [vmem:[#allocation5 + $0x8f0] sm:$0xff] }
 0x1c6   :  { %3662 = vmatprep.subr.bf16.mxu0 %v7776_v43  ;;  %3748 = vmatprep.subr.bf16.mxu1 %v7778_v44  ;;  %v7890_v43 = vcombine.high %v235_v38, %v243_v39  ;;  %v250_v44 = vld [vmem:[#allocation5 + $0x5b0] sm:$0xff]  ;;  %v347_v37 = vld [vmem:[#allocation5 + $0x8b8] sm:$0xff] }
 0x1c7   :  { %v7903_v55 = vcombine.low %v250_v44, %v258_v45 }
 0x1c9   :  { %3663 = vmatpush1.bf16.msra.mxu0 %v7775_v49  ;;  %3749 = vmatpush1.bf16.msra.mxu1 %v7777_v50  ;;  %v7889_v49 = vcombine.low %v235_v38, %v243_v39  ;;  %v7904_v50 = vcombine.high %v250_v44, %v258_v45  ;;  %v355_v38 = vld [vmem:[#allocation5 + $0x8f8] sm:$0xff]  ;;  %v370_v44 = vld [vmem:[#allocation5 + $0x970] sm:$0xff] }
 0x1ca   :  { %3664 = vmatprep.subr.bf16.mxu0 %v7792_v51  ;;  %3750 = vmatprep.subr.bf16.mxu1 %v7794_v58  ;;  %v7906_v51 = vcombine.high %v251_v46, %v259_v47  ;;  %v266_v58 = vld [vmem:[#allocation5 + $0x630] sm:$0xff]  ;;  %v363_v45 = vld [vmem:[#allocation5 + $0x938] sm:$0xff] }
 0x1cb   :  { %v7919_v1 = vcombine.low %v266_v58, %v274_v52 }
 0x1cd   :  { %3665 = vmatpush1.bf16.msra.mxu0 %v7791_v56  ;;  %3751 = vmatpush1.bf16.msra.mxu1 %v7793_v57  ;;  %v7905_v56 = vcombine.low %v251_v46, %v259_v47  ;;  %v7920_v57 = vcombine.high %v266_v58, %v274_v52  ;;  %v371_v46 = vld [vmem:[#allocation5 + $0x978] sm:$0xff]  ;;  %v386_v58 = vld [vmem:[#allocation5 + $0x9f0] sm:$0xff] }
 0x1ce   :  { %3666 = vmatprep.subr.bf16.mxu0 %v7808_v59  ;;  %3752 = vmatprep.subr.bf16.mxu1 %v7810_v60  ;;  %v7922_v59 = vcombine.high %v267_v53, %v275_v54  ;;  %v282_v60 = vld [vmem:[#allocation5 + $0x6b0] sm:$0xff]  ;;  %v379_v52 = vld [vmem:[#allocation5 + $0x9b8] sm:$0xff] }
 0x1cf   :  { %v7935_v12 = vcombine.low %v282_v60, %v290_v61 }
 0x1d1   :  { %3667 = vmatpush1.bf16.msra.mxu0 %v7807_v2  ;;  %3753 = vmatpush1.bf16.msra.mxu1 %v7809_v5  ;;  %v7921_v2 = vcombine.low %v267_v53, %v275_v54  ;;  %v7936_v5 = vcombine.high %v282_v60, %v290_v61  ;;  %v387_v53 = vld [vmem:[#allocation5 + $0x9f8] sm:$0xff] }
 0x1d2   :  { %3668 = vmatprep.subr.bf16.mxu0 %v7824_v7  ;;  %3754 = vmatprep.subr.bf16.mxu1 %v7826_v8  ;;  %v7938_v7 = vcombine.high %v283_v62, %v291_v0  ;;  %v298_v8 = vld [vmem:[#allocation5 + $0x730] sm:$0xff]  ;;  %v395_v60 = vld [vmem:[#allocation5 + $0xa38] sm:$0xff] }
 0x1d3   :  { %v7951_v21 = vcombine.low %v298_v8, %v306_v9  ;;  %v403_v61 = vld [vmem:[#allocation5 + $0xa78] sm:$0xff] }
 0x1d5   :  { %3669 = vmatpush1.bf16.msra.mxu0 %v7823_v13  ;;  %3755 = vmatpush1.bf16.msra.mxu1 %v7825_v14  ;;  %v7937_v13 = vcombine.low %v283_v62, %v291_v0  ;;  %v7952_v14 = vcombine.high %v298_v8, %v306_v9  ;;  %v8033_v0 = vcombine.low %v379_v52, %v387_v53  ;;  %v419_v8 = vld [vmem:[#allocation5 + $0xaf8] sm:$0xff] }
 0x1d6   :  { %3670 = vmatprep.subr.bf16.mxu0 %v7840_v16  ;;  %3756 = vmatprep.subr.bf16.mxu1 %v7842_v17  ;;  %v7954_v16 = vcombine.high %v299_v10, %v307_v11  ;;  %v314_v17 = vld [vmem:[#allocation5 + $0x7b0] sm:$0xff] }
 0x1d7   :  { %v7967_v31 = vcombine.low %v314_v17, %v322_v18 }
 0x1d9   :  { %3671 = vmatpush1.bf16.msra.mxu0 %v7839_v22  ;;  %3757 = vmatpush1.bf16.msra.mxu1 %v7841_v23  ;;  %v7953_v22 = vcombine.low %v299_v10, %v307_v11  ;;  %v7968_v23 = vcombine.high %v314_v17, %v322_v18  ;;  %v8049_v10 = vcombine.low %v395_v60, %v403_v61  ;;  %v435_v17 = vld [vmem:[#allocation5 + $0xb78] sm:$0xff] }
 0x1da   :  { %3672 = vmatprep.subr.bf16.mxu0 %v7856_v24  ;;  %3758 = vmatprep.subr.bf16.mxu1 %v7858_v26  ;;  %v7970_v24 = vcombine.high %v315_v19, %v323_v20  ;;  %v330_v26 = vld [vmem:[#allocation5 + $0x830] sm:$0xff] }
 0x1db   :  { %v7983_v39 = vcombine.low %v330_v26, %v338_v27 }
 0x1dd   :  { %3673 = vmatpush1.bf16.msra.mxu0 %v7855_v32  ;;  %3759 = vmatpush1.bf16.msra.mxu1 %v7857_v33  ;;  %v7969_v32 = vcombine.low %v315_v19, %v323_v20  ;;  %v7984_v33 = vcombine.high %v330_v26, %v338_v27  ;;  %v443_v26 = vld [vmem:[#allocation5 + $0xbb8] sm:$0xff] }
 0x1de   :  { %3674 = vmatprep.subr.bf16.mxu0 %v7872_v34  ;;  %3760 = vmatprep.subr.bf16.mxu1 %v7874_v35  ;;  %v7986_v34 = vcombine.high %v331_v29, %v339_v30  ;;  %v346_v35 = vld [vmem:[#allocation5 + $0x8b0] sm:$0xff]  ;;  %v451_v27 = vld [vmem:[#allocation5 + $0xbf8] sm:$0xff] }
 0x1df   :  { %v7999_v47 = vcombine.low %v346_v35, %v354_v36 }
 0x1e1   :  { %3675 = vmatpush1.bf16.msra.mxu0 %v7871_v40  ;;  %3761 = vmatpush1.bf16.msra.mxu1 %v7873_v41  ;;  %v7985_v40 = vcombine.low %v331_v29, %v339_v30  ;;  %v8000_v41 = vcombine.high %v346_v35, %v354_v36 }
 0x1e2   :  { %3676 = vmatprep.subr.bf16.mxu0 %v7888_v42  ;;  %3762 = vmatprep.subr.bf16.mxu1 %v7890_v43  ;;  %v8002_v42 = vcombine.high %v347_v37, %v355_v38  ;;  %v362_v43 = vld [vmem:[#allocation5 + $0x930] sm:$0xff] }
 0x1e3   :  { %v8015_v54 = vcombine.low %v362_v43, %v370_v44 }
 0x1e5   :  { %3677 = vmatpush1.bf16.msra.mxu0 %v7887_v48  ;;  %3763 = vmatpush1.bf16.msra.mxu1 %v7889_v49  ;;  %v8001_v48 = vcombine.low %v347_v37, %v355_v38  ;;  %v8016_v49 = vcombine.high %v362_v43, %v370_v44 }
 0x1e6   :  { %3678 = vmatprep.subr.bf16.mxu0 %v7904_v50  ;;  %3764 = vmatprep.subr.bf16.mxu1 %v7906_v51  ;;  %v8018_v50 = vcombine.high %v363_v45, %v371_v46  ;;  %v378_v51 = vld [vmem:[#allocation5 + $0x9b0] sm:$0xff] }
 0x1e7   :  { %v8031_v62 = vcombine.low %v378_v51, %v386_v58 }
 0x1e9   :  { %3679 = vmatpush1.bf16.msra.mxu0 %v7903_v55  ;;  %3765 = vmatpush1.bf16.msra.mxu1 %v7905_v56  ;;  %v8032_v55 = vcombine.high %v378_v51, %v386_v58  ;;  %v8034_v56 = vcombine.high %v379_v52, %v387_v53  ;;  %v459_v51 = vld [vmem:[#allocation5 + $0xc38] sm:$0xff] }
 0x1ea   :  { %3680 = vmatprep.subr.bf16.mxu0 %v7920_v57  ;;  %3766 = vmatprep.subr.bf16.mxu1 %v7922_v59  ;;  %v394_v57 = vld [vmem:[#allocation5 + $0xa30] sm:$0xff]  ;;  %v467_v58 = vld [vmem:[#allocation5 + $0xc78] sm:$0xff] }
 0x1eb   :  { %v402_v59 = vld [vmem:[#allocation5 + $0xa70] sm:$0xff] }
 0x1ec   :  { %v8047_v9 = vcombine.low %v394_v57, %v402_v59 }
 0x1ed   :  { %3681 = vmatpush1.bf16.msra.mxu0 %v7919_v1  ;;  %3767 = vmatpush1.bf16.msra.mxu1 %v7921_v2  ;;  %v8048_v1 = vcombine.high %v394_v57, %v402_v59  ;;  %v410_v2 = vld [vmem:[#allocation5 + $0xab0] sm:$0xff]  ;;  %v8114_v57 = vcombine.high %v459_v51, %v467_v58 }
 0x1ee   :  { %3682 = vmatprep.subr.bf16.mxu0 %v7936_v5  ;;  %3768 = vmatprep.subr.bf16.mxu1 %v7938_v7  ;;  %v418_v5 = vld [vmem:[#allocation5 + $0xaf0] sm:$0xff]  ;;  %v411_v7 = vld [vmem:[#allocation5 + $0xab8] sm:$0xff] }
 0x1ef   :  { %v8064_v11 = vcombine.high %v410_v2, %v418_v5  ;;  %v8063_v18 = vcombine.low %v410_v2, %v418_v5  ;;  %v8065_v19 = vcombine.low %v411_v7, %v419_v8  ;;  %v474_v59 = vld [vmem:[#allocation5 + $0xcb0] sm:$0xff] }
 0x1f0   :  { %v490_v5 = vld [vmem:[#allocation5 + $0xd30] sm:$0xff] }
 0x1f1   :  { %3683 = vmatpush1.bf16.msra.mxu0 %v7935_v12  ;;  %3769 = vmatpush1.bf16.msra.mxu1 %v7937_v13  ;;  %v8066_v12 = vcombine.high %v411_v7, %v419_v8  ;;  %v426_v13 = vld [vmem:[#allocation5 + $0xb30] sm:$0xff]  ;;  %v491_v8 = vld [vmem:[#allocation5 + $0xd38] sm:$0xff] }
 0x1f2   :  { %3684 = vmatprep.subr.bf16.mxu0 %v7952_v14  ;;  %3770 = vmatprep.subr.bf16.mxu1 %v7954_v16  ;;  %v434_v14 = vld [vmem:[#allocation5 + $0xb70] sm:$0xff]  ;;  %v427_v16 = vld [vmem:[#allocation5 + $0xb38] sm:$0xff] }
 0x1f3   :  { %v8080_v20 = vcombine.high %v426_v13, %v434_v14  ;;  %v498_v7 = vld [vmem:[#allocation5 + $0xd70] sm:$0xff] }
 0x1f5   :  { %3685 = vmatpush1.bf16.msra.mxu0 %v7951_v21  ;;  %3771 = vmatpush1.bf16.msra.mxu1 %v7953_v22  ;;  %v442_v21 = vld [vmem:[#allocation5 + $0xbb0] sm:$0xff] }
 0x1f6   :  { %3686 = vmatprep.subr.bf16.mxu0 %v7968_v23  ;;  %3772 = vmatprep.subr.bf16.mxu1 %v7970_v24  ;;  %v8082_v23 = vcombine.high %v427_v16, %v435_v17  ;;  %v450_v24 = vld [vmem:[#allocation5 + $0xbf0] sm:$0xff] }
 0x1f9   :  { %3687 = vmatpush1.bf16.msra.mxu0 %v7967_v31  ;;  %3773 = vmatpush1.bf16.msra.mxu1 %v7969_v32 }
 0x1fa   :  { %3699 = vmatprep.subr.bf16.mxu0 %v7984_v33  ;;  %3785 = vmatprep.subr.bf16.mxu1 %v7986_v34  ;;  %v8079_v33 = vcombine.low %v426_v13, %v434_v14  ;;  %v8081_v34 = vcombine.low %v427_v16, %v435_v17  ;;  %v506_v14 = vld [vmem:[#allocation5 + $0xdb0] sm:$0xff]  ;;  %v507_v17 = vld [vmem:[#allocation5 + $0xdb8] sm:$0xff] }
 0x1fb   :  { %v514_v16 = vld [vmem:[#allocation5 + $0xdf0] sm:$0xff] }
 0x1fc   :  { %3689 = vmatmul.mubr.bf16.vlgmr.msra.gmra.mrb[12].mxu0 %v9792_v15  ;;  %3775 = vmatmul.mubr.bf16.vlgmr.msra.gmra.mrb[12].mxu1 %v9792_v15  ;;  %v8017_v15 = vcombine.low %v363_v45, %v371_v46 }
 0x1fd   :  { %3700 = vmatpush1.bf16.msra.mxu0 %v7983_v39  ;;  %3786 = vmatpush1.bf16.msra.mxu1 %v7985_v40  ;;  %v8096_v39 = vcombine.high %v442_v21, %v450_v24  ;;  %v8098_v40 = vcombine.high %v443_v26, %v451_v27 }
 0x1fe   :  { %3701 = vmatprep.subr.bf16.mxu0 %v8000_v41  ;;  %3787 = vmatprep.subr.bf16.mxu1 %v8002_v42  ;;  %v458_v41 = vld [vmem:[#allocation5 + $0xc30] sm:$0xff] }
 0x1ff   :  { %3731 = vmatprep.mubr.bf16.mxu0 %v9794_v25  ;;  %3817 = vmatprep.mubr.bf16.mxu1 %v9794_v25  ;;  %v8050_v25 = vcombine.high %v395_v60, %v403_v61  ;;  %v482_v60 = vld [vmem:[#allocation5 + $0xcf0] sm:$0xff]  ;;  %v475_v61 = vld [vmem:[#allocation5 + $0xcb8] sm:$0xff] }
 0x201   :  { %3702 = vmatpush1.bf16.msra.mxu0 %v7999_v47  ;;  %3788 = vmatpush1.bf16.msra.mxu1 %v8001_v48  ;;  %v466_v47 = vld [vmem:[#allocation5 + $0xc70] sm:$0xff] }
 0x202   :  { %3703 = vmatprep.subr.bf16.mxu0 %v8016_v49  ;;  %3789 = vmatprep.subr.bf16.mxu1 %v8018_v50 }
 0x205   :  { %3704 = vmatpush1.bf16.msra.mxu0 %v8015_v54  ;;  %3790 = vmatpush1.bf16.msra.mxu1 %v8017_v15  ;;  %v8095_v54 = vcombine.low %v442_v21, %v450_v24  ;;  %v8160_v21 = vcombine.high %v506_v14, %v514_v16  ;;  %v530_v24 = vld [vmem:[#allocation5 + $0xe70] sm:$0xff] }
 0x206   :  { %3705 = vmatprep.subr.bf16.mxu0 %v8032_v55  ;;  %3791 = vmatprep.subr.bf16.mxu1 %v8034_v56  ;;  %v8097_v55 = vcombine.low %v443_v26, %v451_v27  ;;  %v8112_v56 = vcombine.high %v458_v41, %v466_v47  ;;  %v523_v26 = vld [vmem:[#allocation5 + $0xe38] sm:$0xff] }
 0x207   :  { %v531_v27 = vld [vmem:[#allocation5 + $0xe78] sm:$0xff] }
 0x209   :  { %3706 = vmatpush1.bf16.msra.mxu0 %v8031_v62  ;;  %3792 = vmatpush1.bf16.msra.mxu1 %v8033_v0  ;;  %v483_v62 = vld [vmem:[#allocation5 + $0xcf8] sm:$0xff]  ;;  %v8111_v0 = vcombine.low %v458_v41, %v466_v47  ;;  %v554_v41 = vld [vmem:[#allocation5 + $0xf30] sm:$0xff] }
 0x20a   :  { %3707 = vmatprep.subr.bf16.mxu0 %v8048_v1  ;;  %3793 = vmatprep.subr.bf16.mxu1 %v8050_v25  ;;  %v8113_v1 = vcombine.low %v459_v51, %v467_v58  ;;  %v8128_v25 = vcombine.high %v474_v59, %v482_v60  ;;  %v8130_v2 = vcombine.high %v475_v61, %v483_v62  ;;  %v578_v51 = vld [vmem:[#allocation5 + $0xff0] sm:$0xff]  ;;  %v571_v58 = vld [vmem:[#allocation5 + $0xfb8] sm:$0xff] }
 0x20d   :  { %3708 = vmatpush1.bf16.msra.mxu0 %v8047_v9  ;;  %3794 = vmatpush1.bf16.msra.mxu1 %v8049_v10  ;;  %v499_v9 = vld [vmem:[#allocation5 + $0xd78] sm:$0xff]  ;;  %v8127_v10 = vcombine.low %v474_v59, %v482_v60 }
 0x20e   :  { %3709 = vmatprep.subr.bf16.mxu0 %v8064_v11  ;;  %3795 = vmatprep.subr.bf16.mxu1 %v8066_v12  ;;  %v8129_v11 = vcombine.low %v475_v61, %v483_v62  ;;  %v8144_v12 = vcombine.high %v490_v5, %v498_v7  ;;  %v8146_v13 = vcombine.high %v491_v8, %v499_v9  ;;  %v8847_v62 = vld [vmem:[#allocation7 + $0x4] ss:$16 sps:$4 sm:$0xff]  }
 0x20f   :  { %v3389_v22 = vpop.f32.mrb[4].mxu0  ;;  %v3475_v29 = vpop.f32.mrb[4].mxu1 }
 0x210   :  { %v3391_v30 = vpop.f32.mrb[5].mxu0  ;;  %v3477_v31 = vpop.f32.mrb[5].mxu1  ;;  %v3832_v35 = vmax.f32 %v3389_v22, 0.0  ;;  %v3834_v42 = vmax.f32 %v3475_v29, 0.0  ;;  %v8159_v29 = vcombine.low %v506_v14, %v514_v16  ;;  %v8863_v14 = vld [vmem:[#allocation7 + $0x60] ss:$16 sps:$4 sm:$0xff]  }
 0x211   :  { %v3393_v32 = vpop.f32.mrb[6].mxu0  ;;  %3710 = vmatpush1.bf16.msra.mxu0 %v8063_v18  ;;  %v3479_v37 = vpop.f32.mrb[6].mxu1  ;;  %3796 = vmatpush1.bf16.msra.mxu1 %v8065_v19  ;;  %v3833_v43 = vmax.f32 %v3391_v30, 0.0  ;;  %v3835_v48 = vmax.f32 %v3477_v31, 0.0  ;;  %v515_v18 = vld [vmem:[#allocation5 + $0xdf8] sm:$0xff]  ;;  %v8143_v19 = vcombine.low %v490_v5, %v498_v7 }
 0x212   :  { %v3848_v36 = vmax.f32 %v3393_v32, 0.0  ;;  %v3395_v38 = vpop.f32.mrb[7].mxu0  ;;  %3711 = vmatprep.subr.bf16.mxu0 %v8080_v20  ;;  %v3850_v44 = vmax.f32 %v3479_v37, 0.0  ;;  %v3481_v46 = vpop.f32.mrb[7].mxu1  ;;  %3797 = vmatprep.subr.bf16.mxu1 %v8082_v23  ;;  %v8145_v20 = vcombine.low %v491_v8, %v499_v9  ;;  %v8162_v22 = vcombine.high %v507_v17, %v515_v18  ;;  %v522_v23 = vld [vmem:[#allocation5 + $0xe30] sm:$0xff] }
 0x213   :  { %v3849_v45 = vmax.f32 %v3395_v38, 0.0  ;;  %v3851_v50 = vmax.f32 %v3481_v46, 0.0  ;;  %v8161_v30 = vcombine.low %v507_v17, %v515_v18  ;;  %v8176_v31 = vcombine.high %v522_v23, %v530_v24  ;;  %v8856_v5 = vld [vmem:[#allocation7 + $0x2c] ss:$16 sps:$4 sm:$0xff]   ;;  %v8851_v7 = vld [vmem:[#allocation7 + $0x20] ss:$16 sps:$4 sm:$0xff]  }
 0x214   :  { %v9834_v49 = vpack.c.bf16 %v3848_v36, %v3832_v35  ;;  %v9836_v52 = vpack.c.bf16 %v3850_v44, %v3834_v42  ;;  %v8178_v32 = vcombine.high %v523_v26, %v531_v27  ;;  %v539_v35 = vld [vmem:[#allocation5 + $0xeb8] sm:$0xff]  ;;  %v8175_v37 = vcombine.low %v522_v23, %v530_v24  ;;  %v562_v42 = vld [vmem:[#allocation5 + $0xf70] sm:$0xff] }
 0x215   :  { %v9838_v53 = vpack.c.bf16 %v3849_v45, %v3833_v43  ;;  %3712 = vmatpush1.bf16.msra.mxu0 %v8079_v33  ;;  %v9840_v15 = vpack.c.bf16 %v3851_v50, %v3835_v48  ;;  %3798 = vmatpush1.bf16.msra.mxu1 %v8081_v34  ;;  %v538_v33 = vld [vmem:[#allocation5 + $0xeb0] sm:$0xff]  ;;  %v547_v36 = vld [vmem:[#allocation5 + $0xef8] sm:$0xff]  ;;  %v8177_v38 = vcombine.low %v523_v26, %v531_v27 }
 0x216   :  { %3713 = vmatprep.subr.bf16.mxu0 %v8096_v39  ;;  %3799 = vmatprep.subr.bf16.mxu1 %v8098_v40  ;;  %v546_v34 = vld [vmem:[#allocation5 + $0xef0] sm:$0xff]  ;;  %v8194_v40 = vcombine.high %v539_v35, %v547_v36  ;;  %v555_v43 = vld [vmem:[#allocation5 + $0xf38] sm:$0xff]  ;;  %v8193_v46 = vcombine.low %v539_v35, %v547_v36  ;;  %v8208_v47 = vcombine.high %v554_v41, %v562_v42 }
 0x217   :  { %v8192_v39 = vcombine.high %v538_v33, %v546_v34  ;;  %v563_v44 = vld [vmem:[#allocation5 + $0xf78] sm:$0xff]  ;;  %v8191_v45 = vcombine.low %v538_v33, %v546_v34  ;;  %v570_v50 = vld [vmem:[#allocation5 + $0xfb0] sm:$0xff] }
 0x218   :  { %v8210_v48 = vcombine.high %v555_v43, %v563_v44  ;;  %v8223_v60 = vcombine.low %v570_v50, %v578_v51  ;;  %v8854_v8 = vld [vmem:[#allocation7 + $0x28] ss:$16 sps:$4 sm:$0xff]   ;;  %v8859_v9 = vld [vmem:[#allocation7 + $0x44] ss:$16 sps:$4 sm:$0xff]   ;;  %v8874_v18 = vld [vmem:[#allocation7 + $0x8c] ss:$16 sps:$4 sm:$0xff]  }
 0x219   :  { %3714 = vmatpush1.bf16.msra.mxu0 %v8095_v54  ;;  %3800 = vmatpush1.bf16.msra.mxu1 %v8097_v55  ;;  %v579_v54 = vld [vmem:[#allocation5 + $0xff8] sm:$0xff]  ;;  %v8207_v55 = vcombine.low %v554_v41, %v562_v42  ;;  %v8871_v17 = vld [vmem:[#allocation7 + $0x84] ss:$16 sps:$4 sm:$0xff]   ;;  %v8881_v27 = vld [vmem:[#allocation7 + $0xc0] ss:$16 sps:$4 sm:$0xff]  }
 0x21a   :  { %3715 = vmatprep.subr.bf16.mxu0 %v8112_v56  ;;  %3801 = vmatprep.subr.bf16.mxu1 %v8114_v57  ;;  %v8209_v56 = vcombine.low %v555_v43, %v563_v44  ;;  %v8224_v57 = vcombine.high %v570_v50, %v578_v51  ;;  %v8226_v59 = vcombine.high %v571_v58, %v579_v54  ;;  %v8866_v16 = vld [vmem:[#allocation7 + $0x68] ss:$16 sps:$4 sm:$0xff]   ;;  %v8883_v24 = vld [vmem:[#allocation7 + $0xc4] ss:$16 sps:$4 sm:$0xff]   ;;  %v8886_v26 = vld [vmem:[#allocation7 + $0xcc] ss:$16 sps:$4 sm:$0xff]  }
 0x21b   :  { %v8225_v61 = vcombine.low %v571_v58, %v579_v54  ;;  %v8878_v23 = vld [vmem:[#allocation7 + $0xa8] ss:$16 sps:$4 sm:$0xff]   ;;  %v8895_v34 = vld [vmem:[#allocation7 + $0x104] ss:$16 sps:$4 sm:$0xff]   ;;  %v8898_v35 = vld [vmem:[#allocation7 + $0x10c] ss:$16 sps:$4 sm:$0xff]  }
 0x21c   :  { %v8890_v33 = vld [vmem:[#allocation7 + $0xe8] ss:$16 sps:$4 sm:$0xff]   ;;  %v8893_v36 = vld [vmem:[#allocation7 + $0x100] ss:$16 sps:$4 sm:$0xff]   ;;  %v8907_v42 = vld [vmem:[#allocation7 + $0x144] ss:$16 sps:$4 sm:$0xff]  }
 0x21d   :  { %3716 = vmatpush1.bf16.msra.mxu0 %v8111_v0  ;;  %3802 = vmatpush1.bf16.msra.mxu1 %v8113_v1  ;;  %v8850_v0 = vld [vmem:[#allocation7 + $0xc] ss:$16 sps:$4 sm:$0xff]   ;;  %v8845_v1 = vld [vmem:[#allocation7] ss:$16 sps:$4 sm:$0xff]   ;;  %v8902_v41 = vld [vmem:[#allocation7 + $0x128] ss:$16 sps:$4 sm:$0xff]  }
 0x21e   :  { %3717 = vmatprep.subr.bf16.mxu0 %v8128_v25  ;;  %3803 = vmatprep.subr.bf16.mxu1 %v8130_v2  ;;  %v8848_v25 = vld [vmem:[#allocation7 + $0x8] ss:$16 sps:$4 sm:$0xff]   ;;  %v8853_v2 = vld [vmem:[#allocation7 + $0x24] ss:$16 sps:$4 sm:$0xff]   ;;  %v8910_v43 = vld [vmem:[#allocation7 + $0x14c] ss:$16 sps:$4 sm:$0xff]  }
 0x21f   :  { %v8905_v44 = vld [vmem:[#allocation7 + $0x140] ss:$16 sps:$4 sm:$0xff]   ;;  %v8914_v50 = vld [vmem:[#allocation7 + $0x168] ss:$16 sps:$4 sm:$0xff]   ;;  %v8919_v51 = vld [vmem:[#allocation7 + $0x184] ss:$16 sps:$4 sm:$0xff]  }
 0x220   :  { %v8922_v58 = vld [vmem:[#allocation7 + $0x18c] ss:$16 sps:$4 sm:$0xff]   ;;  %v8917_v54 = vld [vmem:[#allocation7 + $0x180] ss:$16 sps:$4 sm:$0xff]  }
 0x221   :  { %3718 = vmatpush1.bf16.msra.mxu0 %v8127_v10  ;;  %3804 = vmatpush1.bf16.msra.mxu1 %v8129_v11  ;;  %v8862_v10 = vld [vmem:[#allocation7 + $0x4c] ss:$16 sps:$4 sm:$0xff]   ;;  %v8857_v11 = vld [vmem:[#allocation7 + $0x40] ss:$16 sps:$4 sm:$0xff]  }
 0x222   :  { %3719 = vmatprep.subr.bf16.mxu0 %v8144_v12  ;;  %3805 = vmatprep.subr.bf16.mxu1 %v8146_v13  ;;  %v8860_v12 = vld [vmem:[#allocation7 + $0x48] ss:$16 sps:$4 sm:$0xff]   ;;  %v8865_v13 = vld [vmem:[#allocation7 + $0x64] ss:$16 sps:$4 sm:$0xff]  }
 0x225   :  { %3720 = vmatpush1.bf16.msra.mxu0 %v8143_v19  ;;  %3806 = vmatpush1.bf16.msra.mxu1 %v8145_v20  ;;  %v8872_v19 = vld [vmem:[#allocation7 + $0x88] ss:$16 sps:$4 sm:$0xff]   ;;  %v8877_v20 = vld [vmem:[#allocation7 + $0xa4] ss:$16 sps:$4 sm:$0xff]  }
 0x226   :  { %3721 = vmatprep.subr.bf16.mxu0 %v8160_v21  ;;  %3807 = vmatprep.subr.bf16.mxu1 %v8162_v22  ;;  %v8880_v21 = vld [vmem:[#allocation7 + $0xac] ss:$16 sps:$4 sm:$0xff]   ;;  %v8875_v22 = vld [vmem:[#allocation7 + $0xa0] ss:$16 sps:$4 sm:$0xff]  }
 0x229   :  { %3722 = vmatpush1.bf16.msra.mxu0 %v8159_v29  ;;  %3808 = vmatpush1.bf16.msra.mxu1 %v8161_v30  ;;  %v8884_v29 = vld [vmem:[#allocation7 + $0xc8] ss:$16 sps:$4 sm:$0xff]   ;;  %v8889_v30 = vld [vmem:[#allocation7 + $0xe4] ss:$16 sps:$4 sm:$0xff]  }
 0x22a   :  { %3723 = vmatprep.subr.bf16.mxu0 %v8176_v31  ;;  %3809 = vmatprep.subr.bf16.mxu1 %v8178_v32  ;;  %v8892_v31 = vld [vmem:[#allocation7 + $0xec] ss:$16 sps:$4 sm:$0xff]   ;;  %v8887_v32 = vld [vmem:[#allocation7 + $0xe0] ss:$16 sps:$4 sm:$0xff]  }
 0x22d   :  { %3724 = vmatpush1.bf16.msra.mxu0 %v8175_v37  ;;  %3810 = vmatpush1.bf16.msra.mxu1 %v8177_v38  ;;  %v8896_v37 = vld [vmem:[#allocation7 + $0x108] ss:$16 sps:$4 sm:$0xff]   ;;  %v8901_v38 = vld [vmem:[#allocation7 + $0x124] ss:$16 sps:$4 sm:$0xff]  }
 0x22e   :  { %3725 = vmatprep.subr.bf16.mxu0 %v8192_v39  ;;  %3811 = vmatprep.subr.bf16.mxu1 %v8194_v40  ;;  %v8904_v39 = vld [vmem:[#allocation7 + $0x12c] ss:$16 sps:$4 sm:$0xff]   ;;  %v8899_v40 = vld [vmem:[#allocation7 + $0x120] ss:$16 sps:$4 sm:$0xff]  }
 0x231   :  { %3726 = vmatpush1.bf16.msra.mxu0 %v8191_v45  ;;  %3812 = vmatpush1.bf16.msra.mxu1 %v8193_v46  ;;  %v8908_v45 = vld [vmem:[#allocation7 + $0x148] ss:$16 sps:$4 sm:$0xff]   ;;  %v8913_v46 = vld [vmem:[#allocation7 + $0x164] ss:$16 sps:$4 sm:$0xff]  }
 0x232   :  { %3727 = vmatprep.subr.bf16.mxu0 %v8208_v47  ;;  %3813 = vmatprep.subr.bf16.mxu1 %v8210_v48  ;;  %v8916_v47 = vld [vmem:[#allocation7 + $0x16c] ss:$16 sps:$4 sm:$0xff]   ;;  %v8911_v48 = vld [vmem:[#allocation7 + $0x160] ss:$16 sps:$4 sm:$0xff]  }
 0x235   :  { %3728 = vmatpush1.bf16.msra.mxu0 %v8207_v55  ;;  %3814 = vmatpush1.bf16.msra.mxu1 %v8209_v56  ;;  %v8920_v55 = vld [vmem:[#allocation7 + $0x188] ss:$16 sps:$4 sm:$0xff]   ;;  %v8925_v56 = vld [vmem:[#allocation7 + $0x1a4] ss:$16 sps:$4 sm:$0xff]  }
 0x236   :  { %3729 = vmatprep.subr.bf16.mxu0 %v8224_v57  ;;  %3815 = vmatprep.subr.bf16.mxu1 %v8226_v59  ;;  %v8928_v57 = vld [vmem:[#allocation7 + $0x1ac] ss:$16 sps:$4 sm:$0xff]   ;;  %v8923_v59 = vld [vmem:[#allocation7 + $0x1a0] ss:$16 sps:$4 sm:$0xff]  }
 0x239   :  { %3730 = vmatpush1.bf16.msra.mxu0 %v8223_v60  ;;  %3816 = vmatpush1.bf16.msra.mxu1 %v8225_v61  ;;  %v8926_v60 = vld [vmem:[#allocation7 + $0x1a8] ss:$16 sps:$4 sm:$0xff]   ;;  %v8931_v61 = vld [vmem:[#allocation7 + $0x1c4] ss:$16 sps:$4 sm:$0xff]  }
 0x23a   :  { %6948 = vmatprep.subr.bf16.mxu0 %v8847_v62  ;;  %7292 = vmatprep.subr.bf16.mxu1 %v8850_v0  ;;  %v8934_v62 = vld [vmem:[#allocation7 + $0x1cc] ss:$16 sps:$4 sm:$0xff]   ;;  %v8929_v0 = vld [vmem:[#allocation7 + $0x1c0] ss:$16 sps:$4 sm:$0xff]  }
 0x23c   :  { %3732 = vmatmul.mubr.bf16.vlgmr.msra.gmra.mrb[12].mxu0 %v9800_v28  ;;  %3818 = vmatmul.mubr.bf16.vlgmr.msra.gmra.mrb[12].mxu1 %v9800_v28  ;;  %v8868_v28 = vld [vmem:[#allocation7 + $0x6c] ss:$16 sps:$4 sm:$0xff]  }
 0x23d   :  { %6949 = vmatpush1.bf16.msra.mxu0 %v8845_v1  ;;  %6980 = vmatprep.mubr.bf16.mxu0 %v9822_v4  ;;  %v8932_v1 = vld [vmem:[#allocation7 + $0x1c8] ss:$16 sps:$4 sm:$0xff]  }
 0x23e   :  { %7293 = vmatpush1.bf16.msra.mxu1 %v8848_v25  ;;  %7324 = vmatprep.mubr.bf16.mxu1 %v9822_v4  ;;  %v8869_v4 = vld [vmem:[#allocation7 + $0x80] ss:$16 sps:$4 sm:$0xff]   ;;  %v8937_v25 = vld [vmem:[#allocation7 + $0x1e4] ss:$16 sps:$4 sm:$0xff]  }
 0x23f   :  { %6950 = vmatprep.subr.bf16.mxu0 %v8853_v2  ;;  %7294 = vmatprep.subr.bf16.mxu1 %v8856_v5  ;;  %v8940_v2 = vld [vmem:[#allocation7 + $0x1ec] ss:$16 sps:$4 sm:$0xff]   ;;  %v8935_v5 = vld [vmem:[#allocation7 + $0x1e0] ss:$16 sps:$4 sm:$0xff]  }
 0x241   :  { %6951 = vmatpush1.bf16.msra.mxu0 %v8851_v7  ;;  %v8938_v7 = vld [vmem:[#allocation7 + $0x1e8] ss:$16 sps:$4 sm:$0xff]  }
 0x242   :  { %7295 = vmatpush1.bf16.msra.mxu1 %v8854_v8  ;;  %6952 = vmatprep.subr.bf16.mxu0 %v8859_v9  ;;  %v8943_v8 = vld [vmem:[#allocation7 + $0x204] ss:$16 sps:$4 sm:$0xff]   ;;  %v8946_v9 = vld [vmem:[#allocation7 + $0x20c] ss:$16 sps:$4 sm:$0xff]  }
 0x243   :  { %7296 = vmatprep.subr.bf16.mxu1 %v8862_v10  ;;  %v8941_v10 = vld [vmem:[#allocation7 + $0x200] ss:$16 sps:$4 sm:$0xff]  }
 0x245   :  { %6953 = vmatpush1.bf16.msra.mxu0 %v8857_v11  ;;  %v8944_v11 = vld [vmem:[#allocation7 + $0x208] ss:$16 sps:$4 sm:$0xff]  }
 0x246   :  { %7297 = vmatpush1.bf16.msra.mxu1 %v8860_v12  ;;  %6954 = vmatprep.subr.bf16.mxu0 %v8865_v13  ;;  %v8949_v12 = vld [vmem:[#allocation7 + $0x224] ss:$16 sps:$4 sm:$0xff]   ;;  %v8952_v13 = vld [vmem:[#allocation7 + $0x22c] ss:$16 sps:$4 sm:$0xff]  }
 0x247   :  { %7298 = vmatprep.subr.bf16.mxu1 %v8868_v28  ;;  %v8947_v28 = vld [vmem:[#allocation7 + $0x220] ss:$16 sps:$4 sm:$0xff]  }
 0x249   :  { %6955 = vmatpush1.bf16.msra.mxu0 %v8863_v14  ;;  %v8950_v14 = vld [vmem:[#allocation7 + $0x228] ss:$16 sps:$4 sm:$0xff]  }
 0x24a   :  { %7299 = vmatpush1.bf16.msra.mxu1 %v8866_v16  ;;  %6956 = vmatprep.subr.bf16.mxu0 %v8871_v17  ;;  %v8955_v16 = vld [vmem:[#allocation7 + $0x244] ss:$16 sps:$4 sm:$0xff]   ;;  %v8958_v17 = vld [vmem:[#allocation7 + $0x24c] ss:$16 sps:$4 sm:$0xff]  }
 0x24b   :  { %7300 = vmatprep.subr.bf16.mxu1 %v8874_v18  ;;  %v8953_v18 = vld [vmem:[#allocation7 + $0x240] ss:$16 sps:$4 sm:$0xff]  }
 0x24d   :  { %6957 = vmatpush1.bf16.msra.mxu0 %v8869_v4  ;;  %v8956_v4 = vld [vmem:[#allocation7 + $0x248] ss:$16 sps:$4 sm:$0xff]  }
 0x24e   :  { %7301 = vmatpush1.bf16.msra.mxu1 %v8872_v19  ;;  %6958 = vmatprep.subr.bf16.mxu0 %v8877_v20  ;;  %v8961_v19 = vld [vmem:[#allocation7 + $0x264] ss:$16 sps:$4 sm:$0xff]   ;;  %v8959_v20 = vld [vmem:[#allocation7 + $0x260] ss:$16 sps:$4 sm:$0xff]  }
 0x24f   :  { %7302 = vmatprep.subr.bf16.mxu1 %v8880_v21  ;;  %v8962_v21 = vld [vmem:[#allocation7 + $0x268] ss:$16 sps:$4 sm:$0xff]  }
 0x251   :  { %6959 = vmatpush1.bf16.msra.mxu0 %v8875_v22  ;;  %v8967_v22 = vld [vmem:[#allocation7 + $0x284] ss:$16 sps:$4 sm:$0xff]  }
 0x252   :  { %7303 = vmatpush1.bf16.msra.mxu1 %v8878_v23  ;;  %6960 = vmatprep.subr.bf16.mxu0 %v8883_v24  ;;  %v8970_v23 = vld [vmem:[#allocation7 + $0x28c] ss:$16 sps:$4 sm:$0xff]   ;;  %v8968_v24 = vld [vmem:[#allocation7 + $0x288] ss:$16 sps:$4 sm:$0xff]  }
 0x253   :  { %7304 = vmatprep.subr.bf16.mxu1 %v8886_v26  ;;  %v8973_v26 = vld [vmem:[#allocation7 + $0x2a4] ss:$16 sps:$4 sm:$0xff]  }
 0x255   :  { %6961 = vmatpush1.bf16.msra.mxu0 %v8881_v27  ;;  %v8976_v27 = vld [vmem:[#allocation7 + $0x2ac] ss:$16 sps:$4 sm:$0xff]  }
 0x256   :  { %7305 = vmatpush1.bf16.msra.mxu1 %v8884_v29  ;;  %6962 = vmatprep.subr.bf16.mxu0 %v8889_v30  ;;  %v8971_v29 = vld [vmem:[#allocation7 + $0x2a0] ss:$16 sps:$4 sm:$0xff]   ;;  %v8974_v30 = vld [vmem:[#allocation7 + $0x2a8] ss:$16 sps:$4 sm:$0xff]  }
 0x257   :  { %7306 = vmatprep.subr.bf16.mxu1 %v8892_v31  ;;  %v8979_v31 = vld [vmem:[#allocation7 + $0x2c4] ss:$16 sps:$4 sm:$0xff]  }
 0x259   :  { %6963 = vmatpush1.bf16.msra.mxu0 %v8887_v32 }
 0x25a   :  { %7307 = vmatpush1.bf16.msra.mxu1 %v8890_v33  ;;  %6964 = vmatprep.subr.bf16.mxu0 %v8895_v34  ;;  %v8982_v33 = vld [vmem:[#allocation7 + $0x2cc] ss:$16 sps:$4 sm:$0xff]  }
 0x25b   :  { %7308 = vmatprep.subr.bf16.mxu1 %v8898_v35 }
 0x25d   :  { %6965 = vmatpush1.bf16.msra.mxu0 %v8893_v36  ;;  %v8977_v36 = vld [vmem:[#allocation7 + $0x2c0] ss:$16 sps:$4 sm:$0xff]  }
 0x25e   :  { %7309 = vmatpush1.bf16.msra.mxu1 %v8896_v37  ;;  %6966 = vmatprep.subr.bf16.mxu0 %v8901_v38 }
 0x25f   :  { %7310 = vmatprep.subr.bf16.mxu1 %v8904_v39  ;;  %v8980_v39 = vld [vmem:[#allocation7 + $0x2c8] ss:$16 sps:$4 sm:$0xff]  }
 0x261   :  { %6967 = vmatpush1.bf16.msra.mxu0 %v8899_v40  ;;  %v8985_v40 = vld [vmem:[#allocation7 + $0x2e4] ss:$16 sps:$4 sm:$0xff]  }
 0x262   :  { %7311 = vmatpush1.bf16.msra.mxu1 %v8902_v41  ;;  %6968 = vmatprep.subr.bf16.mxu0 %v8907_v42 }
 0x263   :  { %7312 = vmatprep.subr.bf16.mxu1 %v8910_v43 }
 0x265   :  { %6969 = vmatpush1.bf16.msra.mxu0 %v8905_v44 }
 0x266   :  { %7313 = vmatpush1.bf16.msra.mxu1 %v8908_v45  ;;  %6970 = vmatprep.subr.bf16.mxu0 %v8913_v46  ;;  %v8988_v45 = vld [vmem:[#allocation7 + $0x2ec] ss:$16 sps:$4 sm:$0xff]  }
 0x267   :  { %7314 = vmatprep.subr.bf16.mxu1 %v8916_v47 }
 0x269   :  { %6971 = vmatpush1.bf16.msra.mxu0 %v8911_v48 }
 0x26a   :  { %7315 = vmatpush1.bf16.msra.mxu1 %v8914_v50  ;;  %6972 = vmatprep.subr.bf16.mxu0 %v8919_v51 }
 0x26b   :  { %7316 = vmatprep.subr.bf16.mxu1 %v8922_v58 }
 0x26d   :  { %6973 = vmatpush1.bf16.msra.mxu0 %v8917_v54 }
 0x26e   :  { %7317 = vmatpush1.bf16.msra.mxu1 %v8920_v55  ;;  %6974 = vmatprep.subr.bf16.mxu0 %v8925_v56 }
 0x26f   :  { %7318 = vmatprep.subr.bf16.mxu1 %v8928_v57 }
 0x271   :  { %6975 = vmatpush1.bf16.msra.mxu0 %v8923_v59  ;;  %v8983_v59 = vld [vmem:[#allocation7 + $0x2e0] ss:$16 sps:$4 sm:$0xff]  }
 0x272   :  { %7319 = vmatpush1.bf16.msra.mxu1 %v8926_v60  ;;  %6976 = vmatprep.subr.bf16.mxu0 %v8931_v61  ;;  %v8986_v61 = vld [vmem:[#allocation7 + $0x2e8] ss:$16 sps:$4 sm:$0xff]  }
 0x273   :  { %7320 = vmatprep.subr.bf16.mxu1 %v8934_v62  ;;  %v8991_v62 = vld [vmem:[#allocation7 + $0x304] ss:$16 sps:$4 sm:$0xff]  }
 0x275   :  { %6977 = vmatpush1.bf16.msra.mxu0 %v8929_v0  ;;  %v8994_v0 = vld [vmem:[#allocation7 + $0x30c] ss:$16 sps:$4 sm:$0xff]  }
 0x276   :  { %7321 = vmatpush1.bf16.msra.mxu1 %v8932_v1  ;;  %6978 = vmatprep.subr.bf16.mxu0 %v8937_v25  ;;  %v8989_v1 = vld [vmem:[#allocation7 + $0x300] ss:$16 sps:$4 sm:$0xff]   ;;  %v8992_v25 = vld [vmem:[#allocation7 + $0x308] ss:$16 sps:$4 sm:$0xff]  }
 0x277   :  { %7322 = vmatprep.subr.bf16.mxu1 %v8940_v2  ;;  %v8997_v2 = vld [vmem:[#allocation7 + $0x324] ss:$16 sps:$4 sm:$0xff]  }
 0x279   :  { %6979 = vmatpush1.bf16.msra.mxu0 %v8935_v5  ;;  %v9000_v5 = vld [vmem:[#allocation7 + $0x32c] ss:$16 sps:$4 sm:$0xff]  }
 0x27a   :  { %7323 = vmatpush1.bf16.msra.mxu1 %v8938_v7  ;;  %6991 = vmatprep.subr.bf16.mxu0 %v8943_v8  ;;  %v8995_v7 = vld [vmem:[#allocation7 + $0x320] ss:$16 sps:$4 sm:$0xff]   ;;  %v8998_v8 = vld [vmem:[#allocation7 + $0x328] ss:$16 sps:$4 sm:$0xff]  }
 0x27b   :  { %7335 = vmatprep.subr.bf16.mxu1 %v8946_v9  ;;  %v9003_v9 = vld [vmem:[#allocation7 + $0x344] ss:$16 sps:$4 sm:$0xff]  }
 0x27c   :  { %6981 = vmatmul.mubr.bf16.vlgmr.msra.gmra.mrb[16].mxu0 %v9818_v63 }
 0x27d   :  { %7325 = vmatmul.mubr.bf16.vlgmr.msra.gmra.mrb[16].mxu1 %v9818_v63  ;;  %6992 = vmatpush1.bf16.msra.mxu0 %v8941_v10  ;;  %v8964_v63 = vld [vmem:[#allocation7 + $0x26c] ss:$16 sps:$4 sm:$0xff]  }
 0x27e   :  { %7023 = vmatprep.mubr.bf16.mxu0 %v9824_v6  ;;  %7336 = vmatpush1.bf16.msra.mxu1 %v8944_v11  ;;  %v9006_v10 = vld [vmem:[#allocation7 + $0x34c] ss:$16 sps:$4 sm:$0xff]   ;;  %v9001_v11 = vld [vmem:[#allocation7 + $0x340] ss:$16 sps:$4 sm:$0xff]  }
 0x27f   :  { %7367 = vmatprep.mubr.bf16.mxu1 %v9824_v6  ;;  %6993 = vmatprep.subr.bf16.mxu0 %v8949_v12  ;;  %v8965_v6 = vld [vmem:[#allocation7 + $0x280] ss:$16 sps:$4 sm:$0xff]   ;;  %v9004_v12 = vld [vmem:[#allocation7 + $0x348] ss:$16 sps:$4 sm:$0xff]  }
 0x280   :  { %7337 = vmatprep.subr.bf16.mxu1 %v8952_v13  ;;  %v9009_v13 = vld [vmem:[#allocation7 + $0x364] ss:$16 sps:$4 sm:$0xff]  }
 0x281   :  { %6994 = vmatpush1.bf16.msra.mxu0 %v8947_v28  ;;  %v9012_v28 = vld [vmem:[#allocation7 + $0x36c] ss:$16 sps:$4 sm:$0xff]  }
 0x282   :  { %7338 = vmatpush1.bf16.msra.mxu1 %v8950_v14  ;;  %6995 = vmatprep.subr.bf16.mxu0 %v8955_v16  ;;  %v9007_v14 = vld [vmem:[#allocation7 + $0x360] ss:$16 sps:$4 sm:$0xff]   ;;  %v9010_v16 = vld [vmem:[#allocation7 + $0x368] ss:$16 sps:$4 sm:$0xff]  }
 0x283   :  { %7339 = vmatprep.subr.bf16.mxu1 %v8958_v17  ;;  %v9015_v17 = vld [vmem:[#allocation7 + $0x384] ss:$16 sps:$4 sm:$0xff]  }
 0x285   :  { %6996 = vmatpush1.bf16.msra.mxu0 %v8953_v18  ;;  %v9018_v18 = vld [vmem:[#allocation7 + $0x38c] ss:$16 sps:$4 sm:$0xff]  }
 0x286   :  { %7340 = vmatpush1.bf16.msra.mxu1 %v8956_v4  ;;  %6997 = vmatprep.subr.bf16.mxu0 %v8961_v19  ;;  %v9013_v4 = vld [vmem:[#allocation7 + $0x380] ss:$16 sps:$4 sm:$0xff]   ;;  %v9016_v19 = vld [vmem:[#allocation7 + $0x388] ss:$16 sps:$4 sm:$0xff]  }
 0x287   :  { %7341 = vmatprep.subr.bf16.mxu1 %v8964_v63  ;;  %v9021_v63 = vld [vmem:[#allocation7 + $0x3a4] ss:$16 sps:$4 sm:$0xff]  }
 0x289   :  { %6998 = vmatpush1.bf16.msra.mxu0 %v8959_v20  ;;  %v9024_v20 = vld [vmem:[#allocation7 + $0x3ac] ss:$16 sps:$4 sm:$0xff]  }
 0x28a   :  { %7342 = vmatpush1.bf16.msra.mxu1 %v8962_v21  ;;  %6999 = vmatprep.subr.bf16.mxu0 %v8967_v22  ;;  %v9019_v21 = vld [vmem:[#allocation7 + $0x3a0] ss:$16 sps:$4 sm:$0xff]   ;;  %v9022_v22 = vld [vmem:[#allocation7 + $0x3a8] ss:$16 sps:$4 sm:$0xff]  }
 0x28b   :  { %7343 = vmatprep.subr.bf16.mxu1 %v8970_v23  ;;  %v9027_v23 = vld [vmem:[#allocation7 + $0x3c4] ss:$16 sps:$4 sm:$0xff]  }
 0x28d   :  { %7000 = vmatpush1.bf16.msra.mxu0 %v8965_v6  ;;  %v9030_v6 = vld [vmem:[#allocation7 + $0x3cc] ss:$16 sps:$4 sm:$0xff]  }
 0x28e   :  { %7344 = vmatpush1.bf16.msra.mxu1 %v8968_v24  ;;  %7001 = vmatprep.subr.bf16.mxu0 %v8973_v26  ;;  %v9025_v24 = vld [vmem:[#allocation7 + $0x3c0] ss:$16 sps:$4 sm:$0xff]   ;;  %v9028_v26 = vld [vmem:[#allocation7 + $0x3c8] ss:$16 sps:$4 sm:$0xff]  }
 0x28f   :  { %v3561_v32 = vpop.f32.mrb[8].mxu0  ;;  %7345 = vmatprep.subr.bf16.mxu1 %v8976_v27  ;;  %v3647_v34 = vpop.f32.mrb[8].mxu1  ;;  %v9033_v27 = vld [vmem:[#allocation7 + $0x3e4] ss:$16 sps:$4 sm:$0xff]  }
 0x290   :  { %v3563_v35 = vpop.f32.mrb[9].mxu0  ;;  %v3649_v37 = vpop.f32.mrb[9].mxu1  ;;  %v3836_v41 = vmax.f32 %v3561_v32, 0.0  ;;  %v3838_v46 = vmax.f32 %v3647_v34, 0.0  ;;  %v9039_v32 = vld [vmem:[#allocation7 + $0x404] ss:$16 sps:$4 sm:$0xff]  }
 0x291   :  { %v3565_v38 = vpop.f32.mrb[10].mxu0  ;;  %7002 = vmatpush1.bf16.msra.mxu0 %v8971_v29  ;;  %v3651_v43 = vpop.f32.mrb[10].mxu1  ;;  %v3837_v47 = vmax.f32 %v3563_v35, 0.0  ;;  %v3839_v58 = vmax.f32 %v3649_v37, 0.0  ;;  %v9036_v29 = vld [vmem:[#allocation7 + $0x3ec] ss:$16 sps:$4 sm:$0xff]  }
 0x292   :  { %v3852_v42 = vmax.f32 %v3565_v38, 0.0  ;;  %7346 = vmatpush1.bf16.msra.mxu1 %v8974_v30  ;;  %v3567_v44 = vpop.f32.mrb[11].mxu0  ;;  %7003 = vmatprep.subr.bf16.mxu0 %v8979_v31  ;;  %v3854_v48 = vmax.f32 %v3651_v43, 0.0  ;;  %v3653_v51 = vpop.f32.mrb[11].mxu1  ;;  %v9031_v30 = vld [vmem:[#allocation7 + $0x3e0] ss:$16 sps:$4 sm:$0xff]  }
 0x293   :  { %v3853_v50 = vmax.f32 %v3567_v44, 0.0  ;;  %7347 = vmatprep.subr.bf16.mxu1 %v8982_v33  ;;  %v3855_v55 = vmax.f32 %v3653_v51, 0.0  ;;  %v9034_v31 = vld [vmem:[#allocation7 + $0x3e8] ss:$16 sps:$4 sm:$0xff]   ;;  %v9042_v33 = vld [vmem:[#allocation7 + $0x40c] ss:$16 sps:$4 sm:$0xff]  }
 0x294   :  { %v9850_v54 = vpack.c.bf16 %v3852_v42, %v3836_v41  ;;  %v9852_v56 = vpack.c.bf16 %v3854_v48, %v3838_v46  ;;  %v9037_v34 = vld [vmem:[#allocation7 + $0x400] ss:$16 sps:$4 sm:$0xff]   ;;  %v9040_v35 = vld [vmem:[#allocation7 + $0x408] ss:$16 sps:$4 sm:$0xff]   ;;  %v9048_v37 = vld [vmem:[#allocation7 + $0x42c] ss:$16 sps:$4 sm:$0xff]  }
 0x295   :  { %v9854_v57 = vpack.c.bf16 %v3853_v50, %v3837_v47  ;;  %7004 = vmatpush1.bf16.msra.mxu0 %v8977_v36  ;;  %v9856_v60 = vpack.c.bf16 %v3855_v55, %v3839_v58  ;;  %v9045_v36 = vld [vmem:[#allocation7 + $0x424] ss:$16 sps:$4 sm:$0xff]   ;;  %v9043_v38 = vld [vmem:[#allocation7 + $0x420] ss:$16 sps:$4 sm:$0xff]   ;;  %v9054_v41 = vld [vmem:[#allocation7 + $0x44c] ss:$16 sps:$4 sm:$0xff]  }
 0x296   :  { %7348 = vmatpush1.bf16.msra.mxu1 %v8980_v39  ;;  %7005 = vmatprep.subr.bf16.mxu0 %v8985_v40  ;;  %v9046_v39 = vld [vmem:[#allocation7 + $0x428] ss:$16 sps:$4 sm:$0xff]   ;;  %v9051_v40 = vld [vmem:[#allocation7 + $0x444] ss:$16 sps:$4 sm:$0xff]   ;;  %v9049_v42 = vld [vmem:[#allocation7 + $0x440] ss:$16 sps:$4 sm:$0xff]  }
 0x297   :  { %7349 = vmatprep.subr.bf16.mxu1 %v8988_v45  ;;  %v9052_v43 = vld [vmem:[#allocation7 + $0x448] ss:$16 sps:$4 sm:$0xff]   ;;  %v9057_v44 = vld [vmem:[#allocation7 + $0x464] ss:$16 sps:$4 sm:$0xff]   ;;  %v9055_v45 = vld [vmem:[#allocation7 + $0x460] ss:$16 sps:$4 sm:$0xff]  }
 0x298   :  { %v9058_v46 = vld [vmem:[#allocation7 + $0x468] ss:$16 sps:$4 sm:$0xff]   ;;  %v9063_v47 = vld [vmem:[#allocation7 + $0x484] ss:$16 sps:$4 sm:$0xff]   ;;  %v9066_v48 = vld [vmem:[#allocation7 + $0x48c] ss:$16 sps:$4 sm:$0xff]  }
 0x299   :  { %7006 = vmatpush1.bf16.msra.mxu0 %v8983_v59  ;;  %v9064_v50 = vld [vmem:[#allocation7 + $0x488] ss:$16 sps:$4 sm:$0xff]   ;;  %v9069_v51 = vld [vmem:[#allocation7 + $0x4a4] ss:$16 sps:$4 sm:$0xff]   ;;  %v9072_v58 = vld [vmem:[#allocation7 + $0x4ac] ss:$16 sps:$4 sm:$0xff]  }
 0x29a   :  { %7350 = vmatpush1.bf16.msra.mxu1 %v8986_v61  ;;  %7007 = vmatprep.subr.bf16.mxu0 %v8991_v62  ;;  %v9067_v55 = vld [vmem:[#allocation7 + $0x4a0] ss:$16 sps:$4 sm:$0xff]   ;;  %v9070_v59 = vld [vmem:[#allocation7 + $0x4a8] ss:$16 sps:$4 sm:$0xff]   ;;  %v9075_v61 = vld [vmem:[#allocation7 + $0x4c4] ss:$16 sps:$4 sm:$0xff]  }
 0x29b   :  { %7351 = vmatprep.subr.bf16.mxu1 %v8994_v0  ;;  %v9078_v62 = vld [vmem:[#allocation7 + $0x4cc] ss:$16 sps:$4 sm:$0xff]   ;;  %v9073_v0 = vld [vmem:[#allocation7 + $0x4c0] ss:$16 sps:$4 sm:$0xff]  }
 0x29d   :  { %7008 = vmatpush1.bf16.msra.mxu0 %v8989_v1  ;;  %v9076_v1 = vld [vmem:[#allocation7 + $0x4c8] ss:$16 sps:$4 sm:$0xff]  }
 0x29e   :  { %7352 = vmatpush1.bf16.msra.mxu1 %v8992_v25  ;;  %7009 = vmatprep.subr.bf16.mxu0 %v8997_v2  ;;  %v9081_v25 = vld [vmem:[#allocation7 + $0x4e4] ss:$16 sps:$4 sm:$0xff]   ;;  %v9084_v2 = vld [vmem:[#allocation7 + $0x4ec] ss:$16 sps:$4 sm:$0xff]  }
 0x29f   :  { %7353 = vmatprep.subr.bf16.mxu1 %v9000_v5  ;;  %v9079_v5 = vld [vmem:[#allocation7 + $0x4e0] ss:$16 sps:$4 sm:$0xff]  }
 0x2a1   :  { %7010 = vmatpush1.bf16.msra.mxu0 %v8995_v7  ;;  %v9082_v7 = vld [vmem:[#allocation7 + $0x4e8] ss:$16 sps:$4 sm:$0xff]  }
 0x2a2   :  { %7354 = vmatpush1.bf16.msra.mxu1 %v8998_v8  ;;  %7011 = vmatprep.subr.bf16.mxu0 %v9003_v9  ;;  %v9087_v8 = vld [vmem:[#allocation7 + $0x504] ss:$16 sps:$4 sm:$0xff]   ;;  %v9090_v9 = vld [vmem:[#allocation7 + $0x50c] ss:$16 sps:$4 sm:$0xff]  }
 0x2a3   :  { %7355 = vmatprep.subr.bf16.mxu1 %v9006_v10  ;;  %v9085_v10 = vld [vmem:[#allocation7 + $0x500] ss:$16 sps:$4 sm:$0xff]  }
 0x2a5   :  { %7012 = vmatpush1.bf16.msra.mxu0 %v9001_v11  ;;  %v9088_v11 = vld [vmem:[#allocation7 + $0x508] ss:$16 sps:$4 sm:$0xff]  }
 0x2a6   :  { %7356 = vmatpush1.bf16.msra.mxu1 %v9004_v12  ;;  %7013 = vmatprep.subr.bf16.mxu0 %v9009_v13  ;;  %v9093_v12 = vld [vmem:[#allocation7 + $0x524] ss:$16 sps:$4 sm:$0xff]   ;;  %v9096_v13 = vld [vmem:[#allocation7 + $0x52c] ss:$16 sps:$4 sm:$0xff]  }
 0x2a7   :  { %7357 = vmatprep.subr.bf16.mxu1 %v9012_v28  ;;  %v9091_v28 = vld [vmem:[#allocation7 + $0x520] ss:$16 sps:$4 sm:$0xff]  }
 0x2a9   :  { %7014 = vmatpush1.bf16.msra.mxu0 %v9007_v14  ;;  %v9094_v14 = vld [vmem:[#allocation7 + $0x528] ss:$16 sps:$4 sm:$0xff]  }
 0x2aa   :  { %7358 = vmatpush1.bf16.msra.mxu1 %v9010_v16  ;;  %7015 = vmatprep.subr.bf16.mxu0 %v9015_v17  ;;  %v9099_v16 = vld [vmem:[#allocation7 + $0x544] ss:$16 sps:$4 sm:$0xff]   ;;  %v9102_v17 = vld [vmem:[#allocation7 + $0x54c] ss:$16 sps:$4 sm:$0xff]  }
 0x2ab   :  { %7359 = vmatprep.subr.bf16.mxu1 %v9018_v18  ;;  %v9097_v18 = vld [vmem:[#allocation7 + $0x540] ss:$16 sps:$4 sm:$0xff]  }
 0x2ad   :  { %7016 = vmatpush1.bf16.msra.mxu0 %v9013_v4  ;;  %v9100_v4 = vld [vmem:[#allocation7 + $0x548] ss:$16 sps:$4 sm:$0xff]  }
 0x2ae   :  { %7360 = vmatpush1.bf16.msra.mxu1 %v9016_v19  ;;  %7017 = vmatprep.subr.bf16.mxu0 %v9021_v63  ;;  %v9105_v19 = vld [vmem:[#allocation7 + $0x564] ss:$16 sps:$4 sm:$0xff]   ;;  %v9108_v63 = vld [vmem:[#allocation7 + $0x56c] ss:$16 sps:$4 sm:$0xff]  }
 0x2af   :  { %7361 = vmatprep.subr.bf16.mxu1 %v9024_v20  ;;  %v9103_v20 = vld [vmem:[#allocation7 + $0x560] ss:$16 sps:$4 sm:$0xff]  }
 0x2b1   :  { %7018 = vmatpush1.bf16.msra.mxu0 %v9019_v21  ;;  %v9106_v21 = vld [vmem:[#allocation7 + $0x568] ss:$16 sps:$4 sm:$0xff]  }
 0x2b2   :  { %7362 = vmatpush1.bf16.msra.mxu1 %v9022_v22  ;;  %7019 = vmatprep.subr.bf16.mxu0 %v9027_v23  ;;  %v9111_v22 = vld [vmem:[#allocation7 + $0x584] ss:$16 sps:$4 sm:$0xff]   ;;  %v9114_v23 = vld [vmem:[#allocation7 + $0x58c] ss:$16 sps:$4 sm:$0xff]  }
 0x2b3   :  { %7363 = vmatprep.subr.bf16.mxu1 %v9030_v6  ;;  %v9109_v6 = vld [vmem:[#allocation7 + $0x580] ss:$16 sps:$4 sm:$0xff]  }
 0x2b5   :  { %7020 = vmatpush1.bf16.msra.mxu0 %v9025_v24  ;;  %v9112_v24 = vld [vmem:[#allocation7 + $0x588] ss:$16 sps:$4 sm:$0xff]  }
 0x2b6   :  { %7364 = vmatpush1.bf16.msra.mxu1 %v9028_v26  ;;  %7021 = vmatprep.subr.bf16.mxu0 %v9033_v27  ;;  %v9117_v26 = vld [vmem:[#allocation7 + $0x5a4] ss:$16 sps:$4 sm:$0xff]   ;;  %v9120_v27 = vld [vmem:[#allocation7 + $0x5ac] ss:$16 sps:$4 sm:$0xff]  }
 0x2b7   :  { %7365 = vmatprep.subr.bf16.mxu1 %v9036_v29  ;;  %v9115_v29 = vld [vmem:[#allocation7 + $0x5a0] ss:$16 sps:$4 sm:$0xff]  }
 0x2b9   :  { %7022 = vmatpush1.bf16.msra.mxu0 %v9031_v30  ;;  %v9118_v30 = vld [vmem:[#allocation7 + $0x5a8] ss:$16 sps:$4 sm:$0xff]  }
 0x2ba   :  { %7366 = vmatpush1.bf16.msra.mxu1 %v9034_v31  ;;  %7034 = vmatprep.subr.bf16.mxu0 %v9039_v32  ;;  %v9123_v31 = vld [vmem:[#allocation7 + $0x5c4] ss:$16 sps:$4 sm:$0xff]   ;;  %v9126_v32 = vld [vmem:[#allocation7 + $0x5cc] ss:$16 sps:$4 sm:$0xff]  }
 0x2bb   :  { %7378 = vmatprep.subr.bf16.mxu1 %v9042_v33  ;;  %v9121_v33 = vld [vmem:[#allocation7 + $0x5c0] ss:$16 sps:$4 sm:$0xff]  }
 0x2bc   :  { %7024 = vmatmul.mubr.bf16.vlgmr.msra.gmra.mrb[16].mxu0 %v9820_v3 }
 0x2bd   :  { %7368 = vmatmul.mubr.bf16.vlgmr.msra.gmra.mrb[16].mxu1 %v9820_v3  ;;  %7035 = vmatpush1.bf16.msra.mxu0 %v9037_v34  ;;  %v9060_v3 = vld [vmem:[#allocation7 + $0x46c] ss:$16 sps:$4 sm:$0xff]   ;;  %v9124_v34 = vld [vmem:[#allocation7 + $0x5c8] ss:$16 sps:$4 sm:$0xff]  }
 0x2be   :  { %7066 = vmatprep.mubr.bf16.mxu0 %v9838_v53  ;;  %7379 = vmatpush1.bf16.msra.mxu1 %v9040_v35  ;;  %v9129_v35 = vld [vmem:[#allocation7 + $0x5e4] ss:$16 sps:$4 sm:$0xff]  }
 0x2bf   :  { %7410 = vmatprep.mubr.bf16.mxu1 %v9838_v53  ;;  %7036 = vmatprep.subr.bf16.mxu0 %v9045_v36  ;;  %v9061_v53 = vld [vmem:[#allocation7 + $0x480] ss:$16 sps:$4 sm:$0xff]   ;;  %v9132_v36 = vld [vmem:[#allocation7 + $0x5ec] ss:$16 sps:$4 sm:$0xff]  }
 0x2c0   :  { %7380 = vmatprep.subr.bf16.mxu1 %v9048_v37  ;;  %v9127_v37 = vld [vmem:[#allocation7 + $0x5e0] ss:$16 sps:$4 sm:$0xff]  }
 0x2c1   :  { %7037 = vmatpush1.bf16.msra.mxu0 %v9043_v38  ;;  %v9130_v38 = vld [vmem:[#allocation7 + $0x5e8] ss:$16 sps:$4 sm:$0xff]  }
 0x2c2   :  { %7381 = vmatpush1.bf16.msra.mxu1 %v9046_v39  ;;  %7038 = vmatprep.subr.bf16.mxu0 %v9051_v40  ;;  %v9135_v39 = vld [vmem:[#allocation7 + $0x604] ss:$16 sps:$4 sm:$0xff]   ;;  %v9138_v40 = vld [vmem:[#allocation7 + $0x60c] ss:$16 sps:$4 sm:$0xff]  }
 0x2c3   :  { %7382 = vmatprep.subr.bf16.mxu1 %v9054_v41  ;;  %v9133_v41 = vld [vmem:[#allocation7 + $0x600] ss:$16 sps:$4 sm:$0xff]  }
 0x2c5   :  { %7039 = vmatpush1.bf16.msra.mxu0 %v9049_v42  ;;  %v9136_v42 = vld [vmem:[#allocation7 + $0x608] ss:$16 sps:$4 sm:$0xff]  }
 0x2c6   :  { %7383 = vmatpush1.bf16.msra.mxu1 %v9052_v43  ;;  %7040 = vmatprep.subr.bf16.mxu0 %v9057_v44  ;;  %v9141_v43 = vld [vmem:[#allocation7 + $0x624] ss:$16 sps:$4 sm:$0xff]   ;;  %v9144_v44 = vld [vmem:[#allocation7 + $0x62c] ss:$16 sps:$4 sm:$0xff]  }
 0x2c7   :  { %7384 = vmatprep.subr.bf16.mxu1 %v9060_v3  ;;  %v9139_v3 = vld [vmem:[#allocation7 + $0x620] ss:$16 sps:$4 sm:$0xff]  }
 0x2c9   :  { %7041 = vmatpush1.bf16.msra.mxu0 %v9055_v45  ;;  %v9142_v45 = vld [vmem:[#allocation7 + $0x628] ss:$16 sps:$4 sm:$0xff]  }
 0x2ca   :  { %7385 = vmatpush1.bf16.msra.mxu1 %v9058_v46  ;;  %7042 = vmatprep.subr.bf16.mxu0 %v9063_v47  ;;  %v9147_v46 = vld [vmem:[#allocation7 + $0x644] ss:$16 sps:$4 sm:$0xff]   ;;  %v9150_v47 = vld [vmem:[#allocation7 + $0x64c] ss:$16 sps:$4 sm:$0xff]  }
 0x2cb   :  { %7386 = vmatprep.subr.bf16.mxu1 %v9066_v48  ;;  %v9145_v48 = vld [vmem:[#allocation7 + $0x640] ss:$16 sps:$4 sm:$0xff]  }
 0x2cd   :  { %7043 = vmatpush1.bf16.msra.mxu0 %v9061_v53  ;;  %v9148_v53 = vld [vmem:[#allocation7 + $0x648] ss:$16 sps:$4 sm:$0xff]  }
 0x2ce   :  { %7387 = vmatpush1.bf16.msra.mxu1 %v9064_v50  ;;  %7044 = vmatprep.subr.bf16.mxu0 %v9069_v51  ;;  %v9153_v50 = vld [vmem:[#allocation7 + $0x664] ss:$16 sps:$4 sm:$0xff]   ;;  %v9151_v51 = vld [vmem:[#allocation7 + $0x660] ss:$16 sps:$4 sm:$0xff]  }
 0x2cf   :  { %7388 = vmatprep.subr.bf16.mxu1 %v9072_v58  ;;  %v9154_v58 = vld [vmem:[#allocation7 + $0x668] ss:$16 sps:$4 sm:$0xff]  }
 0x2d1   :  { %7045 = vmatpush1.bf16.msra.mxu0 %v9067_v55  ;;  %v9159_v55 = vld [vmem:[#allocation7 + $0x684] ss:$16 sps:$4 sm:$0xff]  }
 0x2d2   :  { %7389 = vmatpush1.bf16.msra.mxu1 %v9070_v59  ;;  %7046 = vmatprep.subr.bf16.mxu0 %v9075_v61  ;;  %v9162_v59 = vld [vmem:[#allocation7 + $0x68c] ss:$16 sps:$4 sm:$0xff]   ;;  %v9160_v61 = vld [vmem:[#allocation7 + $0x688] ss:$16 sps:$4 sm:$0xff]  }
 0x2d3   :  { %7390 = vmatprep.subr.bf16.mxu1 %v9078_v62  ;;  %v9165_v62 = vld [vmem:[#allocation7 + $0x6a4] ss:$16 sps:$4 sm:$0xff]  }
 0x2d5   :  { %7047 = vmatpush1.bf16.msra.mxu0 %v9073_v0  ;;  %v9168_v0 = vld [vmem:[#allocation7 + $0x6ac] ss:$16 sps:$4 sm:$0xff]  }
 0x2d6   :  { %7391 = vmatpush1.bf16.msra.mxu1 %v9076_v1  ;;  %7048 = vmatprep.subr.bf16.mxu0 %v9081_v25  ;;  %v9163_v1 = vld [vmem:[#allocation7 + $0x6a0] ss:$16 sps:$4 sm:$0xff]   ;;  %v9166_v25 = vld [vmem:[#allocation7 + $0x6a8] ss:$16 sps:$4 sm:$0xff]  }
 0x2d7   :  { %7392 = vmatprep.subr.bf16.mxu1 %v9084_v2  ;;  %v9171_v2 = vld [vmem:[#allocation7 + $0x6c4] ss:$16 sps:$4 sm:$0xff]  }
 0x2d9   :  { %7049 = vmatpush1.bf16.msra.mxu0 %v9079_v5 }
 0x2da   :  { %7393 = vmatpush1.bf16.msra.mxu1 %v9082_v7  ;;  %7050 = vmatprep.subr.bf16.mxu0 %v9087_v8  ;;  %v9174_v7 = vld [vmem:[#allocation7 + $0x6cc] ss:$16 sps:$4 sm:$0xff]  }
 0x2db   :  { %7394 = vmatprep.subr.bf16.mxu1 %v9090_v9 }
 0x2dd   :  { %7051 = vmatpush1.bf16.msra.mxu0 %v9085_v10  ;;  %v9169_v10 = vld [vmem:[#allocation7 + $0x6c0] ss:$16 sps:$4 sm:$0xff]  }
 0x2de   :  { %7395 = vmatpush1.bf16.msra.mxu1 %v9088_v11  ;;  %7052 = vmatprep.subr.bf16.mxu0 %v9093_v12 }
 0x2df   :  { %7396 = vmatprep.subr.bf16.mxu1 %v9096_v13  ;;  %v9172_v13 = vld [vmem:[#allocation7 + $0x6c8] ss:$16 sps:$4 sm:$0xff]  }
 0x2e1   :  { %7053 = vmatpush1.bf16.msra.mxu0 %v9091_v28  ;;  %v9177_v28 = vld [vmem:[#allocation7 + $0x6e4] ss:$16 sps:$4 sm:$0xff]  }
 0x2e2   :  { %7397 = vmatpush1.bf16.msra.mxu1 %v9094_v14  ;;  %7054 = vmatprep.subr.bf16.mxu0 %v9099_v16 }
 0x2e3   :  { %7398 = vmatprep.subr.bf16.mxu1 %v9102_v17 }
 0x2e5   :  { %7055 = vmatpush1.bf16.msra.mxu0 %v9097_v18 }
 0x2e6   :  { %7399 = vmatpush1.bf16.msra.mxu1 %v9100_v4  ;;  %7056 = vmatprep.subr.bf16.mxu0 %v9105_v19  ;;  %v9180_v4 = vld [vmem:[#allocation7 + $0x6ec] ss:$16 sps:$4 sm:$0xff]  }
 0x2e7   :  { %7400 = vmatprep.subr.bf16.mxu1 %v9108_v63 }
 0x2e9   :  { %7057 = vmatpush1.bf16.msra.mxu0 %v9103_v20 }
 0x2ea   :  { %7401 = vmatpush1.bf16.msra.mxu1 %v9106_v21  ;;  %7058 = vmatprep.subr.bf16.mxu0 %v9111_v22 }
 0x2eb   :  { %7402 = vmatprep.subr.bf16.mxu1 %v9114_v23 }
 0x2ed   :  { %7059 = vmatpush1.bf16.msra.mxu0 %v9109_v6 }
 0x2ee   :  { %7403 = vmatpush1.bf16.msra.mxu1 %v9112_v24  ;;  %7060 = vmatprep.subr.bf16.mxu0 %v9117_v26 }
 0x2ef   :  { %7404 = vmatprep.subr.bf16.mxu1 %v9120_v27 }
 0x2f1   :  { %7061 = vmatpush1.bf16.msra.mxu0 %v9115_v29  ;;  %v9175_v29 = vld [vmem:[#allocation7 + $0x6e0] ss:$16 sps:$4 sm:$0xff]  }
 0x2f2   :  { %7405 = vmatpush1.bf16.msra.mxu1 %v9118_v30  ;;  %7062 = vmatprep.subr.bf16.mxu0 %v9123_v31  ;;  %v9178_v31 = vld [vmem:[#allocation7 + $0x6e8] ss:$16 sps:$4 sm:$0xff]  }
 0x2f3   :  { %7406 = vmatprep.subr.bf16.mxu1 %v9126_v32  ;;  %v9183_v32 = vld [vmem:[#allocation7 + $0x704] ss:$16 sps:$4 sm:$0xff]  }
 0x2f5   :  { %7063 = vmatpush1.bf16.msra.mxu0 %v9121_v33  ;;  %v9186_v33 = vld [vmem:[#allocation7 + $0x70c] ss:$16 sps:$4 sm:$0xff]  }
 0x2f6   :  { %7407 = vmatpush1.bf16.msra.mxu1 %v9124_v34  ;;  %7064 = vmatprep.subr.bf16.mxu0 %v9129_v35  ;;  %v9181_v34 = vld [vmem:[#allocation7 + $0x700] ss:$16 sps:$4 sm:$0xff]   ;;  %v9184_v35 = vld [vmem:[#allocation7 + $0x708] ss:$16 sps:$4 sm:$0xff]  }
 0x2f7   :  { %7408 = vmatprep.subr.bf16.mxu1 %v9132_v36  ;;  %v9189_v36 = vld [vmem:[#allocation7 + $0x724] ss:$16 sps:$4 sm:$0xff]  }
 0x2f9   :  { %7065 = vmatpush1.bf16.msra.mxu0 %v9127_v37  ;;  %v9192_v37 = vld [vmem:[#allocation7 + $0x72c] ss:$16 sps:$4 sm:$0xff]  }
 0x2fa   :  { %7409 = vmatpush1.bf16.msra.mxu1 %v9130_v38  ;;  %7077 = vmatprep.subr.bf16.mxu0 %v9135_v39  ;;  %v9187_v38 = vld [vmem:[#allocation7 + $0x720] ss:$16 sps:$4 sm:$0xff]   ;;  %v9190_v39 = vld [vmem:[#allocation7 + $0x728] ss:$16 sps:$4 sm:$0xff]  }
 0x2fb   :  { %7421 = vmatprep.subr.bf16.mxu1 %v9138_v40  ;;  %v9195_v40 = vld [vmem:[#allocation7 + $0x744] ss:$16 sps:$4 sm:$0xff]  }
 0x2fc   :  { %7067 = vmatmul.mubr.bf16.vlgmr.msra.gmra.mrb[16].mxu0 %v9834_v49 }
 0x2fd   :  { %7411 = vmatmul.mubr.bf16.vlgmr.msra.gmra.mrb[16].mxu1 %v9834_v49  ;;  %7078 = vmatpush1.bf16.msra.mxu0 %v9133_v41  ;;  %v9156_v49 = vld [vmem:[#allocation7 + $0x66c] ss:$16 sps:$4 sm:$0xff]  }
 0x2fe   :  { %7109 = vmatprep.mubr.bf16.mxu0 %v9840_v15  ;;  %7422 = vmatpush1.bf16.msra.mxu1 %v9136_v42  ;;  %v9198_v41 = vld [vmem:[#allocation7 + $0x74c] ss:$16 sps:$4 sm:$0xff]   ;;  %v9193_v42 = vld [vmem:[#allocation7 + $0x740] ss:$16 sps:$4 sm:$0xff]  }
 0x2ff   :  { %7453 = vmatprep.mubr.bf16.mxu1 %v9840_v15  ;;  %7079 = vmatprep.subr.bf16.mxu0 %v9141_v43  ;;  %v9157_v15 = vld [vmem:[#allocation7 + $0x680] ss:$16 sps:$4 sm:$0xff]   ;;  %v9196_v43 = vld [vmem:[#allocation7 + $0x748] ss:$16 sps:$4 sm:$0xff]  }
 0x300   :  { %7423 = vmatprep.subr.bf16.mxu1 %v9144_v44  ;;  %v9201_v44 = vld [vmem:[#allocation7 + $0x764] ss:$16 sps:$4 sm:$0xff]  }
 0x301   :  { %7080 = vmatpush1.bf16.msra.mxu0 %v9139_v3  ;;  %v9204_v3 = vld [vmem:[#allocation7 + $0x76c] ss:$16 sps:$4 sm:$0xff]  }
 0x302   :  { %7424 = vmatpush1.bf16.msra.mxu1 %v9142_v45  ;;  %7081 = vmatprep.subr.bf16.mxu0 %v9147_v46  ;;  %v9199_v45 = vld [vmem:[#allocation7 + $0x760] ss:$16 sps:$4 sm:$0xff]   ;;  %v9202_v46 = vld [vmem:[#allocation7 + $0x768] ss:$16 sps:$4 sm:$0xff]  }
 0x303   :  { %7425 = vmatprep.subr.bf16.mxu1 %v9150_v47  ;;  %v9207_v47 = vld [vmem:[#allocation7 + $0x784] ss:$16 sps:$4 sm:$0xff]  }
 0x305   :  { %7082 = vmatpush1.bf16.msra.mxu0 %v9145_v48  ;;  %v9210_v48 = vld [vmem:[#allocation7 + $0x78c] ss:$16 sps:$4 sm:$0xff]  }
 0x306   :  { %7426 = vmatpush1.bf16.msra.mxu1 %v9148_v53  ;;  %7083 = vmatprep.subr.bf16.mxu0 %v9153_v50  ;;  %v9205_v53 = vld [vmem:[#allocation7 + $0x780] ss:$16 sps:$4 sm:$0xff]   ;;  %v9208_v50 = vld [vmem:[#allocation7 + $0x788] ss:$16 sps:$4 sm:$0xff]  }
 0x307   :  { %7427 = vmatprep.subr.bf16.mxu1 %v9156_v49  ;;  %v9213_v49 = vld [vmem:[#allocation7 + $0x7a4] ss:$16 sps:$4 sm:$0xff]  }
 0x309   :  { %7084 = vmatpush1.bf16.msra.mxu0 %v9151_v51  ;;  %v9216_v51 = vld [vmem:[#allocation7 + $0x7ac] ss:$16 sps:$4 sm:$0xff]  }
 0x30a   :  { %7428 = vmatpush1.bf16.msra.mxu1 %v9154_v58  ;;  %7085 = vmatprep.subr.bf16.mxu0 %v9159_v55  ;;  %v9211_v58 = vld [vmem:[#allocation7 + $0x7a0] ss:$16 sps:$4 sm:$0xff]   ;;  %v9214_v55 = vld [vmem:[#allocation7 + $0x7a8] ss:$16 sps:$4 sm:$0xff]  }
 0x30b   :  { %7429 = vmatprep.subr.bf16.mxu1 %v9162_v59  ;;  %v9219_v59 = vld [vmem:[#allocation7 + $0x7c4] ss:$16 sps:$4 sm:$0xff]  }
 0x30d   :  { %7086 = vmatpush1.bf16.msra.mxu0 %v9157_v15  ;;  %v9222_v15 = vld [vmem:[#allocation7 + $0x7cc] ss:$16 sps:$4 sm:$0xff]  }
 0x30e   :  { %7430 = vmatpush1.bf16.msra.mxu1 %v9160_v61  ;;  %7087 = vmatprep.subr.bf16.mxu0 %v9165_v62  ;;  %v9217_v61 = vld [vmem:[#allocation7 + $0x7c0] ss:$16 sps:$4 sm:$0xff]   ;;  %v9220_v62 = vld [vmem:[#allocation7 + $0x7c8] ss:$16 sps:$4 sm:$0xff]  }
 0x30f   :  { %v3733_v5 = vpop.f32.mrb[12].mxu0  ;;  %7431 = vmatprep.subr.bf16.mxu1 %v9168_v0  ;;  %v3819_v8 = vpop.f32.mrb[12].mxu1  ;;  %v9225_v0 = vld [vmem:[#allocation7 + $0x7e4] ss:$16 sps:$4 sm:$0xff]  }
 0x310   :  { %v3735_v9 = vpop.f32.mrb[13].mxu0  ;;  %v3821_v11 = vpop.f32.mrb[13].mxu1  ;;  %v3840_v14 = vmax.f32 %v3733_v5, 0.0  ;;  %v3842_v19 = vmax.f32 %v3819_v8, 0.0  ;;  %v9231_v5 = vld [vmem:[#allocation7 + $0x804] ss:$16 sps:$4 sm:$0xff]  }
 0x311   :  { %v3737_v12 = vpop.f32.mrb[14].mxu0  ;;  %7088 = vmatpush1.bf16.msra.mxu0 %v9163_v1  ;;  %v3823_v17 = vpop.f32.mrb[14].mxu1  ;;  %v3841_v63 = vmax.f32 %v3735_v9, 0.0  ;;  %v3843_v23 = vmax.f32 %v3821_v11, 0.0  ;;  %v9228_v1 = vld [vmem:[#allocation7 + $0x7ec] ss:$16 sps:$4 sm:$0xff]  }
 0x312   :  { %v3856_v16 = vmax.f32 %v3737_v12, 0.0  ;;  %7432 = vmatpush1.bf16.msra.mxu1 %v9166_v25  ;;  %v3739_v18 = vpop.f32.mrb[15].mxu0  ;;  %7089 = vmatprep.subr.bf16.mxu0 %v9171_v2  ;;  %v3858_v20 = vmax.f32 %v3823_v17, 0.0  ;;  %v3825_v22 = vpop.f32.mrb[15].mxu1  ;;  %v9223_v25 = vld [vmem:[#allocation7 + $0x7e0] ss:$16 sps:$4 sm:$0xff]  }
 0x313   :  { %v3857_v21 = vmax.f32 %v3739_v18, 0.0  ;;  %7433 = vmatprep.subr.bf16.mxu1 %v9174_v7  ;;  %v3859_v24 = vmax.f32 %v3825_v22, 0.0  ;;  %v9226_v2 = vld [vmem:[#allocation7 + $0x7e8] ss:$16 sps:$4 sm:$0xff]   ;;  %v9234_v7 = vld [vmem:[#allocation7 + $0x80c] ss:$16 sps:$4 sm:$0xff]  }
 0x314   :  { %v9866_v6 = vpack.c.bf16 %v3856_v16, %v3840_v14  ;;  %v9868_v26 = vpack.c.bf16 %v3858_v20, %v3842_v19  ;;  %v9229_v8 = vld [vmem:[#allocation7 + $0x800] ss:$16 sps:$4 sm:$0xff]   ;;  %v9232_v9 = vld [vmem:[#allocation7 + $0x808] ss:$16 sps:$4 sm:$0xff]   ;;  %v9240_v11 = vld [vmem:[#allocation7 + $0x82c] ss:$16 sps:$4 sm:$0xff]  }
 0x315   :  { %v9870_v27 = vpack.c.bf16 %v3857_v21, %v3841_v63  ;;  %7090 = vmatpush1.bf16.msra.mxu0 %v9169_v10  ;;  %v9872_v30 = vpack.c.bf16 %v3859_v24, %v3843_v23  ;;  %v9237_v10 = vld [vmem:[#allocation7 + $0x824] ss:$16 sps:$4 sm:$0xff]   ;;  %v9235_v12 = vld [vmem:[#allocation7 + $0x820] ss:$16 sps:$4 sm:$0xff]   ;;  %v9246_v14 = vld [vmem:[#allocation7 + $0x84c] ss:$16 sps:$4 sm:$0xff]  }
 0x316   :  { %7434 = vmatpush1.bf16.msra.mxu1 %v9172_v13  ;;  %7091 = vmatprep.subr.bf16.mxu0 %v9177_v28  ;;  %v9238_v13 = vld [vmem:[#allocation7 + $0x828] ss:$16 sps:$4 sm:$0xff]   ;;  %v9243_v28 = vld [vmem:[#allocation7 + $0x844] ss:$16 sps:$4 sm:$0xff]   ;;  %v9241_v16 = vld [vmem:[#allocation7 + $0x840] ss:$16 sps:$4 sm:$0xff]  }
 0x317   :  { %7435 = vmatprep.subr.bf16.mxu1 %v9180_v4  ;;  %v9244_v17 = vld [vmem:[#allocation7 + $0x848] ss:$16 sps:$4 sm:$0xff]   ;;  %v9249_v18 = vld [vmem:[#allocation7 + $0x864] ss:$16 sps:$4 sm:$0xff]   ;;  %v9247_v4 = vld [vmem:[#allocation7 + $0x860] ss:$16 sps:$4 sm:$0xff]  }
 0x318   :  { %v9250_v19 = vld [vmem:[#allocation7 + $0x868] ss:$16 sps:$4 sm:$0xff]   ;;  %v9255_v63 = vld [vmem:[#allocation7 + $0x884] ss:$16 sps:$4 sm:$0xff]   ;;  %v9258_v20 = vld [vmem:[#allocation7 + $0x88c] ss:$16 sps:$4 sm:$0xff]  }
 0x319   :  { %7092 = vmatpush1.bf16.msra.mxu0 %v9175_v29  ;;  %v9256_v21 = vld [vmem:[#allocation7 + $0x888] ss:$16 sps:$4 sm:$0xff]   ;;  %v9261_v22 = vld [vmem:[#allocation7 + $0x8a4] ss:$16 sps:$4 sm:$0xff]   ;;  %v9264_v23 = vld [vmem:[#allocation7 + $0x8ac] ss:$16 sps:$4 sm:$0xff]  }
 0x31a   :  { %7436 = vmatpush1.bf16.msra.mxu1 %v9178_v31  ;;  %7093 = vmatprep.subr.bf16.mxu0 %v9183_v32  ;;  %v9259_v24 = vld [vmem:[#allocation7 + $0x8a0] ss:$16 sps:$4 sm:$0xff]   ;;  %v9262_v29 = vld [vmem:[#allocation7 + $0x8a8] ss:$16 sps:$4 sm:$0xff]   ;;  %v9267_v31 = vld [vmem:[#allocation7 + $0x8c4] ss:$16 sps:$4 sm:$0xff]  }
 0x31b   :  { %7437 = vmatprep.subr.bf16.mxu1 %v9186_v33  ;;  %v9270_v32 = vld [vmem:[#allocation7 + $0x8cc] ss:$16 sps:$4 sm:$0xff]   ;;  %v9265_v33 = vld [vmem:[#allocation7 + $0x8c0] ss:$16 sps:$4 sm:$0xff]  }
 0x31d   :  { %7094 = vmatpush1.bf16.msra.mxu0 %v9181_v34  ;;  %v9268_v34 = vld [vmem:[#allocation7 + $0x8c8] ss:$16 sps:$4 sm:$0xff]  }
 0x31e   :  { %7438 = vmatpush1.bf16.msra.mxu1 %v9184_v35  ;;  %7095 = vmatprep.subr.bf16.mxu0 %v9189_v36  ;;  %v9273_v35 = vld [vmem:[#allocation7 + $0x8e4] ss:$16 sps:$4 sm:$0xff]   ;;  %v9276_v36 = vld [vmem:[#allocation7 + $0x8ec] ss:$16 sps:$4 sm:$0xff]  }
 0x31f   :  { %7439 = vmatprep.subr.bf16.mxu1 %v9192_v37  ;;  %v9271_v37 = vld [vmem:[#allocation7 + $0x8e0] ss:$16 sps:$4 sm:$0xff]  }
 0x321   :  { %7096 = vmatpush1.bf16.msra.mxu0 %v9187_v38  ;;  %v9274_v38 = vld [vmem:[#allocation7 + $0x8e8] ss:$16 sps:$4 sm:$0xff]  }
 0x322   :  { %7440 = vmatpush1.bf16.msra.mxu1 %v9190_v39  ;;  %7097 = vmatprep.subr.bf16.mxu0 %v9195_v40  ;;  %v9279_v39 = vld [vmem:[#allocation7 + $0x904] ss:$16 sps:$4 sm:$0xff]   ;;  %v9282_v40 = vld [vmem:[#allocation7 + $0x90c] ss:$16 sps:$4 sm:$0xff]  }
 0x323   :  { %7441 = vmatprep.subr.bf16.mxu1 %v9198_v41  ;;  %v9277_v41 = vld [vmem:[#allocation7 + $0x900] ss:$16 sps:$4 sm:$0xff]  }
 0x325   :  { %7098 = vmatpush1.bf16.msra.mxu0 %v9193_v42  ;;  %v9280_v42 = vld [vmem:[#allocation7 + $0x908] ss:$16 sps:$4 sm:$0xff]  }
 0x326   :  { %7442 = vmatpush1.bf16.msra.mxu1 %v9196_v43  ;;  %7099 = vmatprep.subr.bf16.mxu0 %v9201_v44  ;;  %v9285_v43 = vld [vmem:[#allocation7 + $0x924] ss:$16 sps:$4 sm:$0xff]   ;;  %v9288_v44 = vld [vmem:[#allocation7 + $0x92c] ss:$16 sps:$4 sm:$0xff]  }
 0x327   :  { %7443 = vmatprep.subr.bf16.mxu1 %v9204_v3  ;;  %v9283_v3 = vld [vmem:[#allocation7 + $0x920] ss:$16 sps:$4 sm:$0xff]  }
 0x329   :  { %7100 = vmatpush1.bf16.msra.mxu0 %v9199_v45  ;;  %v9286_v45 = vld [vmem:[#allocation7 + $0x928] ss:$16 sps:$4 sm:$0xff]  }
 0x32a   :  { %7444 = vmatpush1.bf16.msra.mxu1 %v9202_v46  ;;  %7101 = vmatprep.subr.bf16.mxu0 %v9207_v47  ;;  %v9291_v46 = vld [vmem:[#allocation7 + $0x944] ss:$16 sps:$4 sm:$0xff]   ;;  %v9294_v47 = vld [vmem:[#allocation7 + $0x94c] ss:$16 sps:$4 sm:$0xff]  }
 0x32b   :  { %7445 = vmatprep.subr.bf16.mxu1 %v9210_v48  ;;  %v9289_v48 = vld [vmem:[#allocation7 + $0x940] ss:$16 sps:$4 sm:$0xff]  }
 0x32d   :  { %7102 = vmatpush1.bf16.msra.mxu0 %v9205_v53  ;;  %v9292_v53 = vld [vmem:[#allocation7 + $0x948] ss:$16 sps:$4 sm:$0xff]  }
 0x32e   :  { %7446 = vmatpush1.bf16.msra.mxu1 %v9208_v50  ;;  %7103 = vmatprep.subr.bf16.mxu0 %v9213_v49  ;;  %v9297_v50 = vld [vmem:[#allocation7 + $0x964] ss:$16 sps:$4 sm:$0xff]   ;;  %v9300_v49 = vld [vmem:[#allocation7 + $0x96c] ss:$16 sps:$4 sm:$0xff]  }
 0x32f   :  { %7447 = vmatprep.subr.bf16.mxu1 %v9216_v51  ;;  %v9295_v51 = vld [vmem:[#allocation7 + $0x960] ss:$16 sps:$4 sm:$0xff]  }
 0x331   :  { %7104 = vmatpush1.bf16.msra.mxu0 %v9211_v58  ;;  %v9298_v58 = vld [vmem:[#allocation7 + $0x968] ss:$16 sps:$4 sm:$0xff]  }
 0x332   :  { %7448 = vmatpush1.bf16.msra.mxu1 %v9214_v55  ;;  %7105 = vmatprep.subr.bf16.mxu0 %v9219_v59  ;;  %v9303_v55 = vld [vmem:[#allocation7 + $0x984] ss:$16 sps:$4 sm:$0xff]   ;;  %v9306_v59 = vld [vmem:[#allocation7 + $0x98c] ss:$16 sps:$4 sm:$0xff]  }
 0x333   :  { %7449 = vmatprep.subr.bf16.mxu1 %v9222_v15  ;;  %v9301_v15 = vld [vmem:[#allocation7 + $0x980] ss:$16 sps:$4 sm:$0xff]  }
 0x335   :  { %7106 = vmatpush1.bf16.msra.mxu0 %v9217_v61  ;;  %v9304_v61 = vld [vmem:[#allocation7 + $0x988] ss:$16 sps:$4 sm:$0xff]  }
 0x336   :  { %7450 = vmatpush1.bf16.msra.mxu1 %v9220_v62  ;;  %7107 = vmatprep.subr.bf16.mxu0 %v9225_v0  ;;  %v9309_v62 = vld [vmem:[#allocation7 + $0x9a4] ss:$16 sps:$4 sm:$0xff]   ;;  %v9312_v0 = vld [vmem:[#allocation7 + $0x9ac] ss:$16 sps:$4 sm:$0xff]  }
 0x337   :  { %7451 = vmatprep.subr.bf16.mxu1 %v9228_v1  ;;  %v9307_v1 = vld [vmem:[#allocation7 + $0x9a0] ss:$16 sps:$4 sm:$0xff]  }
 0x339   :  { %7108 = vmatpush1.bf16.msra.mxu0 %v9223_v25  ;;  %v9310_v25 = vld [vmem:[#allocation7 + $0x9a8] ss:$16 sps:$4 sm:$0xff]  }
 0x33a   :  { %7452 = vmatpush1.bf16.msra.mxu1 %v9226_v2  ;;  %7120 = vmatprep.subr.bf16.mxu0 %v9231_v5  ;;  %v9315_v2 = vld [vmem:[#allocation7 + $0x9c4] ss:$16 sps:$4 sm:$0xff]   ;;  %v9318_v5 = vld [vmem:[#allocation7 + $0x9cc] ss:$16 sps:$4 sm:$0xff]  }
 0x33b   :  { %7464 = vmatprep.subr.bf16.mxu1 %v9234_v7  ;;  %v9313_v7 = vld [vmem:[#allocation7 + $0x9c0] ss:$16 sps:$4 sm:$0xff]  }
 0x33c   :  { %7110 = vmatmul.mubr.bf16.vlgmr.msra.gmra.mrb[16].mxu0 %v9836_v52 }
 0x33d   :  { %7454 = vmatmul.mubr.bf16.vlgmr.msra.gmra.mrb[16].mxu1 %v9836_v52  ;;  %7121 = vmatpush1.bf16.msra.mxu0 %v9229_v8  ;;  %v9252_v52 = vld [vmem:[#allocation7 + $0x86c] ss:$16 sps:$4 sm:$0xff]   ;;  %v9316_v8 = vld [vmem:[#allocation7 + $0x9c8] ss:$16 sps:$4 sm:$0xff]  }
 0x33e   :  { %7152 = vmatprep.mubr.bf16.mxu0 %v9854_v57  ;;  %7465 = vmatpush1.bf16.msra.mxu1 %v9232_v9  ;;  %v9321_v9 = vld [vmem:[#allocation7 + $0x9e4] ss:$16 sps:$4 sm:$0xff]  }
 0x33f   :  { %7496 = vmatprep.mubr.bf16.mxu1 %v9854_v57  ;;  %7122 = vmatprep.subr.bf16.mxu0 %v9237_v10  ;;  %v9253_v57 = vld [vmem:[#allocation7 + $0x880] ss:$16 sps:$4 sm:$0xff]   ;;  %v9324_v10 = vld [vmem:[#allocation7 + $0x9ec] ss:$16 sps:$4 sm:$0xff]  }
 0x340   :  { %7466 = vmatprep.subr.bf16.mxu1 %v9240_v11  ;;  %v9319_v11 = vld [vmem:[#allocation7 + $0x9e0] ss:$16 sps:$4 sm:$0xff]  }
 0x341   :  { %7123 = vmatpush1.bf16.msra.mxu0 %v9235_v12  ;;  %v9322_v12 = vld [vmem:[#allocation7 + $0x9e8] ss:$16 sps:$4 sm:$0xff]  }
 0x342   :  { %7467 = vmatpush1.bf16.msra.mxu1 %v9238_v13  ;;  %7124 = vmatprep.subr.bf16.mxu0 %v9243_v28  ;;  %v9327_v13 = vld [vmem:[#allocation7 + $0xa04] ss:$16 sps:$4 sm:$0xff]   ;;  %v9330_v28 = vld [vmem:[#allocation7 + $0xa0c] ss:$16 sps:$4 sm:$0xff]  }
 0x343   :  { %7468 = vmatprep.subr.bf16.mxu1 %v9246_v14  ;;  %v9325_v14 = vld [vmem:[#allocation7 + $0xa00] ss:$16 sps:$4 sm:$0xff]  }
 0x345   :  { %7125 = vmatpush1.bf16.msra.mxu0 %v9241_v16  ;;  %v9328_v16 = vld [vmem:[#allocation7 + $0xa08] ss:$16 sps:$4 sm:$0xff]  }
 0x346   :  { %7469 = vmatpush1.bf16.msra.mxu1 %v9244_v17  ;;  %7126 = vmatprep.subr.bf16.mxu0 %v9249_v18  ;;  %v9333_v17 = vld [vmem:[#allocation7 + $0xa24] ss:$16 sps:$4 sm:$0xff]   ;;  %v9336_v18 = vld [vmem:[#allocation7 + $0xa2c] ss:$16 sps:$4 sm:$0xff]  }
 0x347   :  { %7470 = vmatprep.subr.bf16.mxu1 %v9252_v52  ;;  %v9331_v52 = vld [vmem:[#allocation7 + $0xa20] ss:$16 sps:$4 sm:$0xff]  }
 0x349   :  { %7127 = vmatpush1.bf16.msra.mxu0 %v9247_v4  ;;  %v9334_v4 = vld [vmem:[#allocation7 + $0xa28] ss:$16 sps:$4 sm:$0xff]  }
 0x34a   :  { %7471 = vmatpush1.bf16.msra.mxu1 %v9250_v19  ;;  %7128 = vmatprep.subr.bf16.mxu0 %v9255_v63  ;;  %v9339_v19 = vld [vmem:[#allocation7 + $0xa44] ss:$16 sps:$4 sm:$0xff]   ;;  %v9342_v63 = vld [vmem:[#allocation7 + $0xa4c] ss:$16 sps:$4 sm:$0xff]  }
 0x34b   :  { %7472 = vmatprep.subr.bf16.mxu1 %v9258_v20  ;;  %v9337_v20 = vld [vmem:[#allocation7 + $0xa40] ss:$16 sps:$4 sm:$0xff]  }
 0x34d   :  { %7129 = vmatpush1.bf16.msra.mxu0 %v9253_v57  ;;  %v9340_v57 = vld [vmem:[#allocation7 + $0xa48] ss:$16 sps:$4 sm:$0xff]  }
 0x34e   :  { %7473 = vmatpush1.bf16.msra.mxu1 %v9256_v21  ;;  %7130 = vmatprep.subr.bf16.mxu0 %v9261_v22  ;;  %v9345_v21 = vld [vmem:[#allocation7 + $0xa64] ss:$16 sps:$4 sm:$0xff]   ;;  %v9343_v22 = vld [vmem:[#allocation7 + $0xa60] ss:$16 sps:$4 sm:$0xff]  }
 0x34f   :  { %7474 = vmatprep.subr.bf16.mxu1 %v9264_v23  ;;  %v9346_v23 = vld [vmem:[#allocation7 + $0xa68] ss:$16 sps:$4 sm:$0xff]  }
 0x351   :  { %7131 = vmatpush1.bf16.msra.mxu0 %v9259_v24  ;;  %v9351_v24 = vld [vmem:[#allocation7 + $0xa84] ss:$16 sps:$4 sm:$0xff]  }
 0x352   :  { %7475 = vmatpush1.bf16.msra.mxu1 %v9262_v29  ;;  %7132 = vmatprep.subr.bf16.mxu0 %v9267_v31  ;;  %v9354_v29 = vld [vmem:[#allocation7 + $0xa8c] ss:$16 sps:$4 sm:$0xff]   ;;  %v9352_v31 = vld [vmem:[#allocation7 + $0xa88] ss:$16 sps:$4 sm:$0xff]  }
 0x353   :  { %7476 = vmatprep.subr.bf16.mxu1 %v9270_v32  ;;  %v9357_v32 = vld [vmem:[#allocation7 + $0xaa4] ss:$16 sps:$4 sm:$0xff]  }
 0x355   :  { %7133 = vmatpush1.bf16.msra.mxu0 %v9265_v33  ;;  %v9360_v33 = vld [vmem:[#allocation7 + $0xaac] ss:$16 sps:$4 sm:$0xff]  }
 0x356   :  { %7477 = vmatpush1.bf16.msra.mxu1 %v9268_v34  ;;  %7134 = vmatprep.subr.bf16.mxu0 %v9273_v35  ;;  %v9355_v34 = vld [vmem:[#allocation7 + $0xaa0] ss:$16 sps:$4 sm:$0xff]   ;;  %v9358_v35 = vld [vmem:[#allocation7 + $0xaa8] ss:$16 sps:$4 sm:$0xff]  }
 0x357   :  { %7478 = vmatprep.subr.bf16.mxu1 %v9276_v36  ;;  %v9363_v36 = vld [vmem:[#allocation7 + $0xac4] ss:$16 sps:$4 sm:$0xff]  }
 0x359   :  { %7135 = vmatpush1.bf16.msra.mxu0 %v9271_v37  ;;  %v9366_v37 = vld [vmem:[#allocation7 + $0xacc] ss:$16 sps:$4 sm:$0xff]  }
 0x35a   :  { %7479 = vmatpush1.bf16.msra.mxu1 %v9274_v38  ;;  %7136 = vmatprep.subr.bf16.mxu0 %v9279_v39  ;;  %v9361_v38 = vld [vmem:[#allocation7 + $0xac0] ss:$16 sps:$4 sm:$0xff]   ;;  %v9364_v39 = vld [vmem:[#allocation7 + $0xac8] ss:$16 sps:$4 sm:$0xff]  }
 0x35b   :  { %7480 = vmatprep.subr.bf16.mxu1 %v9282_v40  ;;  %v9369_v40 = vld [vmem:[#allocation7 + $0xae4] ss:$16 sps:$4 sm:$0xff]  }
 0x35d   :  { %7137 = vmatpush1.bf16.msra.mxu0 %v9277_v41  ;;  %v9372_v41 = vld [vmem:[#allocation7 + $0xaec] ss:$16 sps:$4 sm:$0xff]  }
 0x35e   :  { %7481 = vmatpush1.bf16.msra.mxu1 %v9280_v42  ;;  %7138 = vmatprep.subr.bf16.mxu0 %v9285_v43  ;;  %v9367_v42 = vld [vmem:[#allocation7 + $0xae0] ss:$16 sps:$4 sm:$0xff]   ;;  %v9370_v43 = vld [vmem:[#allocation7 + $0xae8] ss:$16 sps:$4 sm:$0xff]  }
 0x35f   :  { %7482 = vmatprep.subr.bf16.mxu1 %v9288_v44  ;;  %v9375_v44 = vld [vmem:[#allocation7 + $0xb04] ss:$16 sps:$4 sm:$0xff]  }
 0x361   :  { %7139 = vmatpush1.bf16.msra.mxu0 %v9283_v3  ;;  %v9378_v3 = vld [vmem:[#allocation7 + $0xb0c] ss:$16 sps:$4 sm:$0xff]  }
 0x362   :  { %7483 = vmatpush1.bf16.msra.mxu1 %v9286_v45  ;;  %7140 = vmatprep.subr.bf16.mxu0 %v9291_v46  ;;  %v9373_v45 = vld [vmem:[#allocation7 + $0xb00] ss:$16 sps:$4 sm:$0xff]   ;;  %v9376_v46 = vld [vmem:[#allocation7 + $0xb08] ss:$16 sps:$4 sm:$0xff]  }
 0x363   :  { %7484 = vmatprep.subr.bf16.mxu1 %v9294_v47  ;;  %v9381_v47 = vld [vmem:[#allocation7 + $0xb24] ss:$16 sps:$4 sm:$0xff]  }
 0x365   :  { %7141 = vmatpush1.bf16.msra.mxu0 %v9289_v48  ;;  %v9384_v48 = vld [vmem:[#allocation7 + $0xb2c] ss:$16 sps:$4 sm:$0xff]  }
 0x366   :  { %7485 = vmatpush1.bf16.msra.mxu1 %v9292_v53  ;;  %7142 = vmatprep.subr.bf16.mxu0 %v9297_v50  ;;  %v9379_v53 = vld [vmem:[#allocation7 + $0xb20] ss:$16 sps:$4 sm:$0xff]   ;;  %v9382_v50 = vld [vmem:[#allocation7 + $0xb28] ss:$16 sps:$4 sm:$0xff]  }
 0x367   :  { %7486 = vmatprep.subr.bf16.mxu1 %v9300_v49  ;;  %v9387_v49 = vld [vmem:[#allocation7 + $0xb44] ss:$16 sps:$4 sm:$0xff]  }
 0x369   :  { %7143 = vmatpush1.bf16.msra.mxu0 %v9295_v51  ;;  %v9390_v51 = vld [vmem:[#allocation7 + $0xb4c] ss:$16 sps:$4 sm:$0xff]  }
 0x36a   :  { %7487 = vmatpush1.bf16.msra.mxu1 %v9298_v58  ;;  %7144 = vmatprep.subr.bf16.mxu0 %v9303_v55  ;;  %v9385_v58 = vld [vmem:[#allocation7 + $0xb40] ss:$16 sps:$4 sm:$0xff]   ;;  %v9388_v55 = vld [vmem:[#allocation7 + $0xb48] ss:$16 sps:$4 sm:$0xff]  }
 0x36b   :  { %7488 = vmatprep.subr.bf16.mxu1 %v9306_v59  ;;  %v9393_v59 = vld [vmem:[#allocation7 + $0xb64] ss:$16 sps:$4 sm:$0xff]  }
 0x36d   :  { %7145 = vmatpush1.bf16.msra.mxu0 %v9301_v15  ;;  %v9396_v15 = vld [vmem:[#allocation7 + $0xb6c] ss:$16 sps:$4 sm:$0xff]  }
 0x36e   :  { %7489 = vmatpush1.bf16.msra.mxu1 %v9304_v61  ;;  %7146 = vmatprep.subr.bf16.mxu0 %v9309_v62  ;;  %v9391_v61 = vld [vmem:[#allocation7 + $0xb60] ss:$16 sps:$4 sm:$0xff]   ;;  %v9394_v62 = vld [vmem:[#allocation7 + $0xb68] ss:$16 sps:$4 sm:$0xff]  }
 0x36f   :  { %7490 = vmatprep.subr.bf16.mxu1 %v9312_v0  ;;  %v9399_v0 = vld [vmem:[#allocation7 + $0xb84] ss:$16 sps:$4 sm:$0xff]  }
 0x371   :  { %7147 = vmatpush1.bf16.msra.mxu0 %v9307_v1  ;;  %v9402_v1 = vld [vmem:[#allocation7 + $0xb8c] ss:$16 sps:$4 sm:$0xff]  }
 0x372   :  { %7491 = vmatpush1.bf16.msra.mxu1 %v9310_v25  ;;  %7148 = vmatprep.subr.bf16.mxu0 %v9315_v2  ;;  %v9397_v25 = vld [vmem:[#allocation7 + $0xb80] ss:$16 sps:$4 sm:$0xff]   ;;  %v9400_v2 = vld [vmem:[#allocation7 + $0xb88] ss:$16 sps:$4 sm:$0xff]  }
 0x373   :  { %7492 = vmatprep.subr.bf16.mxu1 %v9318_v5  ;;  %v9405_v5 = vld [vmem:[#allocation7 + $0xba4] ss:$16 sps:$4 sm:$0xff]  }
 0x375   :  { %7149 = vmatpush1.bf16.msra.mxu0 %v9313_v7  ;;  %v9408_v7 = vld [vmem:[#allocation7 + $0xbac] ss:$16 sps:$4 sm:$0xff]  }
 0x376   :  { %7493 = vmatpush1.bf16.msra.mxu1 %v9316_v8  ;;  %7150 = vmatprep.subr.bf16.mxu0 %v9321_v9  ;;  %v9403_v8 = vld [vmem:[#allocation7 + $0xba0] ss:$16 sps:$4 sm:$0xff]   ;;  %v9406_v9 = vld [vmem:[#allocation7 + $0xba8] ss:$16 sps:$4 sm:$0xff]  }
 0x377   :  { %7494 = vmatprep.subr.bf16.mxu1 %v9324_v10  ;;  %v9411_v10 = vld [vmem:[#allocation7 + $0xbc4] ss:$16 sps:$4 sm:$0xff]  }
 0x379   :  { %7151 = vmatpush1.bf16.msra.mxu0 %v9319_v11  ;;  %v9414_v11 = vld [vmem:[#allocation7 + $0xbcc] ss:$16 sps:$4 sm:$0xff]  }
 0x37a   :  { %7495 = vmatpush1.bf16.msra.mxu1 %v9322_v12  ;;  %7163 = vmatprep.subr.bf16.mxu0 %v9327_v13  ;;  %v9409_v12 = vld [vmem:[#allocation7 + $0xbc0] ss:$16 sps:$4 sm:$0xff]   ;;  %v9412_v13 = vld [vmem:[#allocation7 + $0xbc8] ss:$16 sps:$4 sm:$0xff]  }
 0x37b   :  { %7507 = vmatprep.subr.bf16.mxu1 %v9330_v28  ;;  %v9417_v28 = vld [vmem:[#allocation7 + $0xbe4] ss:$16 sps:$4 sm:$0xff]  }
 0x37c   :  { %7153 = vmatmul.mubr.bf16.vlgmr.msra.gmra.mrb[16].mxu0 %v9850_v54 }
 0x37d   :  { %7497 = vmatmul.mubr.bf16.vlgmr.msra.gmra.mrb[16].mxu1 %v9850_v54  ;;  %7164 = vmatpush1.bf16.msra.mxu0 %v9325_v14  ;;  %v9348_v54 = vld [vmem:[#allocation7 + $0xa6c] ss:$16 sps:$4 sm:$0xff]  }
 0x37e   :  { %7195 = vmatprep.mubr.bf16.mxu0 %v9856_v60  ;;  %7508 = vmatpush1.bf16.msra.mxu1 %v9328_v16  ;;  %v9420_v14 = vld [vmem:[#allocation7 + $0xbec] ss:$16 sps:$4 sm:$0xff]   ;;  %v9415_v16 = vld [vmem:[#allocation7 + $0xbe0] ss:$16 sps:$4 sm:$0xff]  }
 0x37f   :  { %7539 = vmatprep.mubr.bf16.mxu1 %v9856_v60  ;;  %7165 = vmatprep.subr.bf16.mxu0 %v9333_v17  ;;  %v9349_v60 = vld [vmem:[#allocation7 + $0xa80] ss:$16 sps:$4 sm:$0xff]   ;;  %v9418_v17 = vld [vmem:[#allocation7 + $0xbe8] ss:$16 sps:$4 sm:$0xff]  }
 0x380   :  { %7509 = vmatprep.subr.bf16.mxu1 %v9336_v18  ;;  %v9423_v18 = vld [vmem:[#allocation7 + $0xc04] ss:$16 sps:$4 sm:$0xff]  }
 0x381   :  { %7166 = vmatpush1.bf16.msra.mxu0 %v9331_v52  ;;  %v9426_v52 = vld [vmem:[#allocation7 + $0xc0c] ss:$16 sps:$4 sm:$0xff]  }
 0x382   :  { %7510 = vmatpush1.bf16.msra.mxu1 %v9334_v4  ;;  %7167 = vmatprep.subr.bf16.mxu0 %v9339_v19  ;;  %v9421_v4 = vld [vmem:[#allocation7 + $0xc00] ss:$16 sps:$4 sm:$0xff]   ;;  %v9424_v19 = vld [vmem:[#allocation7 + $0xc08] ss:$16 sps:$4 sm:$0xff]  }
 0x383   :  { %7511 = vmatprep.subr.bf16.mxu1 %v9342_v63  ;;  %v9429_v63 = vld [vmem:[#allocation7 + $0xc24] ss:$16 sps:$4 sm:$0xff]  }
 0x385   :  { %7168 = vmatpush1.bf16.msra.mxu0 %v9337_v20  ;;  %v9432_v20 = vld [vmem:[#allocation7 + $0xc2c] ss:$16 sps:$4 sm:$0xff]  }
 0x386   :  { %7512 = vmatpush1.bf16.msra.mxu1 %v9340_v57  ;;  %7169 = vmatprep.subr.bf16.mxu0 %v9345_v21  ;;  %v9427_v57 = vld [vmem:[#allocation7 + $0xc20] ss:$16 sps:$4 sm:$0xff]   ;;  %v9430_v21 = vld [vmem:[#allocation7 + $0xc28] ss:$16 sps:$4 sm:$0xff]  }
 0x387   :  { %7513 = vmatprep.subr.bf16.mxu1 %v9348_v54  ;;  %v9435_v54 = vld [vmem:[#allocation7 + $0xc44] ss:$16 sps:$4 sm:$0xff]  }
 0x389   :  { %7170 = vmatpush1.bf16.msra.mxu0 %v9343_v22  ;;  %v9438_v22 = vld [vmem:[#allocation7 + $0xc4c] ss:$16 sps:$4 sm:$0xff]  }
 0x38a   :  { %7514 = vmatpush1.bf16.msra.mxu1 %v9346_v23  ;;  %7171 = vmatprep.subr.bf16.mxu0 %v9351_v24  ;;  %v9433_v23 = vld [vmem:[#allocation7 + $0xc40] ss:$16 sps:$4 sm:$0xff]   ;;  %v9436_v24 = vld [vmem:[#allocation7 + $0xc48] ss:$16 sps:$4 sm:$0xff]  }
 0x38b   :  { %7515 = vmatprep.subr.bf16.mxu1 %v9354_v29  ;;  %v9441_v29 = vld [vmem:[#allocation7 + $0xc64] ss:$16 sps:$4 sm:$0xff]  }
 0x38d   :  { %7172 = vmatpush1.bf16.msra.mxu0 %v9349_v60  ;;  %v9439_v60 = vld [vmem:[#allocation7 + $0xc60] ss:$16 sps:$4 sm:$0xff]  }
 0x38e   :  { %7516 = vmatpush1.bf16.msra.mxu1 %v9352_v31  ;;  %7173 = vmatprep.subr.bf16.mxu0 %v9357_v32  ;;  %v9442_v31 = vld [vmem:[#allocation7 + $0xc68] ss:$16 sps:$4 sm:$0xff]   ;;  %v9447_v32 = vld [vmem:[#allocation7 + $0xc84] ss:$16 sps:$4 sm:$0xff]  }
 0x38f   :  { %7517 = vmatprep.subr.bf16.mxu1 %v9360_v33  ;;  %v9450_v33 = vld [vmem:[#allocation7 + $0xc8c] ss:$16 sps:$4 sm:$0xff]  }
 0x391   :  { %7174 = vmatpush1.bf16.msra.mxu0 %v9355_v34  ;;  %v9448_v34 = vld [vmem:[#allocation7 + $0xc88] ss:$16 sps:$4 sm:$0xff]  }
 0x392   :  { %7518 = vmatpush1.bf16.msra.mxu1 %v9358_v35  ;;  %7175 = vmatprep.subr.bf16.mxu0 %v9363_v36  ;;  %v9453_v35 = vld [vmem:[#allocation7 + $0xca4] ss:$16 sps:$4 sm:$0xff]   ;;  %v9456_v36 = vld [vmem:[#allocation7 + $0xcac] ss:$16 sps:$4 sm:$0xff]  }
 0x393   :  { %7519 = vmatprep.subr.bf16.mxu1 %v9366_v37  ;;  %v9451_v37 = vld [vmem:[#allocation7 + $0xca0] ss:$16 sps:$4 sm:$0xff]  }
 0x395   :  { %7176 = vmatpush1.bf16.msra.mxu0 %v9361_v38  ;;  %v9454_v38 = vld [vmem:[#allocation7 + $0xca8] ss:$16 sps:$4 sm:$0xff]  }
 0x396   :  { %7520 = vmatpush1.bf16.msra.mxu1 %v9364_v39  ;;  %7177 = vmatprep.subr.bf16.mxu0 %v9369_v40  ;;  %v9459_v39 = vld [vmem:[#allocation7 + $0xcc4] ss:$16 sps:$4 sm:$0xff]   ;;  %v9462_v40 = vld [vmem:[#allocation7 + $0xccc] ss:$16 sps:$4 sm:$0xff]  }
 0x397   :  { %7521 = vmatprep.subr.bf16.mxu1 %v9372_v41  ;;  %v9457_v41 = vld [vmem:[#allocation7 + $0xcc0] ss:$16 sps:$4 sm:$0xff]  }
 0x399   :  { %7178 = vmatpush1.bf16.msra.mxu0 %v9367_v42  ;;  %v9460_v42 = vld [vmem:[#allocation7 + $0xcc8] ss:$16 sps:$4 sm:$0xff]  }
 0x39a   :  { %7522 = vmatpush1.bf16.msra.mxu1 %v9370_v43  ;;  %7179 = vmatprep.subr.bf16.mxu0 %v9375_v44  ;;  %v9465_v43 = vld [vmem:[#allocation7 + $0xce4] ss:$16 sps:$4 sm:$0xff]   ;;  %v9468_v44 = vld [vmem:[#allocation7 + $0xcec] ss:$16 sps:$4 sm:$0xff]  }
 0x39b   :  { %7523 = vmatprep.subr.bf16.mxu1 %v9378_v3  ;;  %v9463_v3 = vld [vmem:[#allocation7 + $0xce0] ss:$16 sps:$4 sm:$0xff]  }
 0x39d   :  { %7180 = vmatpush1.bf16.msra.mxu0 %v9373_v45  ;;  %v9466_v45 = vld [vmem:[#allocation7 + $0xce8] ss:$16 sps:$4 sm:$0xff]  }
 0x39e   :  { %7524 = vmatpush1.bf16.msra.mxu1 %v9376_v46  ;;  %7181 = vmatprep.subr.bf16.mxu0 %v9381_v47  ;;  %v9471_v46 = vld [vmem:[#allocation7 + $0xd04] ss:$16 sps:$4 sm:$0xff]   ;;  %v9474_v47 = vld [vmem:[#allocation7 + $0xd0c] ss:$16 sps:$4 sm:$0xff]  }
 0x39f   :  { %7525 = vmatprep.subr.bf16.mxu1 %v9384_v48  ;;  %v9469_v48 = vld [vmem:[#allocation7 + $0xd00] ss:$16 sps:$4 sm:$0xff]  }
 0x3a1   :  { %7182 = vmatpush1.bf16.msra.mxu0 %v9379_v53  ;;  %v9472_v53 = vld [vmem:[#allocation7 + $0xd08] ss:$16 sps:$4 sm:$0xff]  }
 0x3a2   :  { %7526 = vmatpush1.bf16.msra.mxu1 %v9382_v50  ;;  %7183 = vmatprep.subr.bf16.mxu0 %v9387_v49  ;;  %v9477_v50 = vld [vmem:[#allocation7 + $0xd24] ss:$16 sps:$4 sm:$0xff]   ;;  %v9480_v49 = vld [vmem:[#allocation7 + $0xd2c] ss:$16 sps:$4 sm:$0xff]  }
 0x3a3   :  { %7527 = vmatprep.subr.bf16.mxu1 %v9390_v51  ;;  %v9475_v51 = vld [vmem:[#allocation7 + $0xd20] ss:$16 sps:$4 sm:$0xff]  }
 0x3a5   :  { %7184 = vmatpush1.bf16.msra.mxu0 %v9385_v58  ;;  %v9478_v58 = vld [vmem:[#allocation7 + $0xd28] ss:$16 sps:$4 sm:$0xff]  }
 0x3a6   :  { %7528 = vmatpush1.bf16.msra.mxu1 %v9388_v55  ;;  %7185 = vmatprep.subr.bf16.mxu0 %v9393_v59  ;;  %v9483_v55 = vld [vmem:[#allocation7 + $0xd44] ss:$16 sps:$4 sm:$0xff]   ;;  %v9486_v59 = vld [vmem:[#allocation7 + $0xd4c] ss:$16 sps:$4 sm:$0xff]  }
 0x3a7   :  { %7529 = vmatprep.subr.bf16.mxu1 %v9396_v15  ;;  %v9481_v15 = vld [vmem:[#allocation7 + $0xd40] ss:$16 sps:$4 sm:$0xff]  }
 0x3a9   :  { %7186 = vmatpush1.bf16.msra.mxu0 %v9391_v61  ;;  %v9484_v61 = vld [vmem:[#allocation7 + $0xd48] ss:$16 sps:$4 sm:$0xff]  }
 0x3aa   :  { %7530 = vmatpush1.bf16.msra.mxu1 %v9394_v62  ;;  %7187 = vmatprep.subr.bf16.mxu0 %v9399_v0  ;;  %v9489_v62 = vld [vmem:[#allocation7 + $0xd64] ss:$16 sps:$4 sm:$0xff]   ;;  %v9492_v0 = vld [vmem:[#allocation7 + $0xd6c] ss:$16 sps:$4 sm:$0xff]  }
 0x3ab   :  { %7531 = vmatprep.subr.bf16.mxu1 %v9402_v1  ;;  %v9487_v1 = vld [vmem:[#allocation7 + $0xd60] ss:$16 sps:$4 sm:$0xff]  }
 0x3ad   :  { %7188 = vmatpush1.bf16.msra.mxu0 %v9397_v25  ;;  %v9490_v25 = vld [vmem:[#allocation7 + $0xd68] ss:$16 sps:$4 sm:$0xff]  }
 0x3ae   :  { %7532 = vmatpush1.bf16.msra.mxu1 %v9400_v2  ;;  %7189 = vmatprep.subr.bf16.mxu0 %v9405_v5  ;;  %v9495_v2 = vld [vmem:[#allocation7 + $0xd84] ss:$16 sps:$4 sm:$0xff]   ;;  %v9498_v5 = vld [vmem:[#allocation7 + $0xd8c] ss:$16 sps:$4 sm:$0xff]  }
 0x3af   :  { %7533 = vmatprep.subr.bf16.mxu1 %v9408_v7  ;;  %v9493_v7 = vld [vmem:[#allocation7 + $0xd80] ss:$16 sps:$4 sm:$0xff]  }
 0x3b1   :  { %7190 = vmatpush1.bf16.msra.mxu0 %v9403_v8  ;;  %v9496_v8 = vld [vmem:[#allocation7 + $0xd88] ss:$16 sps:$4 sm:$0xff]  }
 0x3b2   :  { %7534 = vmatpush1.bf16.msra.mxu1 %v9406_v9  ;;  %7191 = vmatprep.subr.bf16.mxu0 %v9411_v10  ;;  %v9501_v9 = vld [vmem:[#allocation7 + $0xda4] ss:$16 sps:$4 sm:$0xff]   ;;  %v9504_v10 = vld [vmem:[#allocation7 + $0xdac] ss:$16 sps:$4 sm:$0xff]  }
 0x3b3   :  { %7535 = vmatprep.subr.bf16.mxu1 %v9414_v11  ;;  %v9499_v11 = vld [vmem:[#allocation7 + $0xda0] ss:$16 sps:$4 sm:$0xff]  }
 0x3b5   :  { %7192 = vmatpush1.bf16.msra.mxu0 %v9409_v12  ;;  %v9502_v12 = vld [vmem:[#allocation7 + $0xda8] ss:$16 sps:$4 sm:$0xff]  }
 0x3b6   :  { %7536 = vmatpush1.bf16.msra.mxu1 %v9412_v13  ;;  %7193 = vmatprep.subr.bf16.mxu0 %v9417_v28  ;;  %v9507_v13 = vld [vmem:[#allocation7 + $0xdc4] ss:$16 sps:$4 sm:$0xff]   ;;  %v9510_v28 = vld [vmem:[#allocation7 + $0xdcc] ss:$16 sps:$4 sm:$0xff]  }
 0x3b7   :  { %7537 = vmatprep.subr.bf16.mxu1 %v9420_v14  ;;  %v9505_v14 = vld [vmem:[#allocation7 + $0xdc0] ss:$16 sps:$4 sm:$0xff]  }
 0x3b9   :  { %7194 = vmatpush1.bf16.msra.mxu0 %v9415_v16  ;;  %v9508_v16 = vld [vmem:[#allocation7 + $0xdc8] ss:$16 sps:$4 sm:$0xff]  }
 0x3ba   :  { %7538 = vmatpush1.bf16.msra.mxu1 %v9418_v17  ;;  %7206 = vmatprep.subr.bf16.mxu0 %v9423_v18  ;;  %v9513_v17 = vld [vmem:[#allocation7 + $0xde4] ss:$16 sps:$4 sm:$0xff]   ;;  %v9516_v18 = vld [vmem:[#allocation7 + $0xdec] ss:$16 sps:$4 sm:$0xff]  }
 0x3bb   :  { %7550 = vmatprep.subr.bf16.mxu1 %v9426_v52  ;;  %v9511_v52 = vld [vmem:[#allocation7 + $0xde0] ss:$16 sps:$4 sm:$0xff]  }
 0x3bc   :  { %7196 = vmatmul.mubr.bf16.vlgmr.msra.gmra.mrb[16].mxu0 %v9852_v56 }
 0x3bd   :  { %7540 = vmatmul.mubr.bf16.vlgmr.msra.gmra.mrb[16].mxu1 %v9852_v56  ;;  %7207 = vmatpush1.bf16.msra.mxu0 %v9421_v4  ;;  %v9444_v56 = vld [vmem:[#allocation7 + $0xc6c] ss:$16 sps:$4 sm:$0xff]   ;;  %v9514_v4 = vld [vmem:[#allocation7 + $0xde8] ss:$16 sps:$4 sm:$0xff]  }
 0x3be   :  { %7238 = vmatprep.mubr.bf16.mxu0 %v9870_v27  ;;  %7551 = vmatpush1.bf16.msra.mxu1 %v9424_v19  ;;  %v9519_v19 = vld [vmem:[#allocation7 + $0xe04] ss:$16 sps:$4 sm:$0xff]  }
 0x3bf   :  { %7582 = vmatprep.mubr.bf16.mxu1 %v9870_v27  ;;  %7208 = vmatprep.subr.bf16.mxu0 %v9429_v63  ;;  %v9445_v27 = vld [vmem:[#allocation7 + $0xc80] ss:$16 sps:$4 sm:$0xff]   ;;  %v9522_v63 = vld [vmem:[#allocation7 + $0xe0c] ss:$16 sps:$4 sm:$0xff]  }
 0x3c0   :  { %7552 = vmatprep.subr.bf16.mxu1 %v9432_v20  ;;  %v9517_v20 = vld [vmem:[#allocation7 + $0xe00] ss:$16 sps:$4 sm:$0xff]  }
 0x3c1   :  { %7209 = vmatpush1.bf16.msra.mxu0 %v9427_v57  ;;  %v9520_v57 = vld [vmem:[#allocation7 + $0xe08] ss:$16 sps:$4 sm:$0xff]  }
 0x3c2   :  { %7553 = vmatpush1.bf16.msra.mxu1 %v9430_v21  ;;  %7210 = vmatprep.subr.bf16.mxu0 %v9435_v54  ;;  %v9525_v21 = vld [vmem:[#allocation7 + $0xe24] ss:$16 sps:$4 sm:$0xff]   ;;  %v9528_v54 = vld [vmem:[#allocation7 + $0xe2c] ss:$16 sps:$4 sm:$0xff]  }
 0x3c3   :  { %7554 = vmatprep.subr.bf16.mxu1 %v9438_v22  ;;  %v9523_v22 = vld [vmem:[#allocation7 + $0xe20] ss:$16 sps:$4 sm:$0xff]  }
 0x3c5   :  { %7211 = vmatpush1.bf16.msra.mxu0 %v9433_v23  ;;  %v9526_v23 = vld [vmem:[#allocation7 + $0xe28] ss:$16 sps:$4 sm:$0xff]  }
 0x3c6   :  { %7555 = vmatpush1.bf16.msra.mxu1 %v9436_v24  ;;  %7212 = vmatprep.subr.bf16.mxu0 %v9441_v29  ;;  %v9531_v24 = vld [vmem:[#allocation7 + $0xe44] ss:$16 sps:$4 sm:$0xff]   ;;  %v9534_v29 = vld [vmem:[#allocation7 + $0xe4c] ss:$16 sps:$4 sm:$0xff]  }
 0x3c7   :  { %7556 = vmatprep.subr.bf16.mxu1 %v9444_v56  ;;  %v9529_v56 = vld [vmem:[#allocation7 + $0xe40] ss:$16 sps:$4 sm:$0xff]  }
 0x3c9   :  { %7213 = vmatpush1.bf16.msra.mxu0 %v9439_v60  ;;  %v9532_v60 = vld [vmem:[#allocation7 + $0xe48] ss:$16 sps:$4 sm:$0xff]  }
 0x3ca   :  { %7557 = vmatpush1.bf16.msra.mxu1 %v9442_v31  ;;  %7214 = vmatprep.subr.bf16.mxu0 %v9447_v32  ;;  %v9537_v31 = vld [vmem:[#allocation7 + $0xe64] ss:$16 sps:$4 sm:$0xff]   ;;  %v9535_v32 = vld [vmem:[#allocation7 + $0xe60] ss:$16 sps:$4 sm:$0xff]  }
 0x3cb   :  { %7558 = vmatprep.subr.bf16.mxu1 %v9450_v33  ;;  %v9538_v33 = vld [vmem:[#allocation7 + $0xe68] ss:$16 sps:$4 sm:$0xff]  }
 0x3cd   :  { %7215 = vmatpush1.bf16.msra.mxu0 %v9445_v27  ;;  %v9543_v27 = vld [vmem:[#allocation7 + $0xe84] ss:$16 sps:$4 sm:$0xff]  }
 0x3ce   :  { %7559 = vmatpush1.bf16.msra.mxu1 %v9448_v34  ;;  %7216 = vmatprep.subr.bf16.mxu0 %v9453_v35  ;;  %v9546_v34 = vld [vmem:[#allocation7 + $0xe8c] ss:$16 sps:$4 sm:$0xff]   ;;  %v9544_v35 = vld [vmem:[#allocation7 + $0xe88] ss:$16 sps:$4 sm:$0xff]  }
 0x3cf   :  { %7560 = vmatprep.subr.bf16.mxu1 %v9456_v36  ;;  %v9549_v36 = vld [vmem:[#allocation7 + $0xea4] ss:$16 sps:$4 sm:$0xff]  }
 0x3d1   :  { %7217 = vmatpush1.bf16.msra.mxu0 %v9451_v37  ;;  %v9552_v37 = vld [vmem:[#allocation7 + $0xeac] ss:$16 sps:$4 sm:$0xff]  }
 0x3d2   :  { %7561 = vmatpush1.bf16.msra.mxu1 %v9454_v38  ;;  %7218 = vmatprep.subr.bf16.mxu0 %v9459_v39  ;;  %v9547_v38 = vld [vmem:[#allocation7 + $0xea0] ss:$16 sps:$4 sm:$0xff]   ;;  %v9550_v39 = vld [vmem:[#allocation7 + $0xea8] ss:$16 sps:$4 sm:$0xff]  }
 0x3d3   :  { %7562 = vmatprep.subr.bf16.mxu1 %v9462_v40  ;;  %v9555_v40 = vld [vmem:[#allocation7 + $0xec4] ss:$16 sps:$4 sm:$0xff]  }
 0x3d5   :  { %7219 = vmatpush1.bf16.msra.mxu0 %v9457_v41  ;;  %v9558_v41 = vld [vmem:[#allocation7 + $0xecc] ss:$16 sps:$4 sm:$0xff]  }
 0x3d6   :  { %7563 = vmatpush1.bf16.msra.mxu1 %v9460_v42  ;;  %7220 = vmatprep.subr.bf16.mxu0 %v9465_v43  ;;  %v9553_v42 = vld [vmem:[#allocation7 + $0xec0] ss:$16 sps:$4 sm:$0xff]   ;;  %v9556_v43 = vld [vmem:[#allocation7 + $0xec8] ss:$16 sps:$4 sm:$0xff]  }
 0x3d7   :  { %7564 = vmatprep.subr.bf16.mxu1 %v9468_v44  ;;  %v9561_v44 = vld [vmem:[#allocation7 + $0xee4] ss:$16 sps:$4 sm:$0xff]  }
 0x3d9   :  { %7221 = vmatpush1.bf16.msra.mxu0 %v9463_v3  ;;  %v9564_v3 = vld [vmem:[#allocation7 + $0xeec] ss:$16 sps:$4 sm:$0xff]  }
 0x3da   :  { %7565 = vmatpush1.bf16.msra.mxu1 %v9466_v45  ;;  %7222 = vmatprep.subr.bf16.mxu0 %v9471_v46  ;;  %v9559_v45 = vld [vmem:[#allocation7 + $0xee0] ss:$16 sps:$4 sm:$0xff]   ;;  %v9562_v46 = vld [vmem:[#allocation7 + $0xee8] ss:$16 sps:$4 sm:$0xff]  }
 0x3db   :  { %7566 = vmatprep.subr.bf16.mxu1 %v9474_v47  ;;  %v9567_v47 = vld [vmem:[#allocation7 + $0xf04] ss:$16 sps:$4 sm:$0xff]  }
 0x3dd   :  { %7223 = vmatpush1.bf16.msra.mxu0 %v9469_v48  ;;  %v9570_v48 = vld [vmem:[#allocation7 + $0xf0c] ss:$16 sps:$4 sm:$0xff]  }
 0x3de   :  { %7567 = vmatpush1.bf16.msra.mxu1 %v9472_v53  ;;  %7224 = vmatprep.subr.bf16.mxu0 %v9477_v50  ;;  %v9565_v53 = vld [vmem:[#allocation7 + $0xf00] ss:$16 sps:$4 sm:$0xff]   ;;  %v9568_v50 = vld [vmem:[#allocation7 + $0xf08] ss:$16 sps:$4 sm:$0xff]  }
 0x3df   :  { %7568 = vmatprep.subr.bf16.mxu1 %v9480_v49  ;;  %v9573_v49 = vld [vmem:[#allocation7 + $0xf24] ss:$16 sps:$4 sm:$0xff]  }
 0x3e1   :  { %7225 = vmatpush1.bf16.msra.mxu0 %v9475_v51  ;;  %v9576_v51 = vld [vmem:[#allocation7 + $0xf2c] ss:$16 sps:$4 sm:$0xff]  }
 0x3e2   :  { %7569 = vmatpush1.bf16.msra.mxu1 %v9478_v58  ;;  %7226 = vmatprep.subr.bf16.mxu0 %v9483_v55  ;;  %v9571_v58 = vld [vmem:[#allocation7 + $0xf20] ss:$16 sps:$4 sm:$0xff]   ;;  %v9574_v55 = vld [vmem:[#allocation7 + $0xf28] ss:$16 sps:$4 sm:$0xff]  }
 0x3e3   :  { %7570 = vmatprep.subr.bf16.mxu1 %v9486_v59  ;;  %v9579_v59 = vld [vmem:[#allocation7 + $0xf44] ss:$16 sps:$4 sm:$0xff]  }
 0x3e5   :  { %7227 = vmatpush1.bf16.msra.mxu0 %v9481_v15  ;;  %v9582_v15 = vld [vmem:[#allocation7 + $0xf4c] ss:$16 sps:$4 sm:$0xff]  }
 0x3e6   :  { %7571 = vmatpush1.bf16.msra.mxu1 %v9484_v61  ;;  %7228 = vmatprep.subr.bf16.mxu0 %v9489_v62  ;;  %v9577_v61 = vld [vmem:[#allocation7 + $0xf40] ss:$16 sps:$4 sm:$0xff]   ;;  %v9580_v62 = vld [vmem:[#allocation7 + $0xf48] ss:$16 sps:$4 sm:$0xff]  }
 0x3e7   :  { %7572 = vmatprep.subr.bf16.mxu1 %v9492_v0  ;;  %v9585_v0 = vld [vmem:[#allocation7 + $0xf64] ss:$16 sps:$4 sm:$0xff]  }
 0x3e9   :  { %7229 = vmatpush1.bf16.msra.mxu0 %v9487_v1  ;;  %v9588_v1 = vld [vmem:[#allocation7 + $0xf6c] ss:$16 sps:$4 sm:$0xff]  }
 0x3ea   :  { %7573 = vmatpush1.bf16.msra.mxu1 %v9490_v25  ;;  %7230 = vmatprep.subr.bf16.mxu0 %v9495_v2  ;;  %v9583_v25 = vld [vmem:[#allocation7 + $0xf60] ss:$16 sps:$4 sm:$0xff]   ;;  %v9586_v2 = vld [vmem:[#allocation7 + $0xf68] ss:$16 sps:$4 sm:$0xff]  }
 0x3eb   :  { %7574 = vmatprep.subr.bf16.mxu1 %v9498_v5  ;;  %v9591_v5 = vld [vmem:[#allocation7 + $0xf84] ss:$16 sps:$4 sm:$0xff]  }
 0x3ed   :  { %7231 = vmatpush1.bf16.msra.mxu0 %v9493_v7  ;;  %v9594_v7 = vld [vmem:[#allocation7 + $0xf8c] ss:$16 sps:$4 sm:$0xff]  }
 0x3ee   :  { %7575 = vmatpush1.bf16.msra.mxu1 %v9496_v8  ;;  %7232 = vmatprep.subr.bf16.mxu0 %v9501_v9  ;;  %v9589_v8 = vld [vmem:[#allocation7 + $0xf80] ss:$16 sps:$4 sm:$0xff]   ;;  %v9592_v9 = vld [vmem:[#allocation7 + $0xf88] ss:$16 sps:$4 sm:$0xff]  }
 0x3ef   :  { %7576 = vmatprep.subr.bf16.mxu1 %v9504_v10  ;;  %v9597_v10 = vld [vmem:[#allocation7 + $0xfa4] ss:$16 sps:$4 sm:$0xff]  }
 0x3f1   :  { %7233 = vmatpush1.bf16.msra.mxu0 %v9499_v11  ;;  %v9600_v11 = vld [vmem:[#allocation7 + $0xfac] ss:$16 sps:$4 sm:$0xff]  }
 0x3f2   :  { %7577 = vmatpush1.bf16.msra.mxu1 %v9502_v12  ;;  %7234 = vmatprep.subr.bf16.mxu0 %v9507_v13  ;;  %v9595_v12 = vld [vmem:[#allocation7 + $0xfa0] ss:$16 sps:$4 sm:$0xff]   ;;  %v9598_v13 = vld [vmem:[#allocation7 + $0xfa8] ss:$16 sps:$4 sm:$0xff]  }
 0x3f3   :  { %7578 = vmatprep.subr.bf16.mxu1 %v9510_v28  ;;  %v9603_v28 = vld [vmem:[#allocation7 + $0xfc4] ss:$16 sps:$4 sm:$0xff]  }
 0x3f5   :  { %7235 = vmatpush1.bf16.msra.mxu0 %v9505_v14  ;;  %v9606_v14 = vld [vmem:[#allocation7 + $0xfcc] ss:$16 sps:$4 sm:$0xff]  }
 0x3f6   :  { %7579 = vmatpush1.bf16.msra.mxu1 %v9508_v16  ;;  %7236 = vmatprep.subr.bf16.mxu0 %v9513_v17  ;;  %v9601_v16 = vld [vmem:[#allocation7 + $0xfc0] ss:$16 sps:$4 sm:$0xff]   ;;  %v9604_v17 = vld [vmem:[#allocation7 + $0xfc8] ss:$16 sps:$4 sm:$0xff]  }
 0x3f7   :  { %7580 = vmatprep.subr.bf16.mxu1 %v9516_v18  ;;  %v9609_v18 = vld [vmem:[#allocation7 + $0xfe4] ss:$16 sps:$4 sm:$0xff]  }
 0x3f9   :  { %7237 = vmatpush1.bf16.msra.mxu0 %v9511_v52  ;;  %v9612_v52 = vld [vmem:[#allocation7 + $0xfec] ss:$16 sps:$4 sm:$0xff]  }
 0x3fa   :  { %7581 = vmatpush1.bf16.msra.mxu1 %v9514_v4  ;;  %7249 = vmatprep.subr.bf16.mxu0 %v9519_v19  ;;  %v9607_v4 = vld [vmem:[#allocation7 + $0xfe0] ss:$16 sps:$4 sm:$0xff]   ;;  %v9610_v19 = vld [vmem:[#allocation7 + $0xfe8] ss:$16 sps:$4 sm:$0xff]  }
 0x3fb   :  { %7593 = vmatprep.subr.bf16.mxu1 %v9522_v63 }
 0x3fc   :  { %7239 = vmatmul.mubr.bf16.vlgmr.msra.gmra.mrb[16].mxu0 %v9866_v6 }
 0x3fd   :  { %7583 = vmatmul.mubr.bf16.vlgmr.msra.gmra.mrb[16].mxu1 %v9866_v6  ;;  %7250 = vmatpush1.bf16.msra.mxu0 %v9517_v20  ;;  %v9540_v6 = vld [vmem:[#allocation7 + $0xe6c] ss:$16 sps:$4 sm:$0xff]   ;;  %v9617_v20 = vld [vmem:[#allocation2] sm:$0xff] }
 0x3fe   :  { %7281 = vmatprep.mubr.bf16.mxu0 %v9872_v30  ;;  %7594 = vmatpush1.bf16.msra.mxu1 %v9520_v57 }
 0x3ff   :  { %7625 = vmatprep.mubr.bf16.mxu1 %v9872_v30  ;;  %7251 = vmatprep.subr.bf16.mxu0 %v9525_v21  ;;  %v9541_v30 = vld [vmem:[#allocation7 + $0xe80] ss:$16 sps:$4 sm:$0xff]  }
 0x400   :  { %7595 = vmatprep.subr.bf16.mxu1 %v9528_v54 }
 0x401   :  { %7252 = vmatpush1.bf16.msra.mxu0 %v9523_v22  ;;  %v9618_v22 = vld [vmem:[#allocation2 + $0x8] sm:$0xff] }
 0x402   :  { %7596 = vmatpush1.bf16.msra.mxu1 %v9526_v23  ;;  %7253 = vmatprep.subr.bf16.mxu0 %v9531_v24 }
 0x403   :  { %7597 = vmatprep.subr.bf16.mxu1 %v9534_v29 }
 0x405   :  { %7254 = vmatpush1.bf16.msra.mxu0 %v9529_v56  ;;  %v9619_v56 = vld [vmem:[#allocation2 + $0x20] sm:$0xff] }
 0x406   :  { %7598 = vmatpush1.bf16.msra.mxu1 %v9532_v60  ;;  %7255 = vmatprep.subr.bf16.mxu0 %v9537_v31 }
 0x407   :  { %7599 = vmatprep.subr.bf16.mxu1 %v9540_v6 }
 0x409   :  { %7256 = vmatpush1.bf16.msra.mxu0 %v9535_v32  ;;  %v9620_v32 = vld [vmem:[#allocation2 + $0x10] sm:$0xff] }
 0x40a   :  { %7600 = vmatpush1.bf16.msra.mxu1 %v9538_v33  ;;  %7257 = vmatprep.subr.bf16.mxu0 %v9543_v27 }
 0x40b   :  { %7601 = vmatprep.subr.bf16.mxu1 %v9546_v34  ;;  %v9621_v34 = vld [vmem:[#allocation2 + $0x28] sm:$0xff] }
 0x40d   :  { %7258 = vmatpush1.bf16.msra.mxu0 %v9541_v30 }
 0x40e   :  { %7602 = vmatpush1.bf16.msra.mxu1 %v9544_v35  ;;  %7259 = vmatprep.subr.bf16.mxu0 %v9549_v36 }
 0x40f   :  { %7603 = vmatprep.subr.bf16.mxu1 %v9552_v37  ;;  %v9623_v37 = vld [vmem:[#allocation2 + $0x30] sm:$0xff] }
 0x411   :  { %7260 = vmatpush1.bf16.msra.mxu0 %v9547_v38 }
 0x412   :  { %7604 = vmatpush1.bf16.msra.mxu1 %v9550_v39  ;;  %7261 = vmatprep.subr.bf16.mxu0 %v9555_v40 }
 0x413   :  { %7605 = vmatprep.subr.bf16.mxu1 %v9558_v41 }
 0x415   :  { %7262 = vmatpush1.bf16.msra.mxu0 %v9553_v42 }
 0x416   :  { %7606 = vmatpush1.bf16.msra.mxu1 %v9556_v43  ;;  %7263 = vmatprep.subr.bf16.mxu0 %v9561_v44  ;;  %v9624_v43 = vld [vmem:[#allocation2 + $0x38] sm:$0xff] }
 0x417   :  { %7607 = vmatprep.subr.bf16.mxu1 %v9564_v3 }
 0x419   :  { %7264 = vmatpush1.bf16.msra.mxu0 %v9559_v45 }
 0x41a   :  { %7608 = vmatpush1.bf16.msra.mxu1 %v9562_v46  ;;  %7265 = vmatprep.subr.bf16.mxu0 %v9567_v47 }
 0x41b   :  { %7609 = vmatprep.subr.bf16.mxu1 %v9570_v48 }
 0x41d   :  { %7266 = vmatpush1.bf16.msra.mxu0 %v9565_v53 }
 0x41e   :  { %7610 = vmatpush1.bf16.msra.mxu1 %v9568_v50  ;;  %7267 = vmatprep.subr.bf16.mxu0 %v9573_v49 }
 0x41f   :  { %7611 = vmatprep.subr.bf16.mxu1 %v9576_v51 }
 0x421   :  { %7268 = vmatpush1.bf16.msra.mxu0 %v9571_v58 }
 0x422   :  { %7612 = vmatpush1.bf16.msra.mxu1 %v9574_v55  ;;  %7269 = vmatprep.subr.bf16.mxu0 %v9579_v59 }
 0x423   :  { %7613 = vmatprep.subr.bf16.mxu1 %v9582_v15 }
 0x425   :  { %7270 = vmatpush1.bf16.msra.mxu0 %v9577_v61 }
 0x426   :  { %7614 = vmatpush1.bf16.msra.mxu1 %v9580_v62  ;;  %7271 = vmatprep.subr.bf16.mxu0 %v9585_v0 }
 0x427   :  { %7615 = vmatprep.subr.bf16.mxu1 %v9588_v1 }
 0x429   :  { %7272 = vmatpush1.bf16.msra.mxu0 %v9583_v25 }
 0x42a   :  { %7616 = vmatpush1.bf16.msra.mxu1 %v9586_v2  ;;  %7273 = vmatprep.subr.bf16.mxu0 %v9591_v5 }
 0x42b   :  { %7617 = vmatprep.subr.bf16.mxu1 %v9594_v7 }
 0x42d   :  { %7274 = vmatpush1.bf16.msra.mxu0 %v9589_v8 }
 0x42e   :  { %7618 = vmatpush1.bf16.msra.mxu1 %v9592_v9  ;;  %7275 = vmatprep.subr.bf16.mxu0 %v9597_v10 }
 0x42f   :  { %7619 = vmatprep.subr.bf16.mxu1 %v9600_v11 }
 0x431   :  { %7276 = vmatpush1.bf16.msra.mxu0 %v9595_v12 }
 0x432   :  { %7620 = vmatpush1.bf16.msra.mxu1 %v9598_v13  ;;  %7277 = vmatprep.subr.bf16.mxu0 %v9603_v28 }
 0x433   :  { %7621 = vmatprep.subr.bf16.mxu1 %v9606_v14 }
 0x435   :  { %7278 = vmatpush1.bf16.msra.mxu0 %v9601_v16 }
 0x436   :  { %7622 = vmatpush1.bf16.msra.mxu1 %v9604_v17  ;;  %7279 = vmatprep.subr.bf16.mxu0 %v9609_v18 }
 0x437   :  { %7623 = vmatprep.subr.bf16.mxu1 %v9612_v52 }
 0x439   :  { %7280 = vmatpush1.bf16.msra.mxu0 %v9607_v4 }
 0x43a   :  { %7624 = vmatpush1.bf16.msra.mxu1 %v9610_v19 }
 0x43c   :  { %7282 = vmatmul.mubr.bf16.vlgmr.msra.gmra.mrb[16].mxu0 %v9868_v26 }
 0x43d   :  { %7626 = vmatmul.mubr.bf16.vlgmr.msra.gmra.mrb[16].mxu1 %v9868_v26  ;;  %v9622_v26 = vld [vmem:[#allocation2 + $0x18] sm:$0xff] }
 0x50f   :  { %v7283_v63 = vpop.f32.mrb[16].mxu0 }
 0x510   :  { %v8739_v57 = vadd.f32 %v9617_v20, %v7283_v63  ;;  %v7627_v21 = vpop.f32.mrb[16].mxu1  ;;  %v7285_v54 = vpop.f32.mrb[17].mxu0 }
 0x511   :  { %v8740_v23 = vadd.f32 %v9618_v22, %v7285_v54  ;;  %v7629_v24 = vpop.f32.mrb[17].mxu1  ;;  %v7287_v29 = vpop.f32.mrb[18].mxu0  ;;  %v8743_v33 = vadd.f32 %v9620_v32, %v7627_v21 }
 0x512   :  { %v8741_v60 = vadd.f32 %v9619_v56, %v7287_v29  ;;  %v7631_v31 = vpop.f32.mrb[18].mxu1  ;;  %v7289_v6 = vpop.f32.mrb[19].mxu0  ;;  %v8744_v36 = vadd.f32 %v9622_v26, %v7629_v24 }
 0x513   :  { %v7636_v27 = vadd.f32 %v8740_v23, %v8739_v57  ;;  %v8742_v30 = vadd.f32 %v9621_v34, %v7289_v6  ;;  %v7633_v35 = vpop.f32.mrb[19].mxu1  ;;  %v8745_v38 = vadd.f32 %v9623_v37, %v7631_v31 }
 0x514   :  { %v8746_v44 = vadd.f32 %v9624_v43, %v7633_v35 }
 0x515   :  { %v7641_v39 = vadd.f32 %v8742_v30, %v8741_v60  ;;  %v7637_v40 = vadd.f32 %v8743_v33, %v7636_v27 }
 0x517   :  { %v7638_v41 = vadd.f32 %v8744_v36, %v7637_v40  ;;  %v7642_v42 = vadd.f32 %v8745_v38, %v7641_v39 }
 0x519   :  { %7639 = vadd.xlane.f32.xlu0 %v7638_v41  ;;  %v7643_v3 = vadd.f32 %v8746_v44, %v7642_v42 }
 0x51d   :  { %7644 = vadd.xlane.f32.xlu0 %v7643_v3 }
 0x5a6   :  { %v7640_v45 = vpop.xlane.xlu0 %7639 }
 0x5a7   :  { %v7647_v46 = vmul.f32 0.001953125, %v7640_v45 }
 0x5a9   :  { %v7649_v47 = vsub.f32 %v8739_v57, %v7647_v46  ;;  %v7650_v48 = vsub.f32 %v8740_v23, %v7647_v46  ;;  %v7651_v53 = vsub.f32 %v8743_v33, %v7647_v46  ;;  %v7652_v49 = vsub.f32 %v8744_v36, %v7647_v46 }
 0x5aa   :  { %v7645_v50 = vpop.xlane.xlu0 %7644 }
 0x5ab   :  { %v7648_v51 = vmul.f32 0.001953125, %v7645_v50  ;;  %v7657_v58 = vmul.f32 %v7649_v47, %v7649_v47  ;;  %v7658_v55 = vmul.f32 %v7650_v48, %v7650_v48  ;;  %v7659_v59 = vmul.f32 %v7651_v53, %v7651_v53 }
 0x5ac   :  { %v7660_v1 = vmul.f32 %v7652_v49, %v7652_v49 }
 0x5ad   :  { %v7653_v15 = vsub.f32 %v8741_v60, %v7648_v51  ;;  %v7654_v61 = vsub.f32 %v8742_v30, %v7648_v51  ;;  %v7665_v62 = vadd.f32 %v7658_v55, %v7657_v58  ;;  %v7655_v0 = vsub.f32 %v8745_v38, %v7648_v51 }
 0x5ae   :  { %v7656_v2 = vsub.f32 %v8746_v44, %v7648_v51 }
 0x5af   :  { %v7666_v25 = vadd.f32 %v7665_v62, %v7659_v59  ;;  %v7661_v5 = vmul.f32 %v7653_v15, %v7653_v15  ;;  %v7662_v7 = vmul.f32 %v7654_v61, %v7654_v61  ;;  %v7663_v9 = vmul.f32 %v7655_v0, %v7655_v0 }
 0x5b0   :  { %v7664_v11 = vmul.f32 %v7656_v2, %v7656_v2 }
 0x5b1   :  { %v7667_v8 = vadd.f32 %v7666_v25, %v7660_v1  ;;  %v7670_v10 = vadd.f32 %v7662_v7, %v7661_v5 }
 0x5b3   :  { %7668 = vadd.xlane.f32.xlu1 %v7667_v8  ;;  %v7671_v12 = vadd.f32 %v7670_v10, %v7663_v9 }
 0x5b5   :  { %v7672_v13 = vadd.f32 %v7671_v12, %v7664_v11 }
 0x5b7   :  { %7673 = vadd.xlane.f32.xlu1 %v7672_v13 }
 0x640   :  { %v7669_v28 = vpop.xlane.xlu1 %7668 }
 0x641   :  { %v7675_v14 = vmul.f32 0.001953125, %v7669_v28 }
 0x643   :  { %v7677_v16 = vadd.f32 1e-05, %v7675_v14 }
 0x644   :  { %v7674_v17 = vpop.xlane.xlu1 %7673 }
 0x645   :  { %9613 = vrsqrt.f32 %v7677_v16  ;;  %v7676_v18 = vmul.f32 0.001953125, %v7674_v17 }
 0x647   :  { %v7678_v52 = vadd.f32 1e-05, %v7676_v18 }
 0x649   :  { %9615 = vrsqrt.f32 %v7678_v52 }
 0x64f   :  { %v9614_v4 = vpop.eup %9613 }
 0x650   :  { %v7681_v19 = vmul.f32 %v9614_v4, %v7649_v47  ;;  %v7682_v63 = vmul.f32 %v9614_v4, %v7650_v48  ;;  %v7683_v20 = vmul.f32 %v9614_v4, %v7651_v53  ;;  %v7684_v57 = vmul.f32 %v9614_v4, %v7652_v49 }
 0x652   :  { %7689 = vst [vmem:[#allocation8] sm:$0xff] %v7681_v19  ;;  %7690 = vst [vmem:[#allocation8 + $0x8] sm:$0xff] %v7682_v63 }
 0x653   :  { %7691 = vst [vmem:[#allocation8 + $0x10] sm:$0xff] %v7683_v20  ;;  %7692 = vst [vmem:[#allocation8 + $0x18] sm:$0xff] %v7684_v57  ;;  %v9616_v21 = vpop.eup %9615 }
 0x654   :  { %v7685_v54 = vmul.f32 %v9616_v21, %v7653_v15  ;;  %v7686_v22 = vmul.f32 %v9616_v21, %v7654_v61  ;;  %v7687_v23 = vmul.f32 %v9616_v21, %v7655_v0  ;;  %v7688_v24 = vmul.f32 %v9616_v21, %v7656_v2 }
 0x656   :  { %7693 = vst [vmem:[#allocation8 + $0x20] sm:$0xff] %v7685_v54  ;;  %7694 = vst [vmem:[#allocation8 + $0x28] sm:$0xff] %v7686_v22 }
 0x657   :  { %7695 = vst [vmem:[#allocation8 + $0x30] sm:$0xff] %v7687_v23  ;;  %7696 = vst [vmem:[#allocation8 + $0x38] sm:$0xff] %v7688_v24 }
 0x658   :  { %9702 = shalt.err (!%p9699_p0)
}
 0x659   :  { %s9703_s29 = scalar_lea.hbm %s9910_s3, 1024 }
 0x65a   :  { %p9704_p1 = scmp.ne.s32.totalorder %s9910_s3, %s9703_s29  ;;  %p9707_p2 = scmp.lt.u32.totalorder %s9703_s29, %s9910_s3 }
 0x65c   :  { %p9709_p3 = pnand %p9707_p2, %p9704_p1 }
 0x65e   :  { %9712 = shalt.err (!%p9709_p3)
}
 0x65f   :  { %7708 = dma.vmem_to_hbm [thread:$0]  %s7703_s25, 1024, %s9910_s3, [#allocation4], %s9723_s1, %s9723_s1, %s9724_s9  }
 0x660   :  { %9717 = dma.done.wait [#allocation4], 1024  }
 0x661   :  { %9718 = vsyncadd [#allocation4], 4294966272 }
 0x662   :  { %7712 = vsyncpa [#allocation3], 1 }
 0x663   :  { %7713 = vsyncpa [#allocation6], 1 }
 0x664   :  { %7714 = vsyncpa [#allocation4], 1 }

</bundles_post_ra>
